<compile_context>
chip_gen: v5e
topology: v5e:2x2
jax: 0.10.0
libtpu: 0.0.40
codegen_flags: <defaults>
</compile_context>

<pallas_src>
import functools

import numpy as np
import jax
import jax.numpy as jnp
from jax import lax
from jax.experimental import pallas as pl
from jax.experimental.pallas import tpu as pltpu

_BN_EPS = 1e-5
_FWD_PREC = lax.Precision.HIGHEST   # forward DFT only; conv / inverse use DEFAULT
_VMEM_LIMIT = 48 * 1024 * 1024      # <= v7x physical VMEM; plenty of headroom here


# ---------------------------------------------------------------------------
# stage 1: forward 2-D DFT      x (N*C*H, W) -> spectrum (N, 2C, H, W) [Re | Im]
# ---------------------------------------------------------------------------
def _fft2_kernel(x_ref, fwr_ref, fwi_ref, fh_ref, spec_ref):
    n, c2, h, w = spec_ref.shape
    c = c2 // 2
    nc = n * c

    x2 = x_ref[...]                                             # (N*C*H, W)
    # W-axis DFT (contract w): two rank-2 MXU matmuls.
    ar = jnp.dot(x2, fwr_ref[...], preferred_element_type=jnp.float32,
                 precision=_FWD_PREC)
    ai = jnp.dot(x2, fwi_ref[...], preferred_element_type=jnp.float32,
                 precision=_FWD_PREC)
    ar3 = ar.reshape(nc, h, w)
    ai3 = ai.reshape(nc, h, w)

    # H-axis DFT: fused real/imag via the row-stacked (2H, H) matrix [Fh_r; Fh_i].
    fh_b = jnp.broadcast_to(fh_ref[...], (nc, 2 * h, h))
    pr = jnp.einsum('buh,bhw->buw', fh_b, ar3,
                    preferred_element_type=jnp.float32, precision=_FWD_PREC)
    pi = jnp.einsum('buh,bhw->buw', fh_b, ai3,
                    preferred_element_type=jnp.float32, precision=_FWD_PREC)

    # complex combine:  Re = Fh_r@Ar - Fh_i@Ai,  Im = Fh_i@Ar + Fh_r@Ai
    spec_ref[:, :c] = (pr[:, :h, :] - pi[:, h:, :]).reshape(n, c, h, w)
    spec_ref[:, c:] = (pr[:, h:, :] + pi[:, :h, :]).reshape(n, c, h, w)


# ---------------------------------------------------------------------------
# stage 2: 1x1 conv + BatchNorm2d (training-mode batch stats) + ReLU
#          spectrum slab (N, 2C, H*W) -> t_r, t_i  each (N, C, H*W)   (lane-dense)
# ---------------------------------------------------------------------------
def _bn_relu(t, gamma, beta, eps):
    # two-pass batch statistics (biased variance), one lane-reduce per channel row
    n, _, p = t.shape
    cnt = 1.0 / (n * p)
    mean = jnp.sum(jnp.sum(t, axis=2, keepdims=True), axis=0, keepdims=True) * cnt
    d = t - mean
    var = jnp.sum(jnp.sum(d * d, axis=2, keepdims=True), axis=0, keepdims=True) * cnt
    return jnp.maximum(d * lax.rsqrt(var + eps) * gamma + beta, 0.0)


def _conv_bn_relu_kernel(spec_ref, wre_ref, wim_ref, gr_ref, br_ref,
                         gi_ref, bi_ref, tr_ref, ti_ref, *, eps):
    n, c, p = tr_ref.shape
    c2 = spec_ref.shape[1]
    spec = spec_ref[...]                                        # (N, 2C, H*W)

    # 1x1 conv as batched MXU matmuls with a 256-wide free dimension.  The output
    # channels are split into the "real" (first C) and "imag" (last C) halves so both
    # halves stay lane-dense and no misaligned channel slicing is needed later.
    wre_b = jnp.broadcast_to(wre_ref[...], (n, c, c2))
    wim_b = jnp.broadcast_to(wim_ref[...], (n, c, c2))
    yr = jnp.einsum('noc,ncp->nop', wre_b, spec, preferred_element_type=jnp.float32)
    yi = jnp.einsum('noc,ncp->nop', wim_b, spec, preferred_element_type=jnp.float32)

    tr_ref[...] = _bn_relu(yr, gr_ref[...], br_ref[...], eps)
    ti_ref[...] = _bn_relu(yi, gi_ref[...], bi_ref[...], eps)


# ---------------------------------------------------------------------------
# stage 3: inverse 2-D DFT (real part)    zr, zi (N*C, H, W) -> out (N*C, H, W)
# ---------------------------------------------------------------------------
def _ifft2_kernel(zr_ref, zi_ref, fha_ref, fhb_ref, fwr_ref, fwi_ref, o_ref):
    nc, h, w = o_ref.shape

    # conj(Fh) @ Z, fused real/imag via row-stacked (2H, H) matrices:
    #   fha = [Fh_r; -Fh_i],  fhb = [Fh_i; Fh_r]
    #   G = fha @ Zr + fhb @ Zi  ->  rows [:H] = Gr, rows [H:] = Gi
    fha_b = jnp.broadcast_to(fha_ref[...], (nc, 2 * h, h))
    fhb_b = jnp.broadcast_to(fhb_ref[...], (nc, 2 * h, h))
    g = (jnp.einsum('byh,bhw->byw', fha_b, zr_ref[...],
                    preferred_element_type=jnp.float32)
         + jnp.einsum('byh,bhw->byw', fhb_b, zi_ref[...],
                      preferred_element_type=jnp.float32))

    gr = g[:, :h, :].reshape(nc * h, w)
    gi = g[:, h:, :].reshape(nc * h, w)
    # Re( G @ conj(Fw) ) / (H*W)
    o = (jnp.dot(gr, fwr_ref[...], preferred_element_type=jnp.float32)
         + jnp.dot(gi, fwi_ref[...], preferred_element_type=jnp.float32))
    o_ref[...] = (o * (1.0 / (h * w))).reshape(nc, h, w)


# ---------------------------------------------------------------------------
# wrapper
# ---------------------------------------------------------------------------
def _dft_mats(m):
    # F[a, b] = exp(-2j*pi*a*b/m) = cos(.) - i*sin(.)   (symmetric)
    k = np.arange(m)
    ang = 2.0 * np.pi * np.outer(k, k) / m
    return np.cos(ang).astype(np.float32), (-np.sin(ang)).astype(np.float32)


def _full_spec(shape):
    nd = len(shape)
    return pl.BlockSpec(shape, lambda i, nd=nd: (0,) * nd)


def _pcall(kernel, args, out_shape):
    multi = isinstance(out_shape, (tuple, list))
    shapes = tuple(out_shape) if multi else (out_shape,)
    specs = tuple(_full_spec(s.shape) for s in shapes)
    return pl.pallas_call(
        kernel,
        out_shape=tuple(shapes) if multi else shapes[0],
        grid=(1,),
        in_specs=[_full_spec(a.shape) for a in args],
        out_specs=specs if multi else specs[0],
        compiler_params=pltpu.CompilerParams(
            dimension_semantics=("arbitrary",),
            vmem_limit_bytes=_VMEM_LIMIT),
    )(*args)


@jax.jit
def fourier_unit(x, weight, gamma, beta):
    """Forward pass of torch FourierUnit.  x: (N, C, H, W); weight: (2C, 2C)."""
    n, c, h, w = x.shape
    fhr, fhi = _dft_mats(h)
    fwr_np, fwi_np = _dft_mats(w)

    fwr = jnp.asarray(fwr_np)
    fwi = jnp.asarray(fwi_np)
    fh_fwd = jnp.asarray(np.concatenate([fhr, fhi], axis=0))       # (2H, H)
    fh_inv_a = jnp.asarray(np.concatenate([fhr, -fhi], axis=0))    # (2H, H)
    fh_inv_b = jnp.asarray(np.concatenate([fhi, fhr], axis=0))     # (2H, H)

    # stage 1: forward DFT.  Input passed flat as (N*C*H, W) (pure reshape, no copy).
    spec = _pcall(
        _fft2_kernel,
        (x.reshape(n * c * h, w), fwr, fwi, fh_fwd),
        jax.ShapeDtypeStruct((n, 2 * c, h, w), jnp.float32))

    # stage 2: conv + BN + ReLU on the lane-dense (N, 2C, H*W) slab (pure reshape).
    spec_slab = spec.reshape(n, 2 * c, h * w)
    t_r, t_i = _pcall(
        functools.partial(_conv_bn_relu_kernel, eps=_BN_EPS),
        (spec_slab,
         weight[:c, :], weight[c:, :],
         gamma[:c].reshape(1, c, 1), beta[:c].reshape(1, c, 1),
         gamma[c:].reshape(1, c, 1), beta[c:].reshape(1, c, 1)),
        (jax.ShapeDtypeStruct((n, c, h * w), jnp.float32),
         jax.ShapeDtypeStruct((n, c, h * w), jnp.float32)))

    # stage 3: inverse DFT, real part.  Inputs are pure reshapes of stage-2 outputs.
    out = _pcall(
        _ifft2_kernel,
        (t_r.reshape(n * c, h, w), t_i.reshape(n * c, h, w),
         fh_inv_a, fh_inv_b, fwr, fwi),
        jax.ShapeDtypeStruct((n * c, h, w), jnp.float32))

    return out.reshape(n, c, h, w)


# ---------------------------------------------------------------------------
# pure-JAX reference (same training-mode BN semantics) for a sanity check
# ---------------------------------------------------------------------------
@jax.jit
def _reference(x, weight, gamma, beta):
    n, c, h, w = x.shape
    z = jnp.fft.fft2(x, axes=(-2, -1))
    f = jnp.concatenate([jnp.real(z), jnp.imag(z)], axis=1)          # (N, 2C, H, W)
    y = jnp.einsum('oc,nchw->nohw', weight, f, precision=lax.Precision.HIGHEST)
    mean = jnp.mean(y, axis=(0, 2, 3), keepdims=True)
    var = jnp.mean(jnp.square(y - mean), axis=(0, 2, 3), keepdims=True)
    y = (y - mean) / jnp.sqrt(var + _BN_EPS)
    y = y * gamma.reshape(1, -1, 1, 1) + beta.reshape(1, -1, 1, 1)
    y = jnp.maximum(y, 0.0)
    zc = y[:, :c] + 1j * y[:, c:]
    return jnp.real(jnp.fft.ifft2(zc, axes=(-2, -1)))


if __name__ == "__main__":
    key = jax.random.PRNGKey(0)
    kx, kw, kg, kb = jax.random.split(key, 4)
    n, c, h, w = 2, 4, 16, 16
    x = jax.random.normal(kx, (n, c, h, w), jnp.float32)
    weight = jax.random.normal(kw, (2 * c, 2 * c), jnp.float32) / np.sqrt(2 * c)
    gamma = 1.0 + 0.1 * jax.random.normal(kg, (2 * c,), jnp.float32)
    beta = 0.1 * jax.random.normal(kb, (2 * c,), jnp.float32)

    out = jax.block_until_ready(fourier_unit(x, weight, gamma, beta))
    ref = jax.block_until_ready(_reference(x, weight, gamma, beta))

    assert out.shape == (n, c, h, w), out.shape
    assert bool(jnp.all(jnp.isfinite(out)))
    max_err = float(jnp.max(jnp.abs(out - ref)))
    assert max_err < 5e-2, f"max |kernel - reference| = {max_err}"
    print("KERNEL_OK")
</pallas_src>

<mosaic_0001>
module attributes {stable_mosaic.version = 11 : i64} {
  func.func @_conv_bn_relu_kernel(%arg0: i32, %arg1: memref<2x8x256xf32, #tpu.memory_space<vmem>>, %arg2: memref<4x8xf32, #tpu.memory_space<vmem>>, %arg3: memref<4x8xf32, #tpu.memory_space<vmem>>, %arg4: memref<1x4x1xf32, #tpu.memory_space<vmem>>, %arg5: memref<1x4x1xf32, #tpu.memory_space<vmem>>, %arg6: memref<1x4x1xf32, #tpu.memory_space<vmem>>, %arg7: memref<1x4x1xf32, #tpu.memory_space<vmem>>, %arg8: memref<2x4x256xf32, #tpu.memory_space<vmem>>, %arg9: memref<2x4x256xf32, #tpu.memory_space<vmem>>) attributes {dimension_semantics = [#tpu.dimension_semantics<arbitrary>], iteration_bounds = array<i64: 1>, scalar_prefetch = 0 : i64, scratch_operands = 0 : i64, tpu.core_type = #tpu.core_type<tc>, window_params = [{pipeline_mode = #tpu.pipeline_mode<synchronous>, transform_indices = @transform_0, window_bounds = array<i64: 2, 8, 256>}, {pipeline_mode = #tpu.pipeline_mode<synchronous>, transform_indices = @transform_1, window_bounds = array<i64: 4, 8>}, {pipeline_mode = #tpu.pipeline_mode<synchronous>, transform_indices = @transform_2, window_bounds = array<i64: 4, 8>}, {pipeline_mode = #tpu.pipeline_mode<synchronous>, transform_indices = @transform_3, window_bounds = array<i64: 1, 4, 1>}, {pipeline_mode = #tpu.pipeline_mode<synchronous>, transform_indices = @transform_4, window_bounds = array<i64: 1, 4, 1>}, {pipeline_mode = #tpu.pipeline_mode<synchronous>, transform_indices = @transform_5, window_bounds = array<i64: 1, 4, 1>}, {pipeline_mode = #tpu.pipeline_mode<synchronous>, transform_indices = @transform_6, window_bounds = array<i64: 1, 4, 1>}, {pipeline_mode = #tpu.pipeline_mode<synchronous>, transform_indices = @transform_7, window_bounds = array<i64: 2, 4, 256>}, {pipeline_mode = #tpu.pipeline_mode<synchronous>, transform_indices = @transform_8, window_bounds = array<i64: 2, 4, 256>}]} {
    %c0 = arith.constant 0 : index
    %c0_0 = arith.constant 0 : index
    %c0_1 = arith.constant 0 : index
    %0 = vector.load %arg1[%c0, %c0_0, %c0_1] : memref<2x8x256xf32, #tpu.memory_space<vmem>>, vector<2x8x256xf32>
    %c0_2 = arith.constant 0 : index
    %c0_3 = arith.constant 0 : index
    %1 = vector.load %arg2[%c0_2, %c0_3] : memref<4x8xf32, #tpu.memory_space<vmem>>, vector<4x8xf32>
    %2 = vector.shape_cast %1 : vector<4x8xf32> to vector<1x4x8xf32>
    %3 = vector.broadcast %2 : vector<1x4x8xf32> to vector<2x4x8xf32>
    %c0_4 = arith.constant 0 : index
    %c0_5 = arith.constant 0 : index
    %4 = vector.load %arg3[%c0_4, %c0_5] : memref<4x8xf32, #tpu.memory_space<vmem>>, vector<4x8xf32>
    %5 = vector.shape_cast %4 : vector<4x8xf32> to vector<1x4x8xf32>
    %6 = vector.broadcast %5 : vector<1x4x8xf32> to vector<2x4x8xf32>
    "tpu.trace_start"() <{level = 10 : i32, message = "noc,ncp->nop"}> : () -> ()
    %cst = arith.constant dense<0.000000e+00> : vector<2x4x256xf32>
    %7 = tpu.matmul %3, %0, %cst {dimension_numbers = #tpu.dot_dimension_numbers<[2], [1], [1], [2], [0, 0, 0, 1, 1, 2], [0], [0]>} : vector<2x4x8xf32>, vector<2x8x256xf32>, vector<2x4x256xf32> -> vector<2x4x256xf32>
    %cst_6 = arith.constant dense<0.000000e+00> : vector<2x4x256xf32>
    %8 = tpu.matmul %6, %0, %cst_6 {dimension_numbers = #tpu.dot_dimension_numbers<[2], [1], [1], [2], [0, 0, 0, 1, 1, 2], [0], [0]>} : vector<2x4x8xf32>, vector<2x8x256xf32>, vector<2x4x256xf32> -> vector<2x4x256xf32>
    "tpu.trace_stop"() : () -> ()
    %c0_7 = arith.constant 0 : index
    %c0_8 = arith.constant 0 : index
    %c0_9 = arith.constant 0 : index
    %9 = vector.load %arg4[%c0_7, %c0_8, %c0_9] : memref<1x4x1xf32, #tpu.memory_space<vmem>>, vector<1x4x1xf32>
    %c0_10 = arith.constant 0 : index
    %c0_11 = arith.constant 0 : index
    %c0_12 = arith.constant 0 : index
    %10 = vector.load %arg5[%c0_10, %c0_11, %c0_12] : memref<1x4x1xf32, #tpu.memory_space<vmem>>, vector<1x4x1xf32>
    %cst_13 = arith.constant dense<0.000000e+00> : vector<2x4xf32>
    %11 = vector.multi_reduction <add>, %7, %cst_13 [2] : vector<2x4x256xf32> to vector<2x4xf32>
    %12 = vector.shape_cast %11 : vector<2x4xf32> to vector<2x4x1xf32>
    %cst_14 = arith.constant dense<0.000000e+00> : vector<4x1xf32>
    %13 = vector.multi_reduction <add>, %12, %cst_14 [0] : vector<2x4x1xf32> to vector<4x1xf32>
    %14 = vector.shape_cast %13 : vector<4x1xf32> to vector<1x4x1xf32>
    %cst_15 = arith.constant 0.001953125 : f32
    %15 = vector.broadcast %cst_15 : f32 to vector<1x4x1xf32>
    %16 = arith.mulf %14, %15 : vector<1x4x1xf32>
    %17 = vector.broadcast %16 : vector<1x4x1xf32> to vector<2x4x256xf32>
    %18 = arith.subf %7, %17 : vector<2x4x256xf32>
    %19 = arith.mulf %18, %18 : vector<2x4x256xf32>
    %cst_16 = arith.constant dense<0.000000e+00> : vector<2x4xf32>
    %20 = vector.multi_reduction <add>, %19, %cst_16 [2] : vector<2x4x256xf32> to vector<2x4xf32>
    %21 = vector.shape_cast %20 : vector<2x4xf32> to vector<2x4x1xf32>
    %cst_17 = arith.constant dense<0.000000e+00> : vector<4x1xf32>
    %22 = vector.multi_reduction <add>, %21, %cst_17 [0] : vector<2x4x1xf32> to vector<4x1xf32>
    %23 = vector.shape_cast %22 : vector<4x1xf32> to vector<1x4x1xf32>
    %cst_18 = arith.constant 0.001953125 : f32
    %24 = vector.broadcast %cst_18 : f32 to vector<1x4x1xf32>
    %25 = arith.mulf %23, %24 : vector<1x4x1xf32>
    %cst_19 = arith.constant 9.99999974E-6 : f32
    %26 = vector.broadcast %cst_19 : f32 to vector<1x4x1xf32>
    %27 = arith.addf %25, %26 : vector<1x4x1xf32>
    %28 = math.rsqrt %27 : vector<1x4x1xf32>
    %29 = vector.broadcast %28 : vector<1x4x1xf32> to vector<2x4x256xf32>
    %30 = arith.mulf %18, %29 : vector<2x4x256xf32>
    %31 = vector.broadcast %9 : vector<1x4x1xf32> to vector<2x4x256xf32>
    %32 = arith.mulf %30, %31 : vector<2x4x256xf32>
    %33 = vector.broadcast %10 : vector<1x4x1xf32> to vector<2x4x256xf32>
    %34 = arith.addf %32, %33 : vector<2x4x256xf32>
    %cst_20 = arith.constant 0.000000e+00 : f32
    %35 = vector.broadcast %cst_20 : f32 to vector<2x4x256xf32>
    %36 = arith.maximumf %34, %35 : vector<2x4x256xf32>
    %c0_21 = arith.constant 0 : index
    %c0_22 = arith.constant 0 : index
    %c0_23 = arith.constant 0 : index
    %37 = vector.load %arg8[%c0_21, %c0_22, %c0_23] : memref<2x4x256xf32, #tpu.memory_space<vmem>>, vector<2x4x256xf32>
    tpu.vector_store %arg8[%c0_21, %c0_22, %c0_23], %36 {strides = array<i32>} : memref<2x4x256xf32, #tpu.memory_space<vmem>>, vector<2x4x256xf32>,
    %c0_24 = arith.constant 0 : index
    %c0_25 = arith.constant 0 : index
    %c0_26 = arith.constant 0 : index
    %38 = vector.load %arg6[%c0_24, %c0_25, %c0_26] : memref<1x4x1xf32, #tpu.memory_space<vmem>>, vector<1x4x1xf32>
    %c0_27 = arith.constant 0 : index
    %c0_28 = arith.constant 0 : index
    %c0_29 = arith.constant 0 : index
    %39 = vector.load %arg7[%c0_27, %c0_28, %c0_29] : memref<1x4x1xf32, #tpu.memory_space<vmem>>, vector<1x4x1xf32>
    %cst_30 = arith.constant dense<0.000000e+00> : vector<2x4xf32>
    %40 = vector.multi_reduction <add>, %8, %cst_30 [2] : vector<2x4x256xf32> to vector<2x4xf32>
    %41 = vector.shape_cast %40 : vector<2x4xf32> to vector<2x4x1xf32>
    %cst_31 = arith.constant dense<0.000000e+00> : vector<4x1xf32>
    %42 = vector.multi_reduction <add>, %41, %cst_31 [0] : vector<2x4x1xf32> to vector<4x1xf32>
    %43 = vector.shape_cast %42 : vector<4x1xf32> to vector<1x4x1xf32>
    %cst_32 = arith.constant 0.001953125 : f32
    %44 = vector.broadcast %cst_32 : f32 to vector<1x4x1xf32>
    %45 = arith.mulf %43, %44 : vector<1x4x1xf32>
    %46 = vector.broadcast %45 : vector<1x4x1xf32> to vector<2x4x256xf32>
    %47 = arith.subf %8, %46 : vector<2x4x256xf32>
    %48 = arith.mulf %47, %47 : vector<2x4x256xf32>
    %cst_33 = arith.constant dense<0.000000e+00> : vector<2x4xf32>
    %49 = vector.multi_reduction <add>, %48, %cst_33 [2] : vector<2x4x256xf32> to vector<2x4xf32>
    %50 = vector.shape_cast %49 : vector<2x4xf32> to vector<2x4x1xf32>
    %cst_34 = arith.constant dense<0.000000e+00> : vector<4x1xf32>
    %51 = vector.multi_reduction <add>, %50, %cst_34 [0] : vector<2x4x1xf32> to vector<4x1xf32>
    %52 = vector.shape_cast %51 : vector<4x1xf32> to vector<1x4x1xf32>
    %cst_35 = arith.constant 0.001953125 : f32
    %53 = vector.broadcast %cst_35 : f32 to vector<1x4x1xf32>
    %54 = arith.mulf %52, %53 : vector<1x4x1xf32>
    %cst_36 = arith.constant 9.99999974E-6 : f32
    %55 = vector.broadcast %cst_36 : f32 to vector<1x4x1xf32>
    %56 = arith.addf %54, %55 : vector<1x4x1xf32>
    %57 = math.rsqrt %56 : vector<1x4x1xf32>
    %58 = vector.broadcast %57 : vector<1x4x1xf32> to vector<2x4x256xf32>
    %59 = arith.mulf %47, %58 : vector<2x4x256xf32>
    %60 = vector.broadcast %38 : vector<1x4x1xf32> to vector<2x4x256xf32>
    %61 = arith.mulf %59, %60 : vector<2x4x256xf32>
    %62 = vector.broadcast %39 : vector<1x4x1xf32> to vector<2x4x256xf32>
    %63 = arith.addf %61, %62 : vector<2x4x256xf32>
    %cst_37 = arith.constant 0.000000e+00 : f32
    %64 = vector.broadcast %cst_37 : f32 to vector<2x4x256xf32>
    %65 = arith.maximumf %63, %64 : vector<2x4x256xf32>
    %c0_38 = arith.constant 0 : index
    %c0_39 = arith.constant 0 : index
    %c0_40 = arith.constant 0 : index
    %66 = vector.load %arg9[%c0_38, %c0_39, %c0_40] : memref<2x4x256xf32, #tpu.memory_space<vmem>>, vector<2x4x256xf32>
    tpu.vector_store %arg9[%c0_38, %c0_39, %c0_40], %65 {strides = array<i32>} : memref<2x4x256xf32, #tpu.memory_space<vmem>>, vector<2x4x256xf32>,
    return
  }
  func.func @transform_0(%arg0: i32) -> (i32, i32, i32) {
    %c0_i32 = arith.constant 0 : i32
    %c0_i32_0 = arith.constant 0 : i32
    %c0_i32_1 = arith.constant 0 : i32
    %c0_i32_2 = arith.constant 0 : i32
    return %c0_i32, %c0_i32_0, %c0_i32_1 : i32, i32, i32
  }
  func.func @transform_1(%arg0: i32) -> (i32, i32) {
    %c0_i32 = arith.constant 0 : i32
    %c0_i32_0 = arith.constant 0 : i32
    %c0_i32_1 = arith.constant 0 : i32
    return %c0_i32, %c0_i32_0 : i32, i32
  }
  func.func @transform_2(%arg0: i32) -> (i32, i32) {
    %c0_i32 = arith.constant 0 : i32
    %c0_i32_0 = arith.constant 0 : i32
    %c0_i32_1 = arith.constant 0 : i32
    return %c0_i32, %c0_i32_0 : i32, i32
  }
  func.func @transform_3(%arg0: i32) -> (i32, i32, i32) {
    %c0_i32 = arith.constant 0 : i32
    %c0_i32_0 = arith.constant 0 : i32
    %c0_i32_1 = arith.constant 0 : i32
    %c0_i32_2 = arith.constant 0 : i32
    return %c0_i32, %c0_i32_0, %c0_i32_1 : i32, i32, i32
  }
  func.func @transform_4(%arg0: i32) -> (i32, i32, i32) {
    %c0_i32 = arith.constant 0 : i32
    %c0_i32_0 = arith.constant 0 : i32
    %c0_i32_1 = arith.constant 0 : i32
    %c0_i32_2 = arith.constant 0 : i32
    return %c0_i32, %c0_i32_0, %c0_i32_1 : i32, i32, i32
  }
  func.func @transform_5(%arg0: i32) -> (i32, i32, i32) {
    %c0_i32 = arith.constant 0 : i32
    %c0_i32_0 = arith.constant 0 : i32
    %c0_i32_1 = arith.constant 0 : i32
    %c0_i32_2 = arith.constant 0 : i32
    return %c0_i32, %c0_i32_0, %c0_i32_1 : i32, i32, i32
  }
  func.func @transform_6(%arg0: i32) -> (i32, i32, i32) {
    %c0_i32 = arith.constant 0 : i32
    %c0_i32_0 = arith.constant 0 : i32
    %c0_i32_1 = arith.constant 0 : i32
    %c0_i32_2 = arith.constant 0 : i32
    return %c0_i32, %c0_i32_0, %c0_i32_1 : i32, i32, i32
  }
  func.func @transform_7(%arg0: i32) -> (i32, i32, i32) {
    %c0_i32 = arith.constant 0 : i32
    %c0_i32_0 = arith.constant 0 : i32
    %c0_i32_1 = arith.constant 0 : i32
    %c0_i32_2 = arith.constant 0 : i32
    return %c0_i32, %c0_i32_0, %c0_i32_1 : i32, i32, i32
  }
  func.func @transform_8(%arg0: i32) -> (i32, i32, i32) {
    %c0_i32 = arith.constant 0 : i32
    %c0_i32_0 = arith.constant 0 : i32
    %c0_i32_1 = arith.constant 0 : i32
    %c0_i32_2 = arith.constant 0 : i32
    return %c0_i32, %c0_i32_0, %c0_i32_1 : i32, i32, i32
  }
}

module attributes {stable_mosaic.version = 11 : i64} {
  func.func @_fft2_kernel(%arg0: i32, %arg1: memref<128x16xf32, #tpu.memory_space<vmem>>, %arg2: memref<16x16xf32, #tpu.memory_space<vmem>>, %arg3: memref<16x16xf32, #tpu.memory_space<vmem>>, %arg4: memref<32x16xf32, #tpu.memory_space<vmem>>, %arg5: memref<2x8x16x16xf32, #tpu.memory_space<vmem>>) attributes {dimension_semantics = [#tpu.dimension_semantics<arbitrary>], iteration_bounds = array<i64: 1>, scalar_prefetch = 0 : i64, scratch_operands = 0 : i64, tpu.core_type = #tpu.core_type<tc>, window_params = [{pipeline_mode = #tpu.pipeline_mode<synchronous>, transform_indices = @transform_0, window_bounds = array<i64: 128, 16>}, {pipeline_mode = #tpu.pipeline_mode<synchronous>, transform_indices = @transform_1, window_bounds = array<i64: 16, 16>}, {pipeline_mode = #tpu.pipeline_mode<synchronous>, transform_indices = @transform_2, window_bounds = array<i64: 16, 16>}, {pipeline_mode = #tpu.pipeline_mode<synchronous>, transform_indices = @transform_3, window_bounds = array<i64: 32, 16>}, {pipeline_mode = #tpu.pipeline_mode<synchronous>, transform_indices = @transform_4, window_bounds = array<i64: 2, 8, 16, 16>}]} {
    %c0 = arith.constant 0 : index
    %c0_0 = arith.constant 0 : index
    %0 = vector.load %arg1[%c0, %c0_0] : memref<128x16xf32, #tpu.memory_space<vmem>>, vector<128x16xf32>
    %c0_1 = arith.constant 0 : index
    %c0_2 = arith.constant 0 : index
    %1 = vector.load %arg2[%c0_1, %c0_2] : memref<16x16xf32, #tpu.memory_space<vmem>>, vector<16x16xf32>
    %cst = arith.constant dense<0.000000e+00> : vector<128x16xf32>
    %2 = tpu.matmul %0, %1, %cst {dimension_numbers = #tpu.dot_dimension_numbers<[1], [0], [0], [1], [0, 0, 1, 1], [], []>, precision = #tpu.contract_precision<fp32>} : vector<128x16xf32>, vector<16x16xf32>, vector<128x16xf32> -> vector<128x16xf32>
    %c0_3 = arith.constant 0 : index
    %c0_4 = arith.constant 0 : index
    %3 = vector.load %arg3[%c0_3, %c0_4] : memref<16x16xf32, #tpu.memory_space<vmem>>, vector<16x16xf32>
    %cst_5 = arith.constant dense<0.000000e+00> : vector<128x16xf32>
    %4 = tpu.matmul %0, %3, %cst_5 {dimension_numbers = #tpu.dot_dimension_numbers<[1], [0], [0], [1], [0, 0, 1, 1], [], []>, precision = #tpu.contract_precision<fp32>} : vector<128x16xf32>, vector<16x16xf32>, vector<128x16xf32> -> vector<128x16xf32>
    %5 = vector.shape_cast %2 : vector<128x16xf32> to vector<8x16x16xf32>
    %6 = vector.shape_cast %4 : vector<128x16xf32> to vector<8x16x16xf32>
    %c0_6 = arith.constant 0 : index
    %c0_7 = arith.constant 0 : index
    %7 = vector.load %arg4[%c0_6, %c0_7] : memref<32x16xf32, #tpu.memory_space<vmem>>, vector<32x16xf32>
    %8 = vector.shape_cast %7 : vector<32x16xf32> to vector<1x32x16xf32>
    %9 = vector.broadcast %8 : vector<1x32x16xf32> to vector<8x32x16xf32>
    "tpu.trace_start"() <{level = 10 : i32, message = "buh,bhw->buw"}> : () -> ()
    %cst_8 = arith.constant dense<0.000000e+00> : vector<8x32x16xf32>
    %10 = tpu.matmul %9, %5, %cst_8 {dimension_numbers = #tpu.dot_dimension_numbers<[2], [1], [1], [2], [0, 0, 0, 1, 1, 2], [0], [0]>, precision = #tpu.contract_precision<fp32>} : vector<8x32x16xf32>, vector<8x16x16xf32>, vector<8x32x16xf32> -> vector<8x32x16xf32>
    %cst_9 = arith.constant dense<0.000000e+00> : vector<8x32x16xf32>
    %11 = tpu.matmul %9, %6, %cst_9 {dimension_numbers = #tpu.dot_dimension_numbers<[2], [1], [1], [2], [0, 0, 0, 1, 1, 2], [0], [0]>, precision = #tpu.contract_precision<fp32>} : vector<8x32x16xf32>, vector<8x16x16xf32>, vector<8x32x16xf32> -> vector<8x32x16xf32>
    "tpu.trace_stop"() : () -> ()
    %12 = vector.extract_strided_slice %10 {offsets = [0, 0, 0], sizes = [8, 16, 16], strides = [1, 1, 1]} : vector<8x32x16xf32> to vector<8x16x16xf32>
    %13 = vector.extract_strided_slice %11 {offsets = [0, 16, 0], sizes = [8, 16, 16], strides = [1, 1, 1]} : vector<8x32x16xf32> to vector<8x16x16xf32>
    %14 = arith.subf %12, %13 : vector<8x16x16xf32>
    %15 = vector.shape_cast %14 : vector<8x16x16xf32> to vector<2x4x16x16xf32>
    %c0_10 = arith.constant 0 : index
    %c0_11 = arith.constant 0 : index
    %c0_12 = arith.constant 0 : index
    %c0_13 = arith.constant 0 : index
    %16 = vector.load %arg5[%c0_10, %c0_11, %c0_12, %c0_13] : memref<2x8x16x16xf32, #tpu.memory_space<vmem>>, vector<2x4x16x16xf32>
    tpu.vector_store %arg5[%c0_10, %c0_11, %c0_12, %c0_13], %15 {strides = array<i32>} : memref<2x8x16x16xf32, #tpu.memory_space<vmem>>, vector<2x4x16x16xf32>,
    %17 = vector.extract_strided_slice %10 {offsets = [0, 16, 0], sizes = [8, 16, 16], strides = [1, 1, 1]} : vector<8x32x16xf32> to vector<8x16x16xf32>
    %18 = vector.extract_strided_slice %11 {offsets = [0, 0, 0], sizes = [8, 16, 16], strides = [1, 1, 1]} : vector<8x32x16xf32> to vector<8x16x16xf32>
    %19 = arith.addf %17, %18 : vector<8x16x16xf32>
    %20 = vector.shape_cast %19 : vector<8x16x16xf32> to vector<2x4x16x16xf32>
    %c0_14 = arith.constant 0 : index
    %c4 = arith.constant 4 : index
    %c0_15 = arith.constant 0 : index
    %c0_16 = arith.constant 0 : index
    %21 = vector.load %arg5[%c0_14, %c4, %c0_15, %c0_16] : memref<2x8x16x16xf32, #tpu.memory_space<vmem>>, vector<2x4x16x16xf32>
    tpu.vector_store %arg5[%c0_14, %c4, %c0_15, %c0_16], %20 {strides = array<i32>} : memref<2x8x16x16xf32, #tpu.memory_space<vmem>>, vector<2x4x16x16xf32>,
    return
  }
  func.func @transform_0(%arg0: i32) -> (i32, i32) {
    %c0_i32 = arith.constant 0 : i32
    %c0_i32_0 = arith.constant 0 : i32
    %c0_i32_1 = arith.constant 0 : i32
    return %c0_i32, %c0_i32_0 : i32, i32
  }
  func.func @transform_1(%arg0: i32) -> (i32, i32) {
    %c0_i32 = arith.constant 0 : i32
    %c0_i32_0 = arith.constant 0 : i32
    %c0_i32_1 = arith.constant 0 : i32
    return %c0_i32, %c0_i32_0 : i32, i32
  }
  func.func @transform_2(%arg0: i32) -> (i32, i32) {
    %c0_i32 = arith.constant 0 : i32
    %c0_i32_0 = arith.constant 0 : i32
    %c0_i32_1 = arith.constant 0 : i32
    return %c0_i32, %c0_i32_0 : i32, i32
  }
  func.func @transform_3(%arg0: i32) -> (i32, i32) {
    %c0_i32 = arith.constant 0 : i32
    %c0_i32_0 = arith.constant 0 : i32
    %c0_i32_1 = arith.constant 0 : i32
    return %c0_i32, %c0_i32_0 : i32, i32
  }
  func.func @transform_4(%arg0: i32) -> (i32, i32, i32, i32) {
    %c0_i32 = arith.constant 0 : i32
    %c0_i32_0 = arith.constant 0 : i32
    %c0_i32_1 = arith.constant 0 : i32
    %c0_i32_2 = arith.constant 0 : i32
    %c0_i32_3 = arith.constant 0 : i32
    return %c0_i32, %c0_i32_0, %c0_i32_1, %c0_i32_2 : i32, i32, i32, i32
  }
}

module attributes {stable_mosaic.version = 11 : i64} {
  func.func @_ifft2_kernel(%arg0: i32, %arg1: memref<8x16x16xf32, #tpu.memory_space<vmem>>, %arg2: memref<8x16x16xf32, #tpu.memory_space<vmem>>, %arg3: memref<32x16xf32, #tpu.memory_space<vmem>>, %arg4: memref<32x16xf32, #tpu.memory_space<vmem>>, %arg5: memref<16x16xf32, #tpu.memory_space<vmem>>, %arg6: memref<16x16xf32, #tpu.memory_space<vmem>>, %arg7: memref<8x16x16xf32, #tpu.memory_space<vmem>>) attributes {dimension_semantics = [#tpu.dimension_semantics<arbitrary>], iteration_bounds = array<i64: 1>, scalar_prefetch = 0 : i64, scratch_operands = 0 : i64, tpu.core_type = #tpu.core_type<tc>, window_params = [{pipeline_mode = #tpu.pipeline_mode<synchronous>, transform_indices = @transform_0, window_bounds = array<i64: 8, 16, 16>}, {pipeline_mode = #tpu.pipeline_mode<synchronous>, transform_indices = @transform_1, window_bounds = array<i64: 8, 16, 16>}, {pipeline_mode = #tpu.pipeline_mode<synchronous>, transform_indices = @transform_2, window_bounds = array<i64: 32, 16>}, {pipeline_mode = #tpu.pipeline_mode<synchronous>, transform_indices = @transform_3, window_bounds = array<i64: 32, 16>}, {pipeline_mode = #tpu.pipeline_mode<synchronous>, transform_indices = @transform_4, window_bounds = array<i64: 16, 16>}, {pipeline_mode = #tpu.pipeline_mode<synchronous>, transform_indices = @transform_5, window_bounds = array<i64: 16, 16>}, {pipeline_mode = #tpu.pipeline_mode<synchronous>, transform_indices = @transform_6, window_bounds = array<i64: 8, 16, 16>}]} {
    %c0 = arith.constant 0 : index
    %c0_0 = arith.constant 0 : index
    %0 = vector.load %arg3[%c0, %c0_0] : memref<32x16xf32, #tpu.memory_space<vmem>>, vector<32x16xf32>
    %1 = vector.shape_cast %0 : vector<32x16xf32> to vector<1x32x16xf32>
    %2 = vector.broadcast %1 : vector<1x32x16xf32> to vector<8x32x16xf32>
    %c0_1 = arith.constant 0 : index
    %c0_2 = arith.constant 0 : index
    %3 = vector.load %arg4[%c0_1, %c0_2] : memref<32x16xf32, #tpu.memory_space<vmem>>, vector<32x16xf32>
    %4 = vector.shape_cast %3 : vector<32x16xf32> to vector<1x32x16xf32>
    %5 = vector.broadcast %4 : vector<1x32x16xf32> to vector<8x32x16xf32>
    %c0_3 = arith.constant 0 : index
    %c0_4 = arith.constant 0 : index
    %c0_5 = arith.constant 0 : index
    %6 = vector.load %arg1[%c0_3, %c0_4, %c0_5] : memref<8x16x16xf32, #tpu.memory_space<vmem>>, vector<8x16x16xf32>
    "tpu.trace_start"() <{level = 10 : i32, message = "byh,bhw->byw"}> : () -> ()
    %cst = arith.constant dense<0.000000e+00> : vector<8x32x16xf32>
    %7 = tpu.matmul %2, %6, %cst {dimension_numbers = #tpu.dot_dimension_numbers<[2], [1], [1], [2], [0, 0, 0, 1, 1, 2], [0], [0]>} : vector<8x32x16xf32>, vector<8x16x16xf32>, vector<8x32x16xf32> -> vector<8x32x16xf32>
    "tpu.trace_stop"() : () -> ()
    %c0_6 = arith.constant 0 : index
    %c0_7 = arith.constant 0 : index
    %c0_8 = arith.constant 0 : index
    %8 = vector.load %arg2[%c0_6, %c0_7, %c0_8] : memref<8x16x16xf32, #tpu.memory_space<vmem>>, vector<8x16x16xf32>
    "tpu.trace_start"() <{level = 10 : i32, message = "byh,bhw->byw"}> : () -> ()
    %cst_9 = arith.constant dense<0.000000e+00> : vector<8x32x16xf32>
    %9 = tpu.matmul %5, %8, %cst_9 {dimension_numbers = #tpu.dot_dimension_numbers<[2], [1], [1], [2], [0, 0, 0, 1, 1, 2], [0], [0]>} : vector<8x32x16xf32>, vector<8x16x16xf32>, vector<8x32x16xf32> -> vector<8x32x16xf32>
    "tpu.trace_stop"() : () -> ()
    %10 = arith.addf %7, %9 : vector<8x32x16xf32>
    %11 = vector.extract_strided_slice %10 {offsets = [0, 0, 0], sizes = [8, 16, 16], strides = [1, 1, 1]} : vector<8x32x16xf32> to vector<8x16x16xf32>
    %12 = vector.shape_cast %11 : vector<8x16x16xf32> to vector<128x16xf32>
    %13 = vector.extract_strided_slice %10 {offsets = [0, 16, 0], sizes = [8, 16, 16], strides = [1, 1, 1]} : vector<8x32x16xf32> to vector<8x16x16xf32>
    %14 = vector.shape_cast %13 : vector<8x16x16xf32> to vector<128x16xf32>
    %c0_10 = arith.constant 0 : index
    %c0_11 = arith.constant 0 : index
    %15 = vector.load %arg5[%c0_10, %c0_11] : memref<16x16xf32, #tpu.memory_space<vmem>>, vector<16x16xf32>
    %cst_12 = arith.constant dense<0.000000e+00> : vector<128x16xf32>
    %16 = tpu.matmul %12, %15, %cst_12 {dimension_numbers = #tpu.dot_dimension_numbers<[1], [0], [0], [1], [0, 0, 1, 1], [], []>} : vector<128x16xf32>, vector<16x16xf32>, vector<128x16xf32> -> vector<128x16xf32>
    %c0_13 = arith.constant 0 : index
    %c0_14 = arith.constant 0 : index
    %17 = vector.load %arg6[%c0_13, %c0_14] : memref<16x16xf32, #tpu.memory_space<vmem>>, vector<16x16xf32>
    %cst_15 = arith.constant dense<0.000000e+00> : vector<128x16xf32>
    %18 = tpu.matmul %14, %17, %cst_15 {dimension_numbers = #tpu.dot_dimension_numbers<[1], [0], [0], [1], [0, 0, 1, 1], [], []>} : vector<128x16xf32>, vector<16x16xf32>, vector<128x16xf32> -> vector<128x16xf32>
    %19 = arith.addf %16, %18 : vector<128x16xf32>
    %cst_16 = arith.constant 3.906250e-03 : f32
    %20 = vector.broadcast %cst_16 : f32 to vector<128x16xf32>
    %21 = arith.mulf %19, %20 : vector<128x16xf32>
    %22 = vector.shape_cast %21 : vector<128x16xf32> to vector<8x16x16xf32>
    %c0_17 = arith.constant 0 : index
    %c0_18 = arith.constant 0 : index
    %c0_19 = arith.constant 0 : index
    %23 = vector.load %arg7[%c0_17, %c0_18, %c0_19] : memref<8x16x16xf32, #tpu.memory_space<vmem>>, vector<8x16x16xf32>
    tpu.vector_store %arg7[%c0_17, %c0_18, %c0_19], %22 {strides = array<i32>} : memref<8x16x16xf32, #tpu.memory_space<vmem>>, vector<8x16x16xf32>,
    return
  }
  func.func @transform_0(%arg0: i32) -> (i32, i32, i32) {
    %c0_i32 = arith.constant 0 : i32
    %c0_i32_0 = arith.constant 0 : i32
    %c0_i32_1 = arith.constant 0 : i32
    %c0_i32_2 = arith.constant 0 : i32
    return %c0_i32, %c0_i32_0, %c0_i32_1 : i32, i32, i32
  }
  func.func @transform_1(%arg0: i32) -> (i32, i32, i32) {
    %c0_i32 = arith.constant 0 : i32
    %c0_i32_0 = arith.constant 0 : i32
    %c0_i32_1 = arith.constant 0 : i32
    %c0_i32_2 = arith.constant 0 : i32
    return %c0_i32, %c0_i32_0, %c0_i32_1 : i32, i32, i32
  }
  func.func @transform_2(%arg0: i32) -> (i32, i32) {
    %c0_i32 = arith.constant 0 : i32
    %c0_i32_0 = arith.constant 0 : i32
    %c0_i32_1 = arith.constant 0 : i32
    return %c0_i32, %c0_i32_0 : i32, i32
  }
  func.func @transform_3(%arg0: i32) -> (i32, i32) {
    %c0_i32 = arith.constant 0 : i32
    %c0_i32_0 = arith.constant 0 : i32
    %c0_i32_1 = arith.constant 0 : i32
    return %c0_i32, %c0_i32_0 : i32, i32
  }
  func.func @transform_4(%arg0: i32) -> (i32, i32) {
    %c0_i32 = arith.constant 0 : i32
    %c0_i32_0 = arith.constant 0 : i32
    %c0_i32_1 = arith.constant 0 : i32
    return %c0_i32, %c0_i32_0 : i32, i32
  }
  func.func @transform_5(%arg0: i32) -> (i32, i32) {
    %c0_i32 = arith.constant 0 : i32
    %c0_i32_0 = arith.constant 0 : i32
    %c0_i32_1 = arith.constant 0 : i32
    return %c0_i32, %c0_i32_0 : i32, i32
  }
  func.func @transform_6(%arg0: i32) -> (i32, i32, i32) {
    %c0_i32 = arith.constant 0 : i32
    %c0_i32_0 = arith.constant 0 : i32
    %c0_i32_1 = arith.constant 0 : i32
    %c0_i32_2 = arith.constant 0 : i32
    return %c0_i32, %c0_i32_0, %c0_i32_1 : i32, i32, i32
  }
}

</mosaic_0001>

<bundles_post_ra>
// kernel: fourier_unit.4
= control target key start
LH: loop header
LB: loop body
LE: loop exit
PB: predicated region body
PF: predicated region fallthrough
CT: control target
= control target key end

     0   :  { %vm34_vm0 = vcmask 64512   ;;  %v400_v7 = vmov 0   ;;  %vm203_vm1 = vcmask 1043456   ;;  %s564_s0 = inlined_call_operand.vmem [shape: f32[2,8,256], index: 0, kind: input, shape index: {}]   ;;  %s565_s1 = inlined_call_operand.vmem [shape: f32[4,8], index: 1, kind: input, shape index: {}]   ;;  %s566_s2 = inlined_call_operand.vmem [shape: f32[4,8], index: 2, kind: input, shape index: {}]   ;;  %s567_s3 = inlined_call_operand.vmem [shape: f32[1,4,1], index: 3, kind: input, shape index: {}]   ;;  %s568_s5 = inlined_call_operand.vmem [shape: f32[1,4,1], index: 5, kind: input, shape index: {}]   ;;  %s569_s6 = inlined_call_operand.vmem [shape: f32[1,4,1], index: 6, kind: input, shape index: {}]   ;;  %s570_s4 = inlined_call_operand.vmem [shape: f32[1,4,1], index: 4, kind: input, shape index: {}]   ;;  %s571_s7 = inlined_call_operand.vmem [shape: f32[2,4,256], index: 7, kind: output, shape index: {0}]   ;;  %s572_s8 = inlined_call_operand.vmem [shape: f32[2,4,256], index: 8, kind: output, shape index: {1}]  }
   0x1   :  { %v28_v0 = vld [vmem:[%s564_s0] sm:$0xff]  ;;  %v29_v1 = vld [vmem:[%s564_s0 + $0x8] sm:$0xff]  ;;  %v30_v3 = vld [vmem:[%s564_s0 + $0x10] sm:$0xff]  ;;  %393 = vset.pattern.permute.xlu2 %v400_v7  ;;  %394 = vset.pattern.permute.xlu0 %v400_v7 }
   0x2   :  { %v32_v2 = vld [vmem:[%s565_s1] sm:$0xf]  ;;  %53 = vmatpush.msra.mxu0 %v28_v0  ;;  %73 = vmatpush.msra.mxu1 %v29_v1  ;;  %v31_v4 = vld [vmem:[%s564_s0 + $0x18] sm:$0xff] }
   0x3   :  { %384 = vmatmul.msk.f32.vlgmr.msra.gmra.mxu0 %vm34_vm0, %v32_v2  ;;  %385 = vmatmul.msk.f32.vlgmr.msra.gmra.mxu1 %vm34_vm0, %v32_v2  ;;  %v33_v5 = vld [vmem:[%s566_s2] sm:$0xf] }
   0x4   :  { %136 = vmatpush.msrb.mxu0 %v28_v0  ;;  %156 = vmatpush.msrb.mxu1 %v29_v1  ;;  %v201_v6 = vld [vmem:[%s567_s3] sm:$0xf] }
   0x5   :  { %93 = vmatpush.msra.mxu2 %v30_v3  ;;  %113 = vmatpush.msra.mxu3 %v31_v4 }
   0x6   :  { %386 = vmatmul.msk.f32.vlgmr.msra.gmra.mxu2 %vm34_vm0, %v32_v2  ;;  %387 = vmatmul.msk.f32.vlgmr.msra.gmra.mxu3 %vm34_vm0, %v32_v2 }
   0x7   :  { %176 = vmatpush.msrb.mxu2 %v30_v3  ;;  %196 = vmatpush.msrb.mxu3 %v31_v4  ;;  %v289_v4 = vld [vmem:[%s568_s5] sm:$0xf] }
   0x8   :  { %257 = vperm.xlu2 %393, %v201_v6   ;;  %395 = vset.pattern.permute.xlu1 %v400_v7  ;;  %v202_v6 = vld [vmem:[%s570_s4] sm:$0xf] }
   0xb   :  { %388 = vmatmul.msk.f32.vlgmr.msrb.gmra.mxu0 %vm34_vm0, %v33_v5  ;;  %389 = vmatmul.msk.f32.vlgmr.msrb.gmra.mxu1 %vm34_vm0, %v33_v5 }
   0xe   :  { %390 = vmatmul.msk.f32.vlgmr.msrb.gmra.mxu2 %vm34_vm0, %v33_v5  ;;  %391 = vmatmul.msk.f32.vlgmr.msrb.gmra.mxu3 %vm34_vm0, %v33_v5  ;;  %v290_v5 = vld [vmem:[%s569_s6] sm:$0xf] }
  0x62   :  { %v258_v7 = vpop.permute.xlu2 %257 }
  0x80   :  { %v55_v8 = vpop.f32.mrf.mxu0  ;;  %v75_v9 = vpop.f32.mrf.mxu1 }
  0x81   :  { %v204_v10 = vsel %vm203_vm1, %v55_v8, 0.0  ;;  %v205_v11 = vsel %vm203_vm1, %v75_v9, 0.0 }
  0x82   :  { %v206_v12 = vadd.f32 %v205_v11, %v204_v10 }
  0x84   :  { %207 = vadd.xlane.f32.xlu0 %v206_v12 }
  0x88   :  { %v138_v13 = vpop.f32.mrf.mxu0  ;;  %v158_v14 = vpop.f32.mrf.mxu1 }
  0x89   :  { %v95_v15 = vpop.f32.mrf.mxu2  ;;  %v115_v16 = vpop.f32.mrf.mxu3  ;;  %v291_v17 = vsel %vm203_vm1, %v138_v13, 0.0  ;;  %v292_v18 = vsel %vm203_vm1, %v158_v14, 0.0 }
  0x8a   :  { %v209_v19 = vsel %vm203_vm1, %v95_v15, 0.0  ;;  %v210_v20 = vsel %vm203_vm1, %v115_v16, 0.0  ;;  %v293_v21 = vadd.f32 %v292_v18, %v291_v17 }
  0x8b   :  { %v211_v22 = vadd.f32 %v210_v20, %v209_v19 }
  0x8c   :  { %294 = vadd.xlane.f32.xlu1 %v293_v21 }
  0x8d   :  { %212 = vadd.xlane.f32.xlu0 %v211_v22 }
  0x91   :  { %v178_v23 = vpop.f32.mrf.mxu2  ;;  %v198_v24 = vpop.f32.mrf.mxu3 }
  0x92   :  { %v296_v25 = vsel %vm203_vm1, %v178_v23, 0.0  ;;  %v297_v26 = vsel %vm203_vm1, %v198_v24, 0.0 }
  0x93   :  { %v298_v27 = vadd.f32 %v297_v26, %v296_v25 }
  0x95   :  { %299 = vadd.xlane.f32.xlu1 %v298_v27 }
  0xf7   :  { %v208_v28 = vpop.xlane.xlu0 %207 }
  0xf8   :  { %v214_v31 = vsel %vm203_vm1, %v208_v28, 0.0 }
  0xff   :  { %v295_v29 = vpop.xlane.xlu1 %294 }
 0x100   :  { %v213_v30 = vpop.xlane.xlu0 %212  ;;  %v301_v42 = vsel %vm203_vm1, %v295_v29, 0.0 }
 0x101   :  { %v215_v32 = vsel %vm203_vm1, %v213_v30, 0.0 }
 0x102   :  { %v216_v33 = vadd.f32 %v215_v32, %v214_v31 }
 0x104   :  { %v217_v34 = vmul.f32 0.001953125, %v216_v33 }
 0x106   :  { %v485_v35 = vsub.f32 %v55_v8, %v217_v34  ;;  %v487_v36 = vsub.f32 %v75_v9, %v217_v34  ;;  %v489_v37 = vsub.f32 %v95_v15, %v217_v34  ;;  %v491_v38 = vsub.f32 %v115_v16, %v217_v34 }
 0x108   :  { %v300_v39 = vpop.xlane.xlu1 %299  ;;  %v222_v40 = vmul.f32 %v485_v35, %v485_v35  ;;  %v223_v41 = vmul.f32 %v487_v36, %v487_v36  ;;  %v224_v48 = vmul.f32 %v489_v37, %v489_v37  ;;  %v225_v49 = vmul.f32 %v491_v38, %v491_v38 }
 0x109   :  { %v302_v43 = vsel %vm203_vm1, %v300_v39, 0.0 }
 0x10a   :  { %v303_v44 = vadd.f32 %v302_v43, %v301_v42  ;;  %v226_v45 = vsel %vm203_vm1, %v222_v40, 0.0  ;;  %v227_v46 = vsel %vm203_vm1, %v223_v41, 0.0  ;;  %v231_v55 = vsel %vm203_vm1, %v224_v48, 0.0 }
 0x10b   :  { %v228_v47 = vadd.f32 %v227_v46, %v226_v45  ;;  %v232_v56 = vsel %vm203_vm1, %v225_v49, 0.0 }
 0x10c   :  { %v304_v50 = vmul.f32 0.001953125, %v303_v44  ;;  %v233_v1 = vadd.f32 %v232_v56, %v231_v55 }
 0x10d   :  { %229 = vadd.xlane.f32.xlu2 %v228_v47 }
 0x10e   :  { %v505_v51 = vsub.f32 %v178_v23, %v304_v50  ;;  %v507_v52 = vsub.f32 %v198_v24, %v304_v50  ;;  %v509_v53 = vsub.f32 %v138_v13, %v304_v50  ;;  %v511_v54 = vsub.f32 %v158_v14, %v304_v50 }
 0x110   :  { %v311_v57 = vmul.f32 %v505_v51, %v505_v51  ;;  %v312_v58 = vmul.f32 %v507_v52, %v507_v52  ;;  %v309_v59 = vmul.f32 %v509_v53, %v509_v53  ;;  %v310_v60 = vmul.f32 %v511_v54, %v511_v54 }
 0x112   :  { %v318_v61 = vsel %vm203_vm1, %v311_v57, 0.0  ;;  %v319_v62 = vsel %vm203_vm1, %v312_v58, 0.0  ;;  %v313_v63 = vsel %vm203_vm1, %v309_v59, 0.0  ;;  %v314_v0 = vsel %vm203_vm1, %v310_v60, 0.0 }
 0x113   :  { %v320_v2 = vadd.f32 %v319_v62, %v318_v61  ;;  %v315_v3 = vadd.f32 %v314_v0, %v313_v63 }
 0x115   :  { %234 = vadd.xlane.f32.xlu2 %v233_v1  ;;  %321 = vadd.xlane.f32.xlu1 %v320_v2 }
 0x116   :  { %316 = vadd.xlane.f32.xlu0 %v315_v3 }
 0x12a   :  { %344 = vperm.xlu0 %394, %v289_v4  }
 0x12d   :  { %353 = vperm.xlu2 %393, %v290_v5  }
 0x12e   :  { %266 = vperm.xlu1 %395, %v202_v6  }
 0x180   :  { %v230_v8 = vpop.xlane.xlu2 %229 }
 0x181   :  { %v236_v11 = vsel %vm203_vm1, %v230_v8, 0.0 }
 0x188   :  { %v235_v9 = vpop.xlane.xlu2 %234  ;;  %v322_v10 = vpop.xlane.xlu1 %321 }
 0x189   :  { %v237_v12 = vsel %vm203_vm1, %v235_v9, 0.0  ;;  %v324_v13 = vsel %vm203_vm1, %v322_v10, 0.0  ;;  %v317_v14 = vpop.xlane.xlu0 %316 }
 0x18a   :  { %v238_v15 = vadd.f32 %v237_v12, %v236_v11  ;;  %v323_v16 = vsel %vm203_vm1, %v317_v14, 0.0 }
 0x18b   :  { %v325_v17 = vadd.f32 %v324_v13, %v323_v16 }
 0x18c   :  { %v239_v18 = vmul.f32 0.001953125, %v238_v15 }
 0x18d   :  { %v326_v19 = vmul.f32 0.001953125, %v325_v17 }
 0x18e   :  { %v240_v20 = vadd.f32 1e-05, %v239_v18 }
 0x18f   :  { %v327_v21 = vadd.f32 1e-05, %v326_v19 }
 0x190   :  { %396 = vrsqrt.f32 %v240_v20  ;;  %vm247_vm4 = vweird.f32 %v240_v20  ;;  %v354_v59 = vpop.permute.xlu2 %353 }
 0x191   :  { %398 = vrsqrt.f32 %v327_v21  ;;  %vm334_vm6 = vweird.f32 %v327_v21 }
 0x196   :  { %v397_v22 = vpop.eup %396 }
 0x197   :  { %v399_v23 = vpop.eup %398  ;;  %v242_v24 = vmul.f32 %v397_v22, %v240_v20  ;;  %vm248_vm2 = vweird.f32 %v397_v22 }
 0x198   :  { %v329_v25 = vmul.f32 %v399_v23, %v327_v21  ;;  %vm335_vm3 = vweird.f32 %v399_v23  ;;  %vm249_vm5 = vmor %vm247_vm4, %vm248_vm2 }
 0x199   :  { %v243_v26 = vmul.f32 %v397_v22, %v242_v24  ;;  %vm336_vm7 = vmor %vm334_vm6, %vm335_vm3 }
 0x19a   :  { %v330_v27 = vmul.f32 %v399_v23, %v329_v25 }
 0x19b   :  { %v244_v28 = vmul.f32 0.5, %v243_v26 }
 0x19c   :  { %v331_v29 = vmul.f32 0.5, %v330_v27  ;;  %v345_v40 = vpop.permute.xlu0 %344 }
 0x19d   :  { %v245_v30 = vsub.f32 1.5, %v244_v28 }
 0x19e   :  { %v332_v31 = vsub.f32 1.5, %v331_v29 }
 0x19f   :  { %v246_v32 = vmul.f32 %v397_v22, %v245_v30 }
 0x1a0   :  { %v333_v33 = vmul.f32 %v399_v23, %v332_v31  ;;  %v267_v48 = vpop.permute.xlu1 %266 }
 0x1a1   :  { %v250_v34 = vsel %vm249_vm5, %v397_v22, %v246_v32 }
 0x1a2   :  { %v337_v39 = vsel %vm336_vm7, %v399_v23, %v333_v33  ;;  %v251_v41 = vmul.f32 %v250_v34, %v485_v35  ;;  %v252_v42 = vmul.f32 %v250_v34, %v487_v36  ;;  %v253_v43 = vmul.f32 %v250_v34, %v489_v37 }
 0x1a3   :  { %v338_v44 = vmul.f32 %v337_v39, %v509_v53  ;;  %v339_v45 = vmul.f32 %v337_v39, %v511_v54  ;;  %v340_v46 = vmul.f32 %v337_v39, %v505_v51  ;;  %v341_v47 = vmul.f32 %v337_v39, %v507_v52 }
 0x1a4   :  { %v254_v49 = vmul.f32 %v250_v34, %v491_v38  ;;  %v260_v50 = vmul.f32 %v258_v7, %v251_v41  ;;  %v261_v55 = vmul.f32 %v258_v7, %v252_v42  ;;  %v262_v56 = vmul.f32 %v258_v7, %v253_v43 }
 0x1a5   :  { %v347_v57 = vmul.f32 %v345_v40, %v338_v44  ;;  %v348_v35 = vmul.f32 %v345_v40, %v339_v45  ;;  %v349_v58 = vmul.f32 %v345_v40, %v340_v46  ;;  %v350_v36 = vmul.f32 %v345_v40, %v341_v47 }
 0x1a6   :  { %v263_v37 = vmul.f32 %v258_v7, %v254_v49  ;;  %v269_v60 = vadd.f32 %v267_v48, %v260_v50  ;;  %v270_v53 = vadd.f32 %v267_v48, %v261_v55  ;;  %v271_v63 = vadd.f32 %v267_v48, %v262_v56 }
 0x1a7   :  { %v356_v61 = vadd.f32 %v354_v59, %v347_v57  ;;  %v357_v54 = vadd.f32 %v354_v59, %v348_v35  ;;  %v358_v62 = vadd.f32 %v354_v59, %v349_v58  ;;  %v359_v51 = vadd.f32 %v354_v59, %v350_v36 }
 0x1a8   :  { %v272_v52 = vadd.f32 %v267_v48, %v263_v37  ;;  %v274_v0 = vmax.f32 %v270_v53, 0.0  ;;  %v273_v2 = vmax.f32 %v269_v60, 0.0  ;;  %v275_v10 = vmax.f32 %v271_v63, 0.0 }
 0x1a9   :  { %v361_v1 = vmax.f32 %v357_v54, 0.0  ;;  %v363_v38 = vmax.f32 %v359_v51, 0.0  ;;  %v360_v5 = vmax.f32 %v356_v61, 0.0  ;;  %v362_v6 = vmax.f32 %v358_v62, 0.0 }
 0x1aa   :  { %v276_v3 = vmax.f32 %v272_v52, 0.0  ;;  %v281_v4 = vrot.slane %v274_v0, 4 }
 0x1ab   :  { %v368_v8 = vrot.slane %v361_v1, 4  ;;  %v369_v9 = vrot.slane %v363_v38, 4 }
 0x1ac   :  { %v282_v7 = vrot.slane %v276_v3, 4  ;;  %v283_v11 = vsel %vm203_vm1, %v273_v2, %v281_v4 }
 0x1ad   :  { %v370_v12 = vsel %vm203_vm1, %v360_v5, %v368_v8  ;;  %v371_v13 = vsel %vm203_vm1, %v362_v6, %v369_v9  ;;  %287 = vst [vmem:[%s571_s7] sm:$0xff] %v283_v11 }
 0x1ae   :  { %374 = vst [vmem:[%s572_s8] sm:$0xff] %v370_v12  ;;  %v284_v14 = vsel %vm203_vm1, %v275_v10, %v282_v7 }
 0x1af   :  { %375 = vst [vmem:[%s572_s8 + $0x8] sm:$0xff] %v371_v13 }
 0x1b0   :  { %288 = vst [vmem:[%s571_s7 + $0x8] sm:$0xff] %v284_v14 }

// kernel: fourier_unit.5
= control target key start
LH: loop header
LB: loop body
LE: loop exit
PB: predicated region body
PF: predicated region fallthrough
CT: control target
= control target key end

     0   :  { %vm64_vm0 = vcmask 130048   ;;  %s1310_s0 = inlined_call_operand.vmem [shape: f32[8,16,16], index: 0, kind: input, shape index: {}]   ;;  %s1311_s1 = inlined_call_operand.vmem [shape: f32[8,16,16], index: 1, kind: input, shape index: {}]   ;;  %s1312_s2 = inlined_call_operand.vmem [shape: f32[32,16], index: 2, kind: input, shape index: {}]   ;;  %s1313_s3 = inlined_call_operand.vmem [shape: f32[32,16], index: 3, kind: input, shape index: {}]   ;;  %s1314_s4 = inlined_call_operand.vmem [shape: f32[16,16], index: 4, kind: input, shape index: {}]   ;;  %s1315_s5 = inlined_call_operand.vmem [shape: f32[16,16], index: 5, kind: input, shape index: {}]   ;;  %s1316_s6 = inlined_call_operand.hbm [shape: f32[8,16,16], index: 6, kind: output, shape index: {}]  }
   0x1   :  { %v49_v0 = vld [vmem:[%s1311_s1 + $0x8] sm:$0xff]  ;;  %v51_v1 = vld [vmem:[%s1311_s1 + $0x18] sm:$0xff]  ;;  %v48_v4 = vld [vmem:[%s1311_s1] sm:$0xff] }
   0x2   :  { %v53_v2 = vld [vmem:[%s1311_s1 + $0x28] sm:$0xff]  ;;  %91 = vmatpush.msra.mxu0 %v49_v0  ;;  %120 = vmatpush.msra.mxu1 %v51_v1  ;;  %v55_v3 = vld [vmem:[%s1311_s1 + $0x38] sm:$0xff]  ;;  %v50_v5 = vld [vmem:[%s1311_s1 + $0x10] sm:$0xff] }
   0x3   :  { %149 = vmatpush.msra.mxu2 %v53_v2  ;;  %178 = vmatpush.msra.mxu3 %v55_v3  ;;  %v52_v6 = vld [vmem:[%s1311_s1 + $0x20] sm:$0xff]  ;;  %v54_v7 = vld [vmem:[%s1311_s1 + $0x30] sm:$0xff]  ;;  %v57_v9 = vld [vmem:[%s1311_s1 + $0x48] sm:$0xff] }
   0x4   :  { %v28_v8 = vld [vmem:[%s1313_s3] sm:$0xff]  ;;  %92 = vmatpush.msra.mxu0 %v48_v4  ;;  %121 = vmatpush.msra.mxu1 %v50_v5  ;;  %v59_v10 = vld [vmem:[%s1311_s1 + $0x58] sm:$0xff]  ;;  %v61_v11 = vld [vmem:[%s1311_s1 + $0x68] sm:$0xff] }
   0x5   :  { %150 = vmatpush.msra.mxu2 %v52_v6  ;;  %179 = vmatpush.msra.mxu3 %v54_v7  ;;  %v63_v12 = vld [vmem:[%s1311_s1 + $0x78] sm:$0xff]  ;;  %v56_v13 = vld [vmem:[%s1311_s1 + $0x40] sm:$0xff]  ;;  %v58_v14 = vld [vmem:[%s1311_s1 + $0x50] sm:$0xff] }
   0x6   :  { %833 = vmatmul.msk.f32.vlgmr.msra.gmra.mxu0 %vm64_vm0, %v28_v8  ;;  %837 = vmatmul.msk.f32.vlgmr.msra.gmra.mxu1 %vm64_vm0, %v28_v8  ;;  %v60_v15 = vld [vmem:[%s1311_s1 + $0x60] sm:$0xff]  ;;  %v62_v16 = vld [vmem:[%s1311_s1 + $0x70] sm:$0xff] }
   0x7   :  { %841 = vmatmul.msk.f32.vlgmr.msra.gmra.mxu2 %vm64_vm0, %v28_v8  ;;  %845 = vmatmul.msk.f32.vlgmr.msra.gmra.mxu3 %vm64_vm0, %v28_v8 }
   0x8   :  { %207 = vmatpush.msrb.mxu0 %v57_v9  ;;  %236 = vmatpush.msrb.mxu1 %v59_v10 }
   0x9   :  { %11 = vsyncpa [#allocation3], 0  ;;  %265 = vmatpush.msrb.mxu2 %v61_v11  ;;  %294 = vmatpush.msrb.mxu3 %v63_v12  ;;  %v33_v17 = vld [vmem:[%s1310_s0 + $0x8] sm:$0xff]  ;;  %v30_v19 = vld [vmem:[%s1313_s3 + $0x10] sm:$0xff]  ;;  %s821_s9 = sshll.u32 %s1316_s6, 4  ;;  %s963_s10 = smov 128   ;;  %s822_s9 = int_to_ptr.hbm [resolvable:$true] %s821_s9 }
   0xa   :  { %208 = vmatpush.msrb.mxu0 %v56_v13  ;;  %237 = vmatpush.msrb.mxu1 %v58_v14  ;;  %v29_v18 = vld [vmem:[%s1313_s3 + $0x8] sm:$0xff]  ;;  %v32_v20 = vld [vmem:[%s1310_s0] sm:$0xff]  ;;  %v35_v21 = vld [vmem:[%s1310_s0 + $0x18] sm:$0xff]  ;;  %s964_s1 = smov 8  }
   0xb   :  { %266 = vmatpush.msrb.mxu2 %v60_v15  ;;  %295 = vmatpush.msrb.mxu3 %v62_v16  ;;  %v31_v22 = vld [vmem:[%s1313_s3 + $0x18] sm:$0xff]  ;;  %v37_v23 = vld [vmem:[%s1310_s0 + $0x28] sm:$0xff]  ;;  %v34_v25 = vld [vmem:[%s1310_s0 + $0x10] sm:$0xff] }
   0xc   :  { %335 = vmatpush.msra.mxu0 %v33_v17  ;;  %364 = vmatpush.msra.mxu1 %v35_v21  ;;  %v39_v24 = vld [vmem:[%s1310_s0 + $0x38] sm:$0xff]  ;;  %v36_v26 = vld [vmem:[%s1310_s0 + $0x20] sm:$0xff]  ;;  %v38_v27 = vld [vmem:[%s1310_s0 + $0x30] sm:$0xff] }
   0xd   :  { %393 = vmatpush.msra.mxu2 %v37_v23  ;;  %422 = vmatpush.msra.mxu3 %v39_v24  ;;  %v41_v28 = vld [vmem:[%s1310_s0 + $0x48] sm:$0xff]  ;;  %v40_v29 = vld [vmem:[%s1310_s0 + $0x40] sm:$0xff]  ;;  %v43_v30 = vld [vmem:[%s1310_s0 + $0x58] sm:$0xff] }
   0xe   :  { %834 = vmatmul.msk.f32.gmra.mxu0 %vm64_vm0, %v29_v18  ;;  %838 = vmatmul.msk.f32.gmra.mxu1 %vm64_vm0, %v29_v18  ;;  %v45_v31 = vld [vmem:[%s1310_s0 + $0x68] sm:$0xff]  ;;  %v47_v32 = vld [vmem:[%s1310_s0 + $0x78] sm:$0xff]  ;;  %v42_v33 = vld [vmem:[%s1310_s0 + $0x50] sm:$0xff] }
   0xf   :  { %842 = vmatmul.msk.f32.gmra.mxu2 %vm64_vm0, %v29_v18  ;;  %846 = vmatmul.msk.f32.gmra.mxu3 %vm64_vm0, %v29_v18  ;;  %v44_v34 = vld [vmem:[%s1310_s0 + $0x60] sm:$0xff]  ;;  %v46_v35 = vld [vmem:[%s1310_s0 + $0x70] sm:$0xff]  ;;  %v25_v37 = vld [vmem:[%s1312_s2 + $0x8] sm:$0xff] }
  0x10   :  { %336 = vmatpush.msra.mxu0 %v32_v20  ;;  %365 = vmatpush.msra.mxu1 %v34_v25  ;;  %v24_v36 = vld [vmem:[%s1312_s2] sm:$0xff]  ;;  %v26_v38 = vld [vmem:[%s1312_s2 + $0x10] sm:$0xff]  ;;  %v27_v39 = vld [vmem:[%s1312_s2 + $0x18] sm:$0xff] }
  0x11   :  { %394 = vmatpush.msra.mxu2 %v36_v26  ;;  %423 = vmatpush.msra.mxu3 %v38_v27  ;;  %v554_v56 = vld [vmem:[%s1314_s4 + $0x8] sm:$0xff]  ;;  %v553_v57 = vld [vmem:[%s1314_s4] sm:$0xff] }
  0x12   :  { %v556_v1 = vld [vmem:[%s1315_s5 + $0x8] sm:$0xff]  ;;  %v555_v2 = vld [vmem:[%s1315_s5] sm:$0xff]  ;;  %s962_s5 = smov [#allocation2]  }
  0x13   :  { %s819_s30 = sshll.u32 %s962_s5, 4  ;;  %s820_s30 = int_to_ptr.vmem [resolvable:$true] %s819_s30 }
  0x16   :  { %835 = vmatmul.msk.f32.gmra.mxu0 %vm64_vm0, %v30_v19  ;;  %839 = vmatmul.msk.f32.gmra.mxu1 %vm64_vm0, %v30_v19 }
  0x17   :  { %843 = vmatmul.msk.f32.gmra.mxu2 %vm64_vm0, %v30_v19  ;;  %847 = vmatmul.msk.f32.gmra.mxu3 %vm64_vm0, %v30_v19 }
  0x1e   :  { %836 = vmatmul.msk.f32.gmra.mxu0 %vm64_vm0, %v31_v22  ;;  %840 = vmatmul.msk.f32.gmra.mxu1 %vm64_vm0, %v31_v22 }
  0x1f   :  { %844 = vmatmul.msk.f32.gmra.mxu2 %vm64_vm0, %v31_v22  ;;  %848 = vmatmul.msk.f32.gmra.mxu3 %vm64_vm0, %v31_v22 }
  0x26   :  { %849 = vmatmul.msk.f32.vlgmr.msrb.gmra.mxu0 %vm64_vm0, %v28_v8  ;;  %853 = vmatmul.msk.f32.vlgmr.msrb.gmra.mxu1 %vm64_vm0, %v28_v8 }
  0x27   :  { %857 = vmatmul.msk.f32.vlgmr.msrb.gmra.mxu2 %vm64_vm0, %v28_v8  ;;  %861 = vmatmul.msk.f32.vlgmr.msrb.gmra.mxu3 %vm64_vm0, %v28_v8 }
  0x28   :  { %451 = vmatpush.msrb.mxu0 %v41_v28  ;;  %480 = vmatpush.msrb.mxu1 %v43_v30 }
  0x29   :  { %509 = vmatpush.msrb.mxu2 %v45_v31  ;;  %538 = vmatpush.msrb.mxu3 %v47_v32 }
  0x2a   :  { %452 = vmatpush.msrb.mxu0 %v40_v29  ;;  %481 = vmatpush.msrb.mxu1 %v42_v33 }
  0x2b   :  { %510 = vmatpush.msrb.mxu2 %v44_v34  ;;  %539 = vmatpush.msrb.mxu3 %v46_v35 }
  0x2e   :  { %850 = vmatmul.msk.f32.gmra.mxu0 %vm64_vm0, %v29_v18  ;;  %854 = vmatmul.msk.f32.gmra.mxu1 %vm64_vm0, %v29_v18 }
  0x2f   :  { %858 = vmatmul.msk.f32.gmra.mxu2 %vm64_vm0, %v29_v18  ;;  %862 = vmatmul.msk.f32.gmra.mxu3 %vm64_vm0, %v29_v18 }
  0x36   :  { %851 = vmatmul.msk.f32.gmra.mxu0 %vm64_vm0, %v30_v19  ;;  %855 = vmatmul.msk.f32.gmra.mxu1 %vm64_vm0, %v30_v19 }
  0x37   :  { %859 = vmatmul.msk.f32.gmra.mxu2 %vm64_vm0, %v30_v19  ;;  %863 = vmatmul.msk.f32.gmra.mxu3 %vm64_vm0, %v30_v19 }
  0x3e   :  { %852 = vmatmul.msk.f32.gmra.mxu0 %vm64_vm0, %v31_v22  ;;  %856 = vmatmul.msk.f32.gmra.mxu1 %vm64_vm0, %v31_v22 }
  0x3f   :  { %860 = vmatmul.msk.f32.gmra.mxu2 %vm64_vm0, %v31_v22  ;;  %864 = vmatmul.msk.f32.gmra.mxu3 %vm64_vm0, %v31_v22 }
  0x46   :  { %865 = vmatmul.msk.f32.vlgmr.msra.gmra.mxu0 %vm64_vm0, %v24_v36  ;;  %869 = vmatmul.msk.f32.vlgmr.msra.gmra.mxu1 %vm64_vm0, %v24_v36 }
  0x47   :  { %873 = vmatmul.msk.f32.vlgmr.msra.gmra.mxu2 %vm64_vm0, %v24_v36  ;;  %877 = vmatmul.msk.f32.vlgmr.msra.gmra.mxu3 %vm64_vm0, %v24_v36 }
  0x48   :  { %732 = vmatpush.msra.mxu1 %v554_v56  ;;  %931 = vmatpush.msra.mxu3 %v554_v56 }
  0x49   :  { %619 = vmatpush.msra.mxu0 %v556_v1  ;;  %929 = vmatpush.msra.mxu2 %v556_v1 }
  0x4a   :  { %733 = vmatpush.msra.mxu1 %v553_v57  ;;  %932 = vmatpush.msra.mxu3 %v553_v57 }
  0x4b   :  { %620 = vmatpush.msra.mxu0 %v555_v2  ;;  %930 = vmatpush.msra.mxu2 %v555_v2 }
  0x4e   :  { %866 = vmatmul.msk.f32.gmra.mxu0 %vm64_vm0, %v25_v37  ;;  %870 = vmatmul.msk.f32.gmra.mxu1 %vm64_vm0, %v25_v37 }
  0x4f   :  { %874 = vmatmul.msk.f32.gmra.mxu2 %vm64_vm0, %v25_v37  ;;  %878 = vmatmul.msk.f32.gmra.mxu3 %vm64_vm0, %v25_v37 }
  0x56   :  { %867 = vmatmul.msk.f32.gmra.mxu0 %vm64_vm0, %v26_v38  ;;  %871 = vmatmul.msk.f32.gmra.mxu1 %vm64_vm0, %v26_v38 }
  0x57   :  { %875 = vmatmul.msk.f32.gmra.mxu2 %vm64_vm0, %v26_v38  ;;  %879 = vmatmul.msk.f32.gmra.mxu3 %vm64_vm0, %v26_v38 }
  0x5e   :  { %868 = vmatmul.msk.f32.gmra.mxu0 %vm64_vm0, %v27_v39  ;;  %872 = vmatmul.msk.f32.gmra.mxu1 %vm64_vm0, %v27_v39 }
  0x5f   :  { %876 = vmatmul.msk.f32.gmra.mxu2 %vm64_vm0, %v27_v39  ;;  %880 = vmatmul.msk.f32.gmra.mxu3 %vm64_vm0, %v27_v39 }
  0x66   :  { %881 = vmatmul.msk.f32.vlgmr.msrb.gmra.mxu0 %vm64_vm0, %v24_v36  ;;  %885 = vmatmul.msk.f32.vlgmr.msrb.gmra.mxu1 %vm64_vm0, %v24_v36 }
  0x67   :  { %889 = vmatmul.msk.f32.vlgmr.msrb.gmra.mxu2 %vm64_vm0, %v24_v36  ;;  %893 = vmatmul.msk.f32.vlgmr.msrb.gmra.mxu3 %vm64_vm0, %v24_v36 }
  0x6e   :  { %882 = vmatmul.msk.f32.gmra.mxu0 %vm64_vm0, %v25_v37  ;;  %886 = vmatmul.msk.f32.gmra.mxu1 %vm64_vm0, %v25_v37 }
  0x6f   :  { %890 = vmatmul.msk.f32.gmra.mxu2 %vm64_vm0, %v25_v37  ;;  %894 = vmatmul.msk.f32.gmra.mxu3 %vm64_vm0, %v25_v37 }
  0x76   :  { %883 = vmatmul.msk.f32.gmra.mxu0 %vm64_vm0, %v26_v38  ;;  %887 = vmatmul.msk.f32.gmra.mxu1 %vm64_vm0, %v26_v38 }
  0x77   :  { %891 = vmatmul.msk.f32.gmra.mxu2 %vm64_vm0, %v26_v38  ;;  %895 = vmatmul.msk.f32.gmra.mxu3 %vm64_vm0, %v26_v38 }
  0x7e   :  { %884 = vmatmul.msk.f32.gmra.mxu0 %vm64_vm0, %v27_v39  ;;  %888 = vmatmul.msk.f32.gmra.mxu1 %vm64_vm0, %v27_v39 }
  0x7f   :  { %892 = vmatmul.msk.f32.gmra.mxu2 %vm64_vm0, %v27_v39  ;;  %896 = vmatmul.msk.f32.gmra.mxu3 %vm64_vm0, %v27_v39 }
  0x83   :  { %v94_v40 = vpop.f32.mrf.mxu0  ;;  %v123_v41 = vpop.f32.mrf.mxu1 }
  0x8a   :  { %v1184_v42 = vpop.f32.mrf.mxu2  ;;  %v1186_v45 = vpop.f32.mrf.mxu3 }
  0x8b   :  { %v97_v43 = vpop.f32.mrf.mxu0  ;;  %v126_v44 = vpop.f32.mrf.mxu1 }
  0x92   :  { %v1188_v46 = vpop.f32.mrf.mxu2  ;;  %v1194_v52 = vpop.f32.mrf.mxu3 }
  0x93   :  { %v100_v47 = vpop.f32.mrf.mxu0  ;;  %v129_v48 = vpop.f32.mrf.mxu1 }
  0x9a   :  { %v1190_v49 = vpop.f32.mrf.mxu2  ;;  %v1206_v58 = vpop.f32.mrf.mxu3 }
  0x9b   :  { %v103_v50 = vpop.f32.mrf.mxu0  ;;  %v1192_v51 = vpop.f32.mrf.mxu1 }
  0xa2   :  { %v1196_v53 = vpop.f32.mrf.mxu2  ;;  %v1212_v62 = vpop.f32.mrf.mxu3 }
  0xa3   :  { %v210_v54 = vpop.f32.mrf.mxu0  ;;  %v1198_v55 = vpop.f32.mrf.mxu1 }
  0xaa   :  { %v1208_v59 = vpop.f32.mrf.mxu2  ;;  %v1224_v4 = vpop.f32.mrf.mxu3 }
  0xab   :  { %v213_v60 = vpop.f32.mrf.mxu0  ;;  %v1210_v61 = vpop.f32.mrf.mxu1 }
  0xb2   :  { %v1222_v3 = vpop.f32.mrf.mxu2  ;;  %v1230_v11 = vpop.f32.mrf.mxu3 }
  0xb3   :  { %v216_v63 = vpop.f32.mrf.mxu0  ;;  %v1214_v0 = vpop.f32.mrf.mxu1 }
  0xba   :  { %v1228_v7 = vpop.f32.mrf.mxu2  ;;  %v1236_v16 = vpop.f32.mrf.mxu3 }
  0xbb   :  { %v219_v5 = vpop.f32.mrf.mxu0  ;;  %v1226_v6 = vpop.f32.mrf.mxu1 }
  0xc2   :  { %v1233_v12 = vpop.f32.mrf.mxu2  ;;  %v1240_v22 = vpop.f32.mrf.mxu3 }
  0xc3   :  { %v338_v8 = vpop.f32.mrf.mxu0  ;;  %v367_v9 = vpop.f32.mrf.mxu1 }
  0xc4   :  { %v339_v10 = vadd.f32 %v338_v8, %v94_v40  ;;  %v368_v19 = vadd.f32 %v367_v9, %v123_v41 }
  0xc6   :  { %913 = vmatmul.msk.f32.vlgmr.msra.gmra.mxu1 %vm64_vm0, %v339_v10 }
  0xca   :  { %v396_v17 = vpop.f32.mrf.mxu2  ;;  %v425_v28 = vpop.f32.mrf.mxu3 }
  0xcb   :  { %v341_v13 = vpop.f32.mrf.mxu0  ;;  %v370_v15 = vpop.f32.mrf.mxu1  ;;  %v397_v30 = vadd.f32 %v396_v17, %v1184_v42 }
  0xcc   :  { %v342_v14 = vadd.f32 %v341_v13, %v97_v43  ;;  %v371_v24 = vadd.f32 %v370_v15, %v126_v44  ;;  %v426_v44 = vadd.f32 %v425_v28, %v1186_v45 }
  0xce   :  { %914 = vmatmul.msk.f32.gmra.mxu1 %vm64_vm0, %v342_v14 }
  0xd2   :  { %v399_v26 = vpop.f32.mrf.mxu2  ;;  %v428_v39 = vpop.f32.mrf.mxu3 }
  0xd3   :  { %v344_v18 = vpop.f32.mrf.mxu0  ;;  %v373_v21 = vpop.f32.mrf.mxu1  ;;  %v400_v36 = vadd.f32 %v399_v26, %v1188_v46  ;;  %v429_v56 = vadd.f32 %v428_v39, %v1194_v52 }
  0xd4   :  { %v345_v20 = vadd.f32 %v344_v18, %v100_v47  ;;  %v374_v31 = vadd.f32 %v373_v21, %v129_v48 }
  0xd6   :  { %897 = vmatmul.msk.f32.vlgmr.msra.gmra.mxu0 %vm64_vm0, %v345_v20  ;;  %915 = vmatmul.msk.f32.gmra.mxu1 %vm64_vm0, %v368_v19 }
  0xda   :  { %v402_v33 = vpop.f32.mrf.mxu2  ;;  %v431_v48 = vpop.f32.mrf.mxu3 }
  0xdb   :  { %v347_v23 = vpop.f32.mrf.mxu0  ;;  %v376_v27 = vpop.f32.mrf.mxu1  ;;  %v403_v42 = vadd.f32 %v402_v33, %v1190_v49 }
  0xdc   :  { %v348_v25 = vadd.f32 %v347_v23, %v103_v50  ;;  %v377_v37 = vadd.f32 %v376_v27, %v1192_v51 }
  0xde   :  { %898 = vmatmul.msk.f32.gmra.mxu0 %vm64_vm0, %v348_v25  ;;  %916 = vmatmul.msk.f32.gmra.mxu1 %vm64_vm0, %v371_v24 }
  0xe2   :  { %v405_v40 = vpop.f32.mrf.mxu2  ;;  %v434_v57 = vpop.f32.mrf.mxu3 }
  0xe3   :  { %v454_v29 = vpop.f32.mrf.mxu0  ;;  %v483_v34 = vpop.f32.mrf.mxu1  ;;  %v435_v2 = vadd.f32 %v434_v57, %v1212_v62 }
  0xe4   :  { %v455_v32 = vadd.f32 %v454_v29, %v210_v54  ;;  %v484_v47 = vadd.f32 %v483_v34, %v1198_v55  ;;  %v406_v54 = vadd.f32 %v405_v40, %v1196_v53 }
  0xe6   :  { %899 = vmatmul.msk.f32.gmra.mxu0 %vm64_vm0, %v374_v31  ;;  %917 = vmatmul.msk.f32.gmra.mxu1 %vm64_vm0, %v397_v30 }
  0xe7   :  { %921 = vmatmul.msk.f32.vlgmr.msra.gmra.mxu3 %vm64_vm0, %v455_v32 }
  0xea   :  { %v512_v50 = vpop.f32.mrf.mxu2 }
  0xeb   :  { %v457_v35 = vpop.f32.mrf.mxu0  ;;  %v486_v46 = vpop.f32.mrf.mxu1  ;;  %v513_v53 = vadd.f32 %v512_v50, %v1208_v59 }
  0xec   :  { %v458_v38 = vadd.f32 %v457_v35, %v213_v60  ;;  %v487_v45 = vadd.f32 %v486_v46, %v1210_v61  ;;  %v432_v60 = vadd.f32 %v431_v48, %v1206_v58  ;;  %v541_v61 = vpop.f32.mrf.mxu3 }
  0xee   :  { %900 = vmatmul.msk.f32.gmra.mxu0 %vm64_vm0, %v377_v37  ;;  %918 = vmatmul.msk.f32.gmra.mxu1 %vm64_vm0, %v400_v36 }
  0xef   :  { %922 = vmatmul.msk.f32.gmra.mxu3 %vm64_vm0, %v458_v38 }
  0xf2   :  { %v515_v1 = vpop.f32.mrf.mxu2 }
  0xf3   :  { %v460_v41 = vpop.f32.mrf.mxu0  ;;  %v489_v55 = vpop.f32.mrf.mxu1  ;;  %v516_v8 = vadd.f32 %v515_v1, %v1222_v3 }
  0xf4   :  { %v461_v43 = vadd.f32 %v460_v41, %v216_v63  ;;  %v490_v63 = vadd.f32 %v489_v55, %v1214_v0  ;;  %v542_v0 = vadd.f32 %v541_v61, %v1224_v4  ;;  %v544_v9 = vpop.f32.mrf.mxu3 }
  0xf5   :  { %v545_v3 = vadd.f32 %v544_v9, %v1230_v11 }
  0xf6   :  { %901 = vmatmul.msk.f32.gmra.mxu0 %vm64_vm0, %v403_v42  ;;  %905 = vmatmul.msk.f32.vlgmr.msra.gmra.mxu2 %vm64_vm0, %v461_v43 }
  0xf7   :  { %919 = vmatmul.msk.f32.gmra.mxu1 %vm64_vm0, %v426_v44  ;;  %923 = vmatmul.msk.f32.gmra.mxu3 %vm64_vm0, %v484_v47 }
  0xfa   :  { %v518_v58 = vpop.f32.mrf.mxu2 }
  0xfb   :  { %v463_v51 = vpop.f32.mrf.mxu0  ;;  %v492_v52 = vpop.f32.mrf.mxu1  ;;  %v519_v59 = vadd.f32 %v518_v58, %v1228_v7 }
  0xfc   :  { %v464_v49 = vadd.f32 %v463_v51, %v219_v5  ;;  %v493_v5 = vadd.f32 %v492_v52, %v1226_v6  ;;  %v547_v10 = vpop.f32.mrf.mxu3 }
  0xfd   :  { %v548_v13 = vadd.f32 %v547_v10, %v1236_v16 }
  0xfe   :  { %902 = vmatmul.msk.f32.gmra.mxu0 %vm64_vm0, %v406_v54  ;;  %906 = vmatmul.msk.f32.gmra.mxu2 %vm64_vm0, %v464_v49 }
  0xff   :  { %920 = vmatmul.msk.f32.gmra.mxu1 %vm64_vm0, %v429_v56  ;;  %924 = vmatmul.msk.f32.gmra.mxu3 %vm64_vm0, %v487_v45 }
 0x102   :  { %v521_v62 = vpop.f32.mrf.mxu2 }
 0x103   :  { %v522_v6 = vadd.f32 %v521_v62, %v1233_v12 }
 0x104   :  { %v550_v4 = vpop.f32.mrf.mxu3 }
 0x105   :  { %v551_v7 = vadd.f32 %v550_v4, %v1240_v22 }
 0x106   :  { %903 = vmatmul.msk.f32.gmra.mxu0 %vm64_vm0, %v432_v60  ;;  %907 = vmatmul.msk.f32.gmra.mxu2 %vm64_vm0, %v490_v63 }
 0x107   :  { %925 = vmatmul.msk.f32.gmra.mxu3 %vm64_vm0, %v513_v53 }
 0x10e   :  { %904 = vmatmul.msk.f32.gmra.mxu0 %vm64_vm0, %v435_v2  ;;  %908 = vmatmul.msk.f32.gmra.mxu2 %vm64_vm0, %v493_v5 }
 0x10f   :  { %926 = vmatmul.msk.f32.gmra.mxu3 %vm64_vm0, %v516_v8 }
 0x116   :  { %909 = vmatmul.msk.f32.gmra.mxu2 %vm64_vm0, %v519_v59 }
 0x117   :  { %927 = vmatmul.msk.f32.gmra.mxu3 %vm64_vm0, %v542_v0 }
 0x11e   :  { %910 = vmatmul.msk.f32.gmra.mxu2 %vm64_vm0, %v522_v6 }
 0x11f   :  { %928 = vmatmul.msk.f32.gmra.mxu3 %vm64_vm0, %v545_v3 }
 0x126   :  { %911 = vmatmul.msk.f32.gmra.mxu2 %vm64_vm0, %v548_v13 }
 0x12e   :  { %912 = vmatmul.msk.f32.gmra.mxu2 %vm64_vm0, %v551_v7 }
 0x143   :  { %v735_v14 = vpop.f32.mrf.mxu1 }
 0x14b   :  { %v738_v15 = vpop.f32.mrf.mxu1 }
 0x153   :  { %v622_v17 = vpop.f32.mrf.mxu0  ;;  %v741_v11 = vpop.f32.mrf.mxu1 }
 0x154   :  { %v736_v12 = vadd.f32 %v735_v14, %v622_v17 }
 0x156   :  { %v783_v18 = vmul.f32 0.00390625, %v736_v12 }
 0x158   :  { %799 = vst.msk [vmem:[#allocation2] sm:$0xff] %vm64_vm0, %v783_v18 }
 0x15b   :  { %v625_v19 = vpop.f32.mrf.mxu0  ;;  %v744_v16 = vpop.f32.mrf.mxu1 }
 0x15c   :  { %v739_v20 = vadd.f32 %v738_v15, %v625_v19 }
 0x15e   :  { %v784_v21 = vmul.f32 0.00390625, %v739_v20 }
 0x160   :  { %800 = vst.msk [vmem:[#allocation2 + $0x8] sm:$0xff] %vm64_vm0, %v784_v21 }
 0x163   :  { %v628_v23 = vpop.f32.mrf.mxu0  ;;  %v747_v28 = vpop.f32.mrf.mxu1 }
 0x164   :  { %v742_v24 = vadd.f32 %v741_v11, %v628_v23 }
 0x166   :  { %v785_v25 = vmul.f32 0.00390625, %v742_v24 }
 0x168   :  { %801 = vst.msk [vmem:[#allocation2 + $0x10] sm:$0xff] %vm64_vm0, %v785_v25 }
 0x16a   :  { %v759_v22 = vpop.f32.mrf.mxu3 }
 0x16b   :  { %v631_v26 = vpop.f32.mrf.mxu0  ;;  %v750_v34 = vpop.f32.mrf.mxu1 }
 0x16c   :  { %v745_v27 = vadd.f32 %v744_v16, %v631_v26 }
 0x16e   :  { %v786_v29 = vmul.f32 0.00390625, %v745_v27 }
 0x170   :  { %802 = vst.msk [vmem:[#allocation2 + $0x18] sm:$0xff] %vm64_vm0, %v786_v29 }
 0x172   :  { %v762_v32 = vpop.f32.mrf.mxu3 }
 0x173   :  { %v634_v30 = vpop.f32.mrf.mxu0 }
 0x174   :  { %v748_v31 = vadd.f32 %v747_v28, %v634_v30  ;;  %v753_v42 = vpop.f32.mrf.mxu1 }
 0x176   :  { %v787_v33 = vmul.f32 0.00390625, %v748_v31 }
 0x178   :  { %803 = vst.msk [vmem:[#allocation2 + $0x20] sm:$0xff] %vm64_vm0, %v787_v33 }
 0x179   :  { %v646_v35 = vpop.f32.mrf.mxu2 }
 0x17a   :  { %v760_v36 = vadd.f32 %v759_v22, %v646_v35  ;;  %v765_v41 = vpop.f32.mrf.mxu3 }
 0x17b   :  { %v637_v37 = vpop.f32.mrf.mxu0 }
 0x17c   :  { %v791_v38 = vmul.f32 0.00390625, %v760_v36  ;;  %v751_v39 = vadd.f32 %v750_v34, %v637_v37  ;;  %v756_v56 = vpop.f32.mrf.mxu1 }
 0x17e   :  { %807 = vst.msk [vmem:[#allocation2 + $0x40] sm:$0xff] %vm64_vm0, %v791_v38  ;;  %v788_v40 = vmul.f32 0.00390625, %v751_v39 }
 0x180   :  { %804 = vst.msk [vmem:[#allocation2 + $0x28] sm:$0xff] %vm64_vm0, %v788_v40 }
 0x181   :  { %v649_v43 = vpop.f32.mrf.mxu2 }
 0x182   :  { %v763_v44 = vadd.f32 %v762_v32, %v649_v43  ;;  %v768_v51 = vpop.f32.mrf.mxu3 }
 0x183   :  { %v640_v47 = vpop.f32.mrf.mxu0 }
 0x184   :  { %v792_v46 = vmul.f32 0.00390625, %v763_v44  ;;  %v754_v48 = vadd.f32 %v753_v42, %v640_v47 }
 0x186   :  { %808 = vst.msk [vmem:[#allocation2 + $0x48] sm:$0xff] %vm64_vm0, %v792_v46  ;;  %v789_v50 = vmul.f32 0.00390625, %v754_v48 }
 0x188   :  { %805 = vst.msk [vmem:[#allocation2 + $0x30] sm:$0xff] %vm64_vm0, %v789_v50 }
 0x189   :  { %v652_v54 = vpop.f32.mrf.mxu2 }
 0x18a   :  { %v766_v49 = vadd.f32 %v765_v41, %v652_v54  ;;  %v771_v1 = vpop.f32.mrf.mxu3 }
 0x18b   :  { %v643_v45 = vpop.f32.mrf.mxu0 }
 0x18c   :  { %v793_v55 = vmul.f32 0.00390625, %v766_v49  ;;  %v757_v57 = vadd.f32 %v756_v56, %v643_v45 }
 0x18e   :  { %809 = vst.msk [vmem:[#allocation2 + $0x50] sm:$0xff] %vm64_vm0, %v793_v55  ;;  %v790_v60 = vmul.f32 0.00390625, %v757_v57 }
 0x190   :  { %806 = vst.msk [vmem:[#allocation2 + $0x38] sm:$0xff] %vm64_vm0, %v790_v60 }
 0x191   :  { %v655_v63 = vpop.f32.mrf.mxu2 }
 0x192   :  { %v769_v53 = vadd.f32 %v768_v51, %v655_v63  ;;  %v774_v8 = vpop.f32.mrf.mxu3 }
 0x194   :  { %v794_v52 = vmul.f32 0.00390625, %v769_v53 }
 0x196   :  { %810 = vst.msk [vmem:[#allocation2 + $0x58] sm:$0xff] %vm64_vm0, %v794_v52 }
 0x199   :  { %v658_v61 = vpop.f32.mrf.mxu2 }
 0x19a   :  { %v772_v2 = vadd.f32 %v771_v1, %v658_v61  ;;  %v777_v9 = vpop.f32.mrf.mxu3 }
 0x19c   :  { %v795_v5 = vmul.f32 0.00390625, %v772_v2 }
 0x19e   :  { %811 = vst.msk [vmem:[#allocation2 + $0x60] sm:$0xff] %vm64_vm0, %v795_v5 }
 0x1a1   :  { %v661_v58 = vpop.f32.mrf.mxu2 }
 0x1a2   :  { %v775_v59 = vadd.f32 %v774_v8, %v661_v58  ;;  %v780_v10 = vpop.f32.mrf.mxu3 }
 0x1a4   :  { %v796_v0 = vmul.f32 0.00390625, %v775_v59 }
 0x1a6   :  { %812 = vst.msk [vmem:[#allocation2 + $0x68] sm:$0xff] %vm64_vm0, %v796_v0 }
 0x1a9   :  { %v664_v62 = vpop.f32.mrf.mxu2 }
 0x1aa   :  { %v778_v6 = vadd.f32 %v777_v9, %v664_v62 }
 0x1ac   :  { %v797_v3 = vmul.f32 0.00390625, %v778_v6 }
 0x1ae   :  { %813 = vst.msk [vmem:[#allocation2 + $0x70] sm:$0xff] %vm64_vm0, %v797_v3 }
 0x1b1   :  { %v667_v13 = vpop.f32.mrf.mxu2 }
 0x1b2   :  { %v781_v4 = vadd.f32 %v780_v10, %v667_v13 }
 0x1b4   :  { %v798_v7 = vmul.f32 0.00390625, %v781_v4 }
 0x1b6   :  { %814 = vst.msk [vmem:[#allocation2 + $0x78] sm:$0xff] %vm64_vm0, %v798_v7 }
 0x1b7   :  { %827 = dma.vmem_to_hbm [thread:$0]  %s820_s30, 2048, %s822_s9, [#allocation3], %s963_s10, %s963_s10, %s964_s1  }
 0x1b8   :  { %960 = dma.done.wait [#allocation3], 2048  }
 0x1b9   :  { %961 = vsyncadd [#allocation3], 4294965248 }
 0x1ba   :  { %832 = vsyncpa [#allocation3], 1 }

// kernel: fourier_unit.3
= control target key start
LH: loop header
LB: loop body
LE: loop exit
PB: predicated region body
PF: predicated region fallthrough
CT: control target
= control target key end

     0   :  { %9 = vsyncpa [#allocation3], 0  ;;  %s7469_s0 = inlined_call_operand.hbm [shape: f32[128,16], index: 0, kind: input, shape index: {}]   ;;  %s7470_s1 = inlined_call_operand.vmem [shape: f32[16,16], index: 1, kind: input, shape index: {}]   ;;  %s7471_s2 = inlined_call_operand.vmem [shape: f32[16,16], index: 2, kind: input, shape index: {}]   ;;  %s7472_s3 = inlined_call_operand.hbm [shape: f32[32,16], index: 3, kind: input, shape index: {}]   ;;  %s7473_s4 = inlined_call_operand.vmem [shape: f32[2,8,16,16], index: 4, kind: output, shape index: {}]  }
   0x1   :  { %s15_s17 = sshll.u32 %s7469_s0, 4  ;;  %s16_s17 = int_to_ptr.hbm [resolvable:$true] %s15_s17 }
   0x2   :  { %10 = vsyncpa [#allocation5], 0  ;;  %s5557_s18 = smov [#allocation2]   ;;  %s32_s22 = sshll.u32 %s7472_s3, 4  ;;  %s33_s22 = int_to_ptr.hbm [resolvable:$true] %s32_s22 }
   0x3   :  { %s17_s19 = sshll.u32 %s5557_s18, 4  ;;  %s5558_s23 = smov 128   ;;  %s18_s19 = int_to_ptr.vmem [resolvable:$true] %s17_s19 }
   0x4   :  { %s5559_s24 = smov 8   ;;  %s5560_s25 = smov [#allocation4]  }
   0x5   :  { %23 = dma.hbm_to_vmem [thread:$0]  %s16_s17, 2048, %s18_s19, [#allocation3], %s5558_s23, %s5558_s23, %s5559_s24  }
   0x6   :  { %s34_s26 = sshll.u32 %s5560_s25, 4  ;;  %s35_s26 = int_to_ptr.vmem [resolvable:$true] %s34_s26 }
   0x7   :  { %40 = dma.hbm_to_vmem [thread:$0]  %s33_s22, 512, %s35_s26, [#allocation5], %s5558_s23, %s5558_s23, %s5559_s24  }
   0x8   :  { %5553 = dma.done.wait [#allocation3], 2048  }
   0x9   :  { %5554 = vsyncadd [#allocation3], 4294965248 }
   0xa   :  { %5555 = dma.done.wait [#allocation5], 512  }
   0xb   :  { %5556 = vsyncadd [#allocation5], 4294966784  ;;  %vm67_vm0 = vcmask 130048   ;;  %v66_v0 = vld [vmem:[%s7470_s1 + $0x8] sm:$0xff]  ;;  %v65_v1 = vld [vmem:[%s7470_s1] sm:$0xff] }
   0xc   :  { %v49_v2 = vld [vmem:[#allocation2] sm:$0xff]  ;;  %v130_v3 = vand.u32 4294901760, %v66_v0  ;;  %v132_v4 = vand.u32 4294901760, %v65_v1  ;;  %v50_v6 = vld [vmem:[#allocation2 + $0x8] sm:$0xff]  ;;  %v51_v10 = vld [vmem:[#allocation2 + $0x10] sm:$0xff] }
   0xd   :  { %v69_v5 = vsel %vm67_vm0, %v49_v2, 0  ;;  %v741_v7 = vld [vmem:[%s7471_s2 + $0x8] sm:$0xff]  ;;  %v72_v9 = vsel %vm67_vm0, %v50_v6, 0  ;;  %v75_v20 = vsel %vm67_vm0, %v51_v10, 0  ;;  %v52_v33 = vld [vmem:[#allocation2 + $0x18] sm:$0xff]  ;;  %v53_v40 = vld [vmem:[#allocation2 + $0x20] sm:$0xff] }
   0xe   :  { %v5602_v8 = vand.u32 4294901760, %v69_v5  ;;  %v5605_v11 = vand.u32 4294901760, %v741_v7  ;;  %v278_v12 = vsub.f32 %v66_v0, %v130_v3  ;;  %470 = vmatpush.msra.mxu3 %v130_v3  ;;  %v284_v13 = vsub.f32 %v65_v1, %v132_v4  ;;  %131 = vmatpush.msra.mxu0 %v130_v3  ;;  %v54_v47 = vld [vmem:[#allocation2 + $0x28] sm:$0xff]  ;;  %v55_v54 = vld [vmem:[#allocation2 + $0x30] sm:$0xff]  ;;  %v56_v61 = vld [vmem:[#allocation2 + $0x38] sm:$0xff] }
   0xf   :  { %v5607_v14 = vand.u32 4294901760, %v72_v9  ;;  %v5630_v27 = vand.u32 4294901760, %v75_v20  ;;  %v78_v36 = vsel %vm67_vm0, %v52_v33, 0  ;;  %v81_v43 = vsel %vm67_vm0, %v53_v40, 0  ;;  %v59_v33 = vld [vmem:[#allocation2 + $0x50] sm:$0xff] }
  0x10   :  { %v5610_v15 = vsub.f32 %v69_v5, %v5602_v8  ;;  %v5613_v16 = vsub.f32 %v741_v7, %v5605_v11  ;;  %370 = vmatpush.msra.mxu2 %v278_v12  ;;  %472 = vmatpush.msra.mxu3 %v132_v4  ;;  %v279_v17 = vand.u32 4294901760, %v278_v12  ;;  %v285_v18 = vand.u32 4294901760, %v284_v13 }
  0x11   :  { %v5616_v19 = vsub.f32 %v72_v9, %v5607_v14  ;;  %133 = vmatpush.msra.mxu0 %v132_v4  ;;  %v5642_v35 = vsub.f32 %v75_v20, %v5630_v27  ;;  %v5654_v39 = vand.u32 4294901760, %v78_v36  ;;  %v5672_v46 = vand.u32 4294901760, %v81_v43  ;;  %v740_v20 = vld [vmem:[%s7471_s2] sm:$0xff] }
  0x12   :  { %v5620_v21 = vand.u32 4294901760, %v5610_v15  ;;  %v905_v22 = vand.u32 4294901760, %v5613_v16  ;;  %373 = vmatpush.msra.mxu2 %v284_v13  ;;  %v280_v23 = vsub.f32 %v278_v12, %v279_v17  ;;  %v286_v24 = vsub.f32 %v284_v13, %v285_v18  ;;  %v58_v13 = vld [vmem:[#allocation2 + $0x48] sm:$0xff] }
  0x13   :  { %587 = vmatpush.msrb.mxu0 %v279_v17  ;;  %376 = vmatmul.f32.vlgmr.msra.gmra.mxu2 %v5610_v15  ;;  %v5628_v26 = vand.u32 4294901760, %v5616_v19  ;;  %v5652_v38 = vand.u32 4294901760, %v5642_v35  ;;  %v5661_v42 = vsub.f32 %v78_v36, %v5654_v39  ;;  %v5678_v49 = vsub.f32 %v81_v43, %v5672_v46 }
  0x14   :  { %476 = vmatmul.f32.vlgmr.msra.gmra.mxu3 %v5620_v21  ;;  %v137_v25 = vsub.f32 %v5610_v15, %v5620_v21  ;;  %v906_v28 = vsub.f32 %v5613_v16, %v905_v22  ;;  %v281_v29 = vand.u32 4294901760, %v280_v23  ;;  %v287_v30 = vand.u32 4294901760, %v286_v24  ;;  %757 = vmatpush.msrb.mxu2 %v5605_v11 }
  0x15   :  { %591 = vmatpush.msrb.mxu0 %v285_v18  ;;  %v145_v34 = vsub.f32 %v5616_v19, %v5628_v26  ;;  %v153_v41 = vsub.f32 %v5642_v35, %v5652_v38  ;;  %v5670_v45 = vand.u32 4294901760, %v5661_v42  ;;  %v84_v50 = vsel %vm67_vm0, %v54_v47, 0 }
  0x16   :  { %v5636_v31 = vand.u32 4294901760, %v137_v25  ;;  %v907_v32 = vand.u32 4294901760, %v906_v28  ;;  %282 = vmatpush.msra.mxu1 %v281_v29  ;;  %v5687_v52 = vand.u32 4294901760, %v5678_v49  ;;  %v5689_v53 = vand.u32 4294901760, %v84_v50 }
  0x17   :  { %v5649_v37 = vand.u32 4294901760, %v145_v34  ;;  %v5667_v44 = vand.u32 4294901760, %v153_v41  ;;  %v161_v48 = vsub.f32 %v5661_v42, %v5670_v45  ;;  %v87_v57 = vsel %vm67_vm0, %v55_v54, 0 }
  0x18   :  { %139 = vmatmul.f32.vlgmr.msra.gmra.mxu0 %v5636_v31  ;;  %908 = vmatpush.msrb.mxu3 %v907_v32  ;;  %v169_v55 = vsub.f32 %v5678_v49, %v5687_v52  ;;  %v5695_v56 = vsub.f32 %v84_v50, %v5689_v53  ;;  %v5706_v60 = vand.u32 4294901760, %v87_v57  ;;  %v90_v0 = vsel %vm67_vm0, %v56_v61, 0 }
  0x19   :  { %288 = vmatpush.msra.mxu1 %v287_v30  ;;  %996 = vmatpush.msra.mxu0 %v5613_v16  ;;  %v5684_v51 = vand.u32 4294901760, %v161_v48  ;;  %v96_v23 = vsel %vm67_vm0, %v58_v13, 0  ;;  %v758_v24 = vand.u32 4294901760, %v740_v20  ;;  %v99_v41 = vsel %vm67_vm0, %v59_v33, 0  ;;  %v60_v48 = vld [vmem:[#allocation2 + $0x58] sm:$0xff] }
  0x1a   :  { %290 = vmatmul.f32.vlgmr.msra.gmra.mxu1 %v5602_v8  ;;  %v5701_v58 = vand.u32 4294901760, %v169_v55  ;;  %v5704_v59 = vand.u32 4294901760, %v5695_v56  ;;  %v5712_v63 = vsub.f32 %v87_v57, %v5706_v60  ;;  %v5760_v30 = vand.u32 4294901760, %v96_v23 }
  0x1b   :  { %672 = vmatpush.msrb.mxu1 %v130_v3  ;;  %381 = vmatmul.f32.gmra.mxu2 %v5616_v19  ;;  %v5723_v3 = vand.u32 4294901760, %v90_v0  ;;  %v910_v25 = vsub.f32 %v740_v20, %v758_v24  ;;  %v5779_v47 = vand.u32 4294901760, %v99_v41  ;;  %v102_v55 = vsel %vm67_vm0, %v60_v48, 0  ;;  %v62_v20 = vld [vmem:[#allocation2 + $0x68] sm:$0xff] }
  0x1c   :  { %482 = vmatmul.f32.gmra.mxu3 %v5628_v26  ;;  %v177_v62 = vsub.f32 %v5695_v56, %v5704_v59  ;;  %v5721_v2 = vand.u32 4294901760, %v5712_v63  ;;  %759 = vmatpush.msrb.mxu2 %v758_v24  ;;  %v5768_v40 = vsub.f32 %v96_v23, %v5760_v30  ;;  %v5797_v61 = vand.u32 4294901760, %v102_v55 }
  0x1d   :  { %674 = vmatpush.msrb.mxu1 %v132_v4  ;;  %v57_v4 = vld [vmem:[#allocation2 + $0x40] sm:$0xff]  ;;  %v5729_v6 = vsub.f32 %v90_v0, %v5723_v3  ;;  %v911_v32 = vand.u32 4294901760, %v910_v25  ;;  %999 = vmatpush.msra.mxu0 %v910_v25  ;;  %v5786_v54 = vsub.f32 %v99_v41, %v5779_v47 }
  0x1e   :  { %v5718_v1 = vand.u32 4294901760, %v177_v62  ;;  %v185_v5 = vsub.f32 %v5712_v63, %v5721_v2  ;;  %v93_v7 = vsel %vm67_vm0, %v57_v4, 0  ;;  %1213 = vmatpush.msra.mxu2 %v905_v22  ;;  %v5777_v22 = vand.u32 4294901760, %v5768_v40  ;;  %v61_v62 = vld [vmem:[#allocation2 + $0x60] sm:$0xff] }
  0x1f   :  { %1096 = vmatpush.msra.mxu1 %v5605_v11  ;;  %v5738_v10 = vand.u32 4294901760, %v5729_v6  ;;  %v5740_v12 = vand.u32 4294901760, %v93_v7  ;;  %v912_v34 = vsub.f32 %v910_v25, %v911_v32  ;;  %v5803_v4 = vsub.f32 %v102_v55, %v5797_v61 }
  0x20   :  { %147 = vmatmul.f32.gmra.mxu0 %v5649_v37  ;;  %v5735_v9 = vand.u32 4294901760, %v185_v5  ;;  %1217 = vmatpush.msra.mxu2 %v911_v32  ;;  %v209_v50 = vsub.f32 %v5768_v40, %v5777_v22  ;;  %v105_v5 = vsel %vm67_vm0, %v61_v62, 0  ;;  %v108_v25 = vsel %vm67_vm0, %v62_v20, 0 }
  0x21   :  { %v193_v17 = vsub.f32 %v5729_v6, %v5738_v10  ;;  %v5746_v18 = vsub.f32 %v93_v7, %v5740_v12  ;;  %1098 = vmatpush.msra.mxu1 %v758_v24  ;;  %v913_v43 = vand.u32 4294901760, %v912_v34  ;;  %7513 = vst [vmem:[#allocation9_spill] sm:$0xff] %v5803_v4  ;;  %v5812_v13 = vand.u32 4294901760, %v5803_v4 }
  0x22   :  { %294 = vmatmul.f32.gmra.mxu1 %v5607_v14  ;;  %v5792_v57 = vand.u32 4294901760, %v209_v50  ;;  %v5831_v34 = vand.u32 4294901760, %v108_v25 }
  0x23   :  { %386 = vmatmul.f32.gmra.mxu2 %v5642_v35  ;;  %v5755_v28 = vand.u32 4294901760, %v193_v17  ;;  %v5758_v29 = vand.u32 4294901760, %v5746_v18  ;;  %914 = vmatpush.msrb.mxu3 %v913_v43  ;;  %7514 = vst [vmem:[#allocation10_spill] sm:$0xff] %v5812_v13  ;;  %v5814_v17 = vand.u32 4294901760, %v105_v5  ;;  %v225_v23 = vsub.f32 %v5803_v4, %v5812_v13 }
  0x24   :  { %488 = vmatmul.f32.gmra.mxu3 %v5652_v38  ;;  %v5837_v43 = vsub.f32 %v108_v25, %v5831_v34 }
  0x25   :  { %v201_v36 = vsub.f32 %v5746_v18, %v5758_v29  ;;  %1298 = vmatpush.msra.mxu3 %v5605_v11  ;;  %v5795_v11 = vand.u32 4294901760, %v5786_v54  ;;  %v5826_v32 = vand.u32 4294901760, %v225_v23 }
  0x26   :  { %7517 = vst [vmem:[#allocation13_spill] sm:$0xff] %v5837_v43  ;;  %v5846_v55 = vand.u32 4294901760, %v5837_v43 }
  0x27   :  { %v5774_v16 = vand.u32 4294901760, %v201_v36  ;;  %1300 = vmatpush.msra.mxu3 %v758_v24  ;;  %7512 = vst [vmem:[#allocation8_spill] sm:$0xff] %v5795_v11  ;;  %v217_v0 = vsub.f32 %v5786_v54, %v5795_v11  ;;  %v5820_v24 = vsub.f32 %v105_v5, %v5814_v17  ;;  %v63_v36 = vld [vmem:[#allocation2 + $0x70] sm:$0xff] }
  0x28   :  { %155 = vmatmul.f32.gmra.mxu0 %v5667_v44  ;;  %v111_v48 = vsel %vm67_vm0, %v63_v36, 0  ;;  %7518 = vst [vmem:[#allocation14_spill] sm:$0xff] %v5846_v55  ;;  %v241_v5 = vsub.f32 %v5837_v43, %v5846_v55 }
  0x29   :  { %v5809_v7 = vand.u32 4294901760, %v217_v0  ;;  %7515 = vst [vmem:[#allocation11_spill] sm:$0xff] %v5820_v24  ;;  %v5829_v33 = vand.u32 4294901760, %v5820_v24  ;;  %v5848_v62 = vand.u32 4294901760, %v111_v48  ;;  %v64_v0 = vld [vmem:[#allocation2 + $0x78] sm:$0xff] }
  0x2a   :  { %298 = vmatmul.f32.gmra.mxu1 %v5630_v27  ;;  %v114_v23 = vsel %vm67_vm0, %v64_v0, 0  ;;  %v5860_v25 = vand.u32 4294901760, %v241_v5 }
  0x2b   :  { %391 = vmatmul.f32.gmra.mxu2 %v5661_v42  ;;  %7516 = vst [vmem:[#allocation12_spill] sm:$0xff] %v5829_v33  ;;  %v233_v41 = vsub.f32 %v5820_v24, %v5829_v33  ;;  %v5854_v20 = vsub.f32 %v111_v48, %v5848_v62 }
  0x2c   :  { %494 = vmatmul.f32.gmra.mxu3 %v5670_v45 }
  0x2d   :  { %v5843_v50 = vand.u32 4294901760, %v233_v41  ;;  %7519 = vst [vmem:[#allocation15_spill] sm:$0xff] %v5854_v20  ;;  %v5863_v36 = vand.u32 4294901760, %v5854_v20  ;;  %v5865_v41 = vand.u32 4294901760, %v114_v23 }
  0x2f   :  { %7520 = vst [vmem:[#allocation16_spill] sm:$0xff] %v5863_v36  ;;  %v249_v48 = vsub.f32 %v5854_v20, %v5863_v36  ;;  %v5871_v0 = vsub.f32 %v114_v23, %v5865_v41 }
  0x30   :  { %163 = vmatmul.f32.gmra.mxu0 %v5684_v51 }
  0x31   :  { %7521 = vst [vmem:[#allocation17_spill] sm:$0xff] %v5871_v0  ;;  %v5876_v5 = vand.u32 4294901760, %v249_v48 }
  0x32   :  { %302 = vmatmul.f32.gmra.mxu1 %v5654_v39 }
  0x33   :  { %396 = vmatmul.f32.gmra.mxu2 %v5678_v49 }
  0x34   :  { %500 = vmatmul.f32.gmra.mxu3 %v5687_v52 }
  0x38   :  { %171 = vmatmul.f32.gmra.mxu0 %v5701_v58 }
  0x3a   :  { %306 = vmatmul.f32.gmra.mxu1 %v5672_v46 }
  0x3b   :  { %401 = vmatmul.f32.gmra.mxu2 %v5695_v56 }
  0x3c   :  { %506 = vmatmul.f32.gmra.mxu3 %v5704_v59 }
  0x40   :  { %179 = vmatmul.f32.gmra.mxu0 %v5718_v1 }
  0x42   :  { %310 = vmatmul.f32.gmra.mxu1 %v5689_v53 }
  0x43   :  { %406 = vmatmul.f32.gmra.mxu2 %v5712_v63 }
  0x44   :  { %512 = vmatmul.f32.gmra.mxu3 %v5721_v2 }
  0x48   :  { %187 = vmatmul.f32.gmra.mxu0 %v5735_v9 }
  0x4a   :  { %314 = vmatmul.f32.gmra.mxu1 %v5706_v60 }
  0x4b   :  { %411 = vmatmul.f32.gmra.mxu2 %v5729_v6 }
  0x4c   :  { %518 = vmatmul.f32.gmra.mxu3 %v5738_v10 }
  0x50   :  { %195 = vmatmul.f32.gmra.mxu0 %v5755_v28 }
  0x52   :  { %318 = vmatmul.f32.gmra.mxu1 %v5723_v3 }
  0x53   :  { %416 = vmatmul.f32.gmra.mxu2 %v5746_v18 }
  0x54   :  { %524 = vmatmul.f32.gmra.mxu3 %v5758_v29 }
  0x58   :  { %203 = vmatmul.f32.gmra.mxu0 %v5774_v16 }
  0x5a   :  { %322 = vmatmul.f32.gmra.mxu1 %v5740_v12 }
  0x5b   :  { %421 = vmatmul.f32.gmra.mxu2 %v5768_v40 }
  0x5c   :  { %530 = vmatmul.f32.gmra.mxu3 %v5777_v22 }
  0x60   :  { %211 = vmatmul.f32.gmra.mxu0 %v5792_v57 }
  0x62   :  { %326 = vmatmul.f32.gmra.mxu1 %v5760_v30 }
  0x63   :  { %426 = vmatmul.f32.gmra.mxu2 %v5786_v54 }
  0x64   :  { %536 = vmatmul.f32.gmra.mxu3 %v5795_v11 }
  0x68   :  { %219 = vmatmul.f32.gmra.mxu0 %v5809_v7 }
  0x6a   :  { %330 = vmatmul.f32.gmra.mxu1 %v5779_v47 }
  0x6b   :  { %431 = vmatmul.f32.gmra.mxu2 %v5803_v4 }
  0x6c   :  { %542 = vmatmul.f32.gmra.mxu3 %v5812_v13 }
  0x70   :  { %227 = vmatmul.f32.gmra.mxu0 %v5826_v32 }
  0x72   :  { %334 = vmatmul.f32.gmra.mxu1 %v5797_v61 }
  0x73   :  { %436 = vmatmul.f32.gmra.mxu2 %v5820_v24 }
  0x74   :  { %548 = vmatmul.f32.gmra.mxu3 %v5829_v33 }
  0x78   :  { %235 = vmatmul.f32.gmra.mxu0 %v5843_v50 }
  0x7a   :  { %338 = vmatmul.f32.gmra.mxu1 %v5814_v17 }
  0x7b   :  { %441 = vmatmul.f32.gmra.mxu2 %v5837_v43 }
  0x7c   :  { %554 = vmatmul.f32.gmra.mxu3 %v5846_v55  ;;  %v5879_v55 = vand.u32 4294901760, %v5871_v0 }
  0x7e   :  { %7522 = vst [vmem:[#allocation18_spill] sm:$0xff] %v5879_v55  ;;  %v257_v43 = vsub.f32 %v5871_v0, %v5879_v55 }
  0x80   :  { %243 = vmatmul.f32.gmra.mxu0 %v5860_v25  ;;  %v5887_v23 = vand.u32 4294901760, %v257_v43 }
  0x82   :  { %342 = vmatmul.f32.gmra.mxu1 %v5831_v34 }
  0x83   :  { %446 = vmatmul.f32.gmra.mxu2 %v5854_v20 }
  0x84   :  { %560 = vmatmul.f32.gmra.mxu3 %v5863_v36 }
  0x88   :  { %251 = vmatmul.f32.gmra.mxu0 %v5876_v5 }
  0x8a   :  { %346 = vmatmul.f32.gmra.mxu1 %v5848_v62 }
  0x8b   :  { %451 = vmatmul.f32.gmra.mxu2 %v5871_v0 }
  0x8c   :  { %566 = vmatmul.f32.gmra.mxu3 %v5879_v55 }
  0x90   :  { %259 = vmatmul.f32.gmra.mxu0 %v5887_v23 }
  0x92   :  { %350 = vmatmul.f32.gmra.mxu1 %v5865_v41 }
  0x93   :  { %765 = vmatmul.f32.vlgmr.msrb.gmra.mxu2 %v5636_v31 }
  0x94   :  { %916 = vmatmul.f32.vlgmr.msrb.gmra.mxu3 %v5602_v8 }
  0x95   :  { %v140_v48 = vpop.f32.mrf.mxu0 }
  0x96   :  { %v377_v20 = vpop.f32.mrf.mxu2 }
  0x97   :  { %v291_v36 = vpop.f32.mrf.mxu1  ;;  %v477_v24 = vpop.f32.mrf.mxu3 }
  0x98   :  { %v292_v33 = vadd.f32 %v291_v36, %v140_v48  ;;  %593 = vmatmul.f32.vlgmr.msrb.gmra.mxu0 %v5602_v8 }
  0x9a   :  { %v378_v0 = vadd.f32 %v377_v20, %v292_v33  ;;  %676 = vmatmul.f32.vlgmr.msrb.gmra.mxu1 %v5602_v8 }
  0x9b   :  { %773 = vmatmul.f32.gmra.mxu2 %v5649_v37 }
  0x9c   :  { %v5895_v43 = vadd.f32 %v477_v24, %v378_v0  ;;  %920 = vmatmul.f32.gmra.mxu3 %v5607_v14 }
  0x9d   :  { %v148_v55 = vpop.f32.mrf.mxu0 }
  0x9e   :  { %v382_v13 = vpop.f32.mrf.mxu2 }
  0x9f   :  { %v295_v31 = vpop.f32.mrf.mxu1  ;;  %v483_v11 = vpop.f32.mrf.mxu3 }
  0xa0   :  { %v296_v4 = vadd.f32 %v295_v31, %v148_v55  ;;  %597 = vmatmul.f32.gmra.mxu0 %v5607_v14 }
  0xa2   :  { %v383_v36 = vadd.f32 %v382_v13, %v296_v4  ;;  %680 = vmatmul.f32.gmra.mxu1 %v5607_v14 }
  0xa3   :  { %781 = vmatmul.f32.gmra.mxu2 %v5667_v44 }
  0xa4   :  { %v5901_v48 = vadd.f32 %v483_v11, %v383_v36  ;;  %924 = vmatmul.f32.gmra.mxu3 %v5630_v27 }
  0xa5   :  { %v156_v24 = vpop.f32.mrf.mxu0 }
  0xa6   :  { %v387_v33 = vpop.f32.mrf.mxu2 }
  0xa7   :  { %v299_v37 = vpop.f32.mrf.mxu1  ;;  %v489_v0 = vpop.f32.mrf.mxu3 }
  0xa8   :  { %v300_v20 = vadd.f32 %v299_v37, %v156_v24  ;;  %601 = vmatmul.f32.gmra.mxu0 %v5630_v27 }
  0xaa   :  { %v388_v55 = vadd.f32 %v387_v33, %v300_v20  ;;  %684 = vmatmul.f32.gmra.mxu1 %v5630_v27 }
  0xab   :  { %789 = vmatmul.f32.gmra.mxu2 %v5684_v51 }
  0xac   :  { %v5907_v31 = vadd.f32 %v489_v0, %v388_v55  ;;  %928 = vmatmul.f32.gmra.mxu3 %v5654_v39 }
  0xad   :  { %v164_v11 = vpop.f32.mrf.mxu0 }
  0xae   :  { %v392_v4 = vpop.f32.mrf.mxu2 }
  0xaf   :  { %v303_v44 = vpop.f32.mrf.mxu1  ;;  %v495_v36 = vpop.f32.mrf.mxu3 }
  0xb0   :  { %v304_v13 = vadd.f32 %v303_v44, %v164_v11  ;;  %605 = vmatmul.f32.gmra.mxu0 %v5654_v39 }
  0xb2   :  { %v393_v24 = vadd.f32 %v392_v4, %v304_v13  ;;  %688 = vmatmul.f32.gmra.mxu1 %v5654_v39 }
  0xb3   :  { %797 = vmatmul.f32.gmra.mxu2 %v5701_v58 }
  0xb4   :  { %v5913_v37 = vadd.f32 %v495_v36, %v393_v24  ;;  %932 = vmatmul.f32.gmra.mxu3 %v5672_v46 }
  0xb5   :  { %v172_v33 = vpop.f32.mrf.mxu0 }
  0xb6   :  { %v397_v20 = vpop.f32.mrf.mxu2 }
  0xb7   :  { %v307_v51 = vpop.f32.mrf.mxu1  ;;  %v501_v55 = vpop.f32.mrf.mxu3 }
  0xb8   :  { %v308_v0 = vadd.f32 %v307_v51, %v172_v33  ;;  %609 = vmatmul.f32.gmra.mxu0 %v5672_v46 }
  0xba   :  { %v398_v11 = vadd.f32 %v397_v20, %v308_v0  ;;  %692 = vmatmul.f32.gmra.mxu1 %v5672_v46 }
  0xbb   :  { %805 = vmatmul.f32.gmra.mxu2 %v5718_v1 }
  0xbc   :  { %v5919_v44 = vadd.f32 %v501_v55, %v398_v11  ;;  %936 = vmatmul.f32.gmra.mxu3 %v5689_v53 }
  0xbd   :  { %v180_v4 = vpop.f32.mrf.mxu0 }
  0xbe   :  { %v402_v13 = vpop.f32.mrf.mxu2 }
  0xbf   :  { %v311_v58 = vpop.f32.mrf.mxu1  ;;  %v507_v24 = vpop.f32.mrf.mxu3 }
  0xc0   :  { %v312_v36 = vadd.f32 %v311_v58, %v180_v4  ;;  %613 = vmatmul.f32.gmra.mxu0 %v5689_v53 }
  0xc2   :  { %v403_v33 = vadd.f32 %v402_v13, %v312_v36  ;;  %696 = vmatmul.f32.gmra.mxu1 %v5689_v53 }
  0xc3   :  { %813 = vmatmul.f32.gmra.mxu2 %v5735_v9 }
  0xc4   :  { %v5925_v51 = vadd.f32 %v507_v24, %v403_v33  ;;  %940 = vmatmul.f32.gmra.mxu3 %v5706_v60 }
  0xc5   :  { %v188_v20 = vpop.f32.mrf.mxu0 }
  0xc6   :  { %v407_v0 = vpop.f32.mrf.mxu2 }
  0xc7   :  { %v315_v1 = vpop.f32.mrf.mxu1  ;;  %v513_v11 = vpop.f32.mrf.mxu3 }
  0xc8   :  { %v316_v55 = vadd.f32 %v315_v1, %v188_v20  ;;  %617 = vmatmul.f32.gmra.mxu0 %v5706_v60 }
  0xca   :  { %v408_v4 = vadd.f32 %v407_v0, %v316_v55  ;;  %700 = vmatmul.f32.gmra.mxu1 %v5706_v60 }
  0xcb   :  { %821 = vmatmul.f32.gmra.mxu2 %v5755_v28 }
  0xcc   :  { %v5931_v58 = vadd.f32 %v513_v11, %v408_v4  ;;  %944 = vmatmul.f32.gmra.mxu3 %v5723_v3 }
  0xcd   :  { %v196_v13 = vpop.f32.mrf.mxu0 }
  0xce   :  { %v412_v36 = vpop.f32.mrf.mxu2 }
  0xcf   :  { %v319_v9 = vpop.f32.mrf.mxu1  ;;  %v519_v33 = vpop.f32.mrf.mxu3 }
  0xd0   :  { %v320_v24 = vadd.f32 %v319_v9, %v196_v13  ;;  %621 = vmatmul.f32.gmra.mxu0 %v5723_v3 }
  0xd2   :  { %v413_v20 = vadd.f32 %v412_v36, %v320_v24  ;;  %704 = vmatmul.f32.gmra.mxu1 %v5723_v3 }
  0xd3   :  { %829 = vmatmul.f32.gmra.mxu2 %v5774_v16 }
  0xd4   :  { %v5937_v1 = vadd.f32 %v519_v33, %v413_v20  ;;  %948 = vmatmul.f32.gmra.mxu3 %v5740_v12 }
  0xd5   :  { %v204_v0 = vpop.f32.mrf.mxu0 }
  0xd6   :  { %v417_v55 = vpop.f32.mrf.mxu2 }
  0xd7   :  { %v323_v28 = vpop.f32.mrf.mxu1  ;;  %v525_v4 = vpop.f32.mrf.mxu3 }
  0xd8   :  { %v324_v11 = vadd.f32 %v323_v28, %v204_v0  ;;  %625 = vmatmul.f32.gmra.mxu0 %v5740_v12 }
  0xda   :  { %v418_v13 = vadd.f32 %v417_v55, %v324_v11  ;;  %708 = vmatmul.f32.gmra.mxu1 %v5740_v12 }
  0xdb   :  { %837 = vmatmul.f32.gmra.mxu2 %v5792_v57 }
  0xdc   :  { %v5943_v9 = vadd.f32 %v525_v4, %v418_v13  ;;  %952 = vmatmul.f32.gmra.mxu3 %v5760_v30 }
  0xdd   :  { %v212_v36 = vpop.f32.mrf.mxu0 }
  0xde   :  { %v422_v24 = vpop.f32.mrf.mxu2 }
  0xdf   :  { %v327_v16 = vpop.f32.mrf.mxu1  ;;  %v531_v20 = vpop.f32.mrf.mxu3 }
  0xe0   :  { %v328_v33 = vadd.f32 %v327_v16, %v212_v36  ;;  %629 = vmatmul.f32.gmra.mxu0 %v5760_v30 }
  0xe2   :  { %v423_v0 = vadd.f32 %v422_v24, %v328_v33  ;;  %712 = vmatmul.f32.gmra.mxu1 %v5760_v30 }
  0xe3   :  { %845 = vmatmul.f32.gmra.mxu2 %v5809_v7 }
  0xe4   :  { %v5949_v28 = vadd.f32 %v531_v20, %v423_v0  ;;  %956 = vmatmul.f32.gmra.mxu3 %v5779_v47 }
  0xe5   :  { %v220_v55 = vpop.f32.mrf.mxu0 }
  0xe6   :  { %v427_v11 = vpop.f32.mrf.mxu2 }
  0xe7   :  { %v331_v57 = vpop.f32.mrf.mxu1  ;;  %v537_v13 = vpop.f32.mrf.mxu3 }
  0xe8   :  { %v332_v4 = vadd.f32 %v331_v57, %v220_v55  ;;  %633 = vmatmul.f32.gmra.mxu0 %v5779_v47 }
  0xea   :  { %v428_v36 = vadd.f32 %v427_v11, %v332_v4  ;;  %716 = vmatmul.f32.gmra.mxu1 %v5779_v47 }
  0xeb   :  { %853 = vmatmul.f32.gmra.mxu2 %v5826_v32 }
  0xec   :  { %v5955_v16 = vadd.f32 %v537_v13, %v428_v36  ;;  %960 = vmatmul.f32.gmra.mxu3 %v5797_v61 }
  0xed   :  { %v228_v24 = vpop.f32.mrf.mxu0 }
  0xee   :  { %v432_v33 = vpop.f32.mrf.mxu2 }
  0xef   :  { %v335_v7 = vpop.f32.mrf.mxu1  ;;  %v543_v0 = vpop.f32.mrf.mxu3 }
  0xf0   :  { %v336_v20 = vadd.f32 %v335_v7, %v228_v24  ;;  %637 = vmatmul.f32.gmra.mxu0 %v5797_v61 }
  0xf2   :  { %v433_v55 = vadd.f32 %v432_v33, %v336_v20  ;;  %720 = vmatmul.f32.gmra.mxu1 %v5797_v61 }
  0xf3   :  { %861 = vmatmul.f32.gmra.mxu2 %v5843_v50 }
  0xf4   :  { %v5961_v57 = vadd.f32 %v543_v0, %v433_v55  ;;  %964 = vmatmul.f32.gmra.mxu3 %v5814_v17 }
  0xf5   :  { %v236_v11 = vpop.f32.mrf.mxu0 }
  0xf6   :  { %v437_v4 = vpop.f32.mrf.mxu2 }
  0xf7   :  { %v339_v32 = vpop.f32.mrf.mxu1  ;;  %v549_v36 = vpop.f32.mrf.mxu3 }
  0xf8   :  { %v340_v13 = vadd.f32 %v339_v32, %v236_v11  ;;  %641 = vmatmul.f32.gmra.mxu0 %v5814_v17 }
  0xfa   :  { %v438_v24 = vadd.f32 %v437_v4, %v340_v13  ;;  %724 = vmatmul.f32.gmra.mxu1 %v5814_v17 }
  0xfb   :  { %869 = vmatmul.f32.gmra.mxu2 %v5860_v25 }
  0xfc   :  { %v5967_v7 = vadd.f32 %v549_v36, %v438_v24  ;;  %968 = vmatmul.f32.gmra.mxu3 %v5831_v34 }
  0xfd   :  { %v244_v33 = vpop.f32.mrf.mxu0 }
  0xfe   :  { %7523 = vst [vmem:[#allocation19_spill] sm:$0xff] %v5967_v7  ;;  %v442_v20 = vpop.f32.mrf.mxu2 }
  0xff   :  { %v343_v50 = vpop.f32.mrf.mxu1  ;;  %v555_v55 = vpop.f32.mrf.mxu3 }
 0x100   :  { %v344_v0 = vadd.f32 %v343_v50, %v244_v33  ;;  %645 = vmatmul.f32.gmra.mxu0 %v5831_v34 }
 0x102   :  { %v443_v11 = vadd.f32 %v442_v20, %v344_v0  ;;  %728 = vmatmul.f32.gmra.mxu1 %v5831_v34 }
 0x103   :  { %877 = vmatmul.f32.gmra.mxu2 %v5876_v5 }
 0x104   :  { %v5973_v32 = vadd.f32 %v555_v55, %v443_v11  ;;  %972 = vmatmul.f32.gmra.mxu3 %v5848_v62 }
 0x105   :  { %v252_v4 = vpop.f32.mrf.mxu0 }
 0x106   :  { %v447_v13 = vpop.f32.mrf.mxu2 }
 0x107   :  { %v347_v25 = vpop.f32.mrf.mxu1  ;;  %v561_v24 = vpop.f32.mrf.mxu3 }
 0x108   :  { %v348_v36 = vadd.f32 %v347_v25, %v252_v4  ;;  %649 = vmatmul.f32.gmra.mxu0 %v5848_v62 }
 0x10a   :  { %v448_v33 = vadd.f32 %v447_v13, %v348_v36  ;;  %732 = vmatmul.f32.gmra.mxu1 %v5848_v62 }
 0x10b   :  { %885 = vmatmul.f32.gmra.mxu2 %v5887_v23 }
 0x10c   :  { %v5979_v50 = vadd.f32 %v561_v24, %v448_v33  ;;  %976 = vmatmul.f32.gmra.mxu3 %v5865_v41 }
 0x10d   :  { %v260_v20 = vpop.f32.mrf.mxu0 }
 0x10e   :  { %7524 = vst [vmem:[#allocation20_spill] sm:$0xff] %v5979_v50  ;;  %v452_v0 = vpop.f32.mrf.mxu2 }
 0x10f   :  { %v351_v5 = vpop.f32.mrf.mxu1  ;;  %v567_v11 = vpop.f32.mrf.mxu3 }
 0x110   :  { %v352_v55 = vadd.f32 %v351_v5, %v260_v20  ;;  %653 = vmatmul.f32.gmra.mxu0 %v5865_v41 }
 0x112   :  { %v453_v4 = vadd.f32 %v452_v0, %v352_v55  ;;  %736 = vmatmul.f32.gmra.mxu1 %v5865_v41 }
 0x113   :  { %1219 = vmatmul.f32.vlgmr.msra.gmra.mxu2 %v5602_v8 }
 0x114   :  { %v5985_v25 = vadd.f32 %v567_v11, %v453_v4  ;;  %1302 = vmatmul.f32.vlgmr.msra.gmra.mxu3 %v5602_v8 }
 0x115   :  { %v594_v13 = vpop.f32.mrf.mxu0 }
 0x116   :  { %7525 = vst [vmem:[#allocation21_spill] sm:$0xff] %v5985_v25  ;;  %v595_v23 = vadd.f32 %v594_v13, %v5895_v43  ;;  %v766_v24 = vpop.f32.mrf.mxu2 }
 0x117   :  { %v677_v36 = vpop.f32.mrf.mxu1  ;;  %v917_v33 = vpop.f32.mrf.mxu3 }
 0x118   :  { %1002 = vmatmul.f32.vlgmr.msra.gmra.mxu0 %v5610_v15  ;;  %v678_v20 = vadd.f32 %v677_v36, %v595_v23  ;;  %v5991_v5 = vadd.f32 %v917_v33, %v766_v24 }
 0x11a   :  { %1102 = vmatmul.f32.vlgmr.msra.gmra.mxu1 %v5620_v21  ;;  %v1398_v0 = vand.u32 4294901760, %v678_v20 }
 0x11b   :  { %1223 = vmatmul.f32.gmra.mxu2 %v5607_v14 }
 0x11c   :  { %1306 = vmatmul.f32.gmra.mxu3 %v5607_v14  ;;  %v1454_v13 = vsub.f32 %v678_v20, %v1398_v0 }
 0x11d   :  { %v598_v55 = vpop.f32.mrf.mxu0 }
 0x11e   :  { %v599_v8 = vadd.f32 %v598_v55, %v5901_v48  ;;  %v774_v43 = vpop.f32.mrf.mxu2  ;;  %v1455_v48 = vand.u32 4294901760, %v1454_v13 }
 0x11f   :  { %v681_v11 = vpop.f32.mrf.mxu1  ;;  %v921_v15 = vpop.f32.mrf.mxu3 }
 0x120   :  { %v682_v4 = vadd.f32 %v681_v11, %v599_v8  ;;  %1007 = vmatmul.f32.gmra.mxu0 %v5616_v19  ;;  %v5998_v23 = vadd.f32 %v921_v15, %v774_v43  ;;  %v1456_v11 = vsub.f32 %v1454_v13, %v1455_v48 }
 0x122   :  { %v1396_v36 = vand.u32 4294901760, %v682_v4  ;;  %1108 = vmatmul.f32.gmra.mxu1 %v5628_v26 }
 0x123   :  { %1227 = vmatmul.f32.gmra.mxu2 %v5630_v27 }
 0x124   :  { %v1448_v21 = vsub.f32 %v682_v4, %v1396_v36  ;;  %1310 = vmatmul.f32.gmra.mxu3 %v5630_v27  ;;  %1397 = vmatpush.msrb.mxu0 %v1396_v36  ;;  %v1457_v4 = vand.u32 4294901760, %v1456_v11 }
 0x125   :  { %1532 = vmatpush.msrb.mxu3 %v1396_v36  ;;  %v602_v14 = vpop.f32.mrf.mxu0 }
 0x126   :  { %v603_v24 = vadd.f32 %v602_v14, %v5907_v31  ;;  %1492 = vmatpush.msrb.mxu2 %v1448_v21  ;;  %v1449_v19 = vand.u32 4294901760, %v1448_v21  ;;  %1399 = vmatpush.msrb.mxu0 %v1398_v0  ;;  %v782_v20 = vpop.f32.mrf.mxu2 }
 0x127   :  { %1534 = vmatpush.msrb.mxu3 %v1398_v0  ;;  %v685_v33 = vpop.f32.mrf.mxu1  ;;  %v925_v26 = vpop.f32.mrf.mxu3 }
 0x128   :  { %1012 = vmatmul.f32.gmra.mxu0 %v5642_v35  ;;  %1495 = vmatpush.msrb.mxu2 %v1454_v13  ;;  %v1450_v55 = vsub.f32 %v1448_v21, %v1449_v19  ;;  %v686_v8 = vadd.f32 %v685_v33, %v603_v24  ;;  %v6005_v27 = vadd.f32 %v925_v26, %v782_v20 }
 0x129   :  { %1577 = vmatpush.msra.mxu0 %v1449_v19 }
 0x12a   :  { %1114 = vmatmul.f32.gmra.mxu1 %v5652_v38  ;;  %v1451_v43 = vand.u32 4294901760, %v1450_v55  ;;  %v6010_v31 = vand.u32 4294901760, %v686_v8 }
 0x12b   :  { %1581 = vmatpush.msra.mxu0 %v1455_v48  ;;  %1231 = vmatmul.f32.gmra.mxu2 %v5654_v39 }
 0x12c   :  { %1314 = vmatmul.f32.gmra.mxu3 %v5654_v39  ;;  %1452 = vmatpush.msrb.mxu1 %v1451_v43  ;;  %v6015_v13 = vsub.f32 %v686_v8, %v6010_v31 }
 0x12d   :  { %v606_v35 = vpop.f32.mrf.mxu0 }
 0x12e   :  { %v607_v15 = vadd.f32 %v606_v35, %v5913_v37  ;;  %1458 = vmatpush.msrb.mxu1 %v1457_v4  ;;  %v790_v14 = vpop.f32.mrf.mxu2 }
 0x12f   :  { %v689_v21 = vpop.f32.mrf.mxu1  ;;  %v929_v38 = vpop.f32.mrf.mxu3 }
 0x130   :  { %v690_v24 = vadd.f32 %v689_v21, %v607_v15  ;;  %1614 = vmatpush.msra.mxu1 %v1396_v36  ;;  %1017 = vmatmul.f32.gmra.mxu0 %v5661_v42  ;;  %v6017_v48 = vadd.f32 %v929_v38, %v790_v14  ;;  %v7485_v36 = vand.u32 4294901760, %v6015_v13 }
 0x132   :  { %v6019_v39 = vand.u32 4294901760, %v690_v24  ;;  %1616 = vmatpush.msra.mxu1 %v1398_v0  ;;  %v1708_v26 = vsub.f32 %v6015_v13, %v7485_v36 }
 0x133   :  { %1120 = vmatmul.f32.gmra.mxu1 %v5670_v45  ;;  %1235 = vmatmul.f32.gmra.mxu2 %v5672_v46 }
 0x134   :  { %v6023_v37 = vsub.f32 %v690_v24, %v6019_v39  ;;  %1318 = vmatmul.f32.gmra.mxu3 %v5672_v46  ;;  %1649 = vmatpush.msra.mxu2 %v6019_v39  ;;  %v1709_v8 = vand.u32 4294901760, %v1708_v26 }
 0x135   :  { %v6028_v42 = vpop.f32.mrf.mxu0 }
 0x136   :  { %v7486_v19 = vand.u32 4294901760, %v6023_v37  ;;  %1651 = vmatpush.msra.mxu2 %v6010_v31  ;;  %v798_v45 = vpop.f32.mrf.mxu2 }
 0x137   :  { %v6033_v0 = vpop.f32.mrf.mxu1  ;;  %v933_v33 = vpop.f32.mrf.mxu3 }
 0x138   :  { %1022 = vmatmul.f32.gmra.mxu0 %v5678_v49  ;;  %v1702_v46 = vsub.f32 %v6023_v37, %v7486_v19  ;;  %v6039_v20 = vadd.f32 %v933_v33, %v798_v45  ;;  %v7540_v19 = vld [vmem:[#allocation16_spill] sm:$0xff] }
 0x13a   :  { %v1703_v55 = vand.u32 4294901760, %v1702_v46 }
 0x13b   :  { %1126 = vmatmul.f32.gmra.mxu1 %v5687_v52  ;;  %1239 = vmatmul.f32.gmra.mxu2 %v5689_v53 }
 0x13c   :  { %1322 = vmatmul.f32.gmra.mxu3 %v5689_v53 }
 0x13d   :  { %1704 = vmatpush.msra.mxu3 %v1703_v55  ;;  %v6047_v49 = vpop.f32.mrf.mxu0 }
 0x13e   :  { %v806_v43 = vpop.f32.mrf.mxu2 }
 0x13f   :  { %1710 = vmatpush.msra.mxu3 %v1709_v8  ;;  %v6049_v11 = vpop.f32.mrf.mxu1  ;;  %v937_v35 = vpop.f32.mrf.mxu3 }
 0x140   :  { %1027 = vmatmul.f32.gmra.mxu0 %v5695_v56  ;;  %v6052_v4 = vadd.f32 %v937_v35, %v806_v43  ;;  %v7527_v35 = vld [vmem:[#allocation9_spill] sm:$0xff] }
 0x143   :  { %1132 = vmatmul.f32.gmra.mxu1 %v5704_v59  ;;  %1243 = vmatmul.f32.gmra.mxu2 %v5706_v60 }
 0x144   :  { %1326 = vmatmul.f32.gmra.mxu3 %v5706_v60 }
 0x145   :  { %v6057_v52 = vpop.f32.mrf.mxu0 }
 0x146   :  { %v814_v15 = vpop.f32.mrf.mxu2 }
 0x147   :  { %v6059_v53 = vpop.f32.mrf.mxu1  ;;  %v941_v21 = vpop.f32.mrf.mxu3 }
 0x148   :  { %1032 = vmatmul.f32.gmra.mxu0 %v5712_v63  ;;  %v6062_v14 = vadd.f32 %v941_v21, %v814_v15 }
 0x14b   :  { %1138 = vmatmul.f32.gmra.mxu1 %v5721_v2  ;;  %1247 = vmatmul.f32.gmra.mxu2 %v5723_v3 }
 0x14c   :  { %1330 = vmatmul.f32.gmra.mxu3 %v5723_v3 }
 0x14d   :  { %v6067_v56 = vpop.f32.mrf.mxu0 }
 0x14e   :  { %v822_v60 = vpop.f32.mrf.mxu2 }
 0x14f   :  { %v6069_v59 = vpop.f32.mrf.mxu1  ;;  %v945_v24 = vpop.f32.mrf.mxu3 }
 0x150   :  { %1037 = vmatmul.f32.gmra.mxu0 %v5729_v6  ;;  %v6072_v38 = vadd.f32 %v945_v24, %v822_v60 }
 0x153   :  { %1144 = vmatmul.f32.gmra.mxu1 %v5738_v10  ;;  %1251 = vmatmul.f32.gmra.mxu2 %v5740_v12 }
 0x154   :  { %1334 = vmatmul.f32.gmra.mxu3 %v5740_v12 }
 0x155   :  { %v6077_v63 = vpop.f32.mrf.mxu0 }
 0x156   :  { %v830_v3 = vpop.f32.mrf.mxu2 }
 0x157   :  { %v6079_v2 = vpop.f32.mrf.mxu1  ;;  %v949_v45 = vpop.f32.mrf.mxu3 }
 0x158   :  { %1042 = vmatmul.f32.gmra.mxu0 %v5746_v18  ;;  %v6082_v33 = vadd.f32 %v949_v45, %v830_v3  ;;  %v7531_v3 = vld [vmem:[#allocation11_spill] sm:$0xff] }
 0x15b   :  { %1150 = vmatmul.f32.gmra.mxu1 %v5758_v29  ;;  %1255 = vmatmul.f32.gmra.mxu2 %v5760_v30 }
 0x15c   :  { %1338 = vmatmul.f32.gmra.mxu3 %v5760_v30 }
 0x15d   :  { %v6087_v6 = vpop.f32.mrf.mxu0 }
 0x15e   :  { %v838_v12 = vpop.f32.mrf.mxu2 }
 0x15f   :  { %v6089_v10 = vpop.f32.mrf.mxu1  ;;  %v953_v46 = vpop.f32.mrf.mxu3 }
 0x160   :  { %1047 = vmatmul.f32.gmra.mxu0 %v5768_v40  ;;  %v6092_v26 = vadd.f32 %v953_v46, %v838_v12  ;;  %v7526_v40 = vld [vmem:[#allocation8_spill] sm:$0xff] }
 0x161   :  { %v7532_v46 = vld [vmem:[#allocation12_spill] sm:$0xff] }
 0x163   :  { %1156 = vmatmul.f32.gmra.mxu1 %v5777_v22  ;;  %1259 = vmatmul.f32.gmra.mxu2 %v5779_v47 }
 0x164   :  { %1342 = vmatmul.f32.gmra.mxu3 %v5779_v47 }
 0x165   :  { %v6097_v18 = vpop.f32.mrf.mxu0 }
 0x166   :  { %v846_v30 = vpop.f32.mrf.mxu2 }
 0x167   :  { %v6099_v29 = vpop.f32.mrf.mxu1  ;;  %v957_v55 = vpop.f32.mrf.mxu3 }
 0x168   :  { %1052 = vmatmul.f32.gmra.mxu0 %v5786_v54  ;;  %v6102_v8 = vadd.f32 %v957_v55, %v846_v30  ;;  %v7528_v54 = vld [vmem:[#allocation10_spill] sm:$0xff]  ;;  %v1366_v55 = vld [vmem:[#allocation4] sm:$0xff] }
 0x16b   :  { %1162 = vmatmul.f32.gmra.mxu1 %v7526_v40  ;;  %1263 = vmatmul.f32.gmra.mxu2 %v5797_v61 }
 0x16c   :  { %1346 = vmatmul.f32.gmra.mxu3 %v5797_v61 }
 0x16d   :  { %v6107_v22 = vpop.f32.mrf.mxu0 }
 0x16e   :  { %v854_v47 = vpop.f32.mrf.mxu2 }
 0x16f   :  { %v6109_v43 = vpop.f32.mrf.mxu1  ;;  %v961_v15 = vpop.f32.mrf.mxu3 }
 0x170   :  { %1057 = vmatmul.f32.gmra.mxu0 %v7527_v35  ;;  %v6112_v21 = vadd.f32 %v961_v15, %v854_v47  ;;  %v7535_v47 = vld [vmem:[#allocation13_spill] sm:$0xff] }
 0x173   :  { %1168 = vmatmul.f32.gmra.mxu1 %v7528_v54  ;;  %1267 = vmatmul.f32.gmra.mxu2 %v5814_v17  ;;  %v1371_v54 = vsel %vm67_vm0, %v1366_v55, 0 }
 0x174   :  { %1350 = vmatmul.f32.gmra.mxu3 %v5814_v17 }
 0x175   :  { %v6117_v60 = vpop.f32.mrf.mxu0 }
 0x176   :  { %7529 = vst [vmem:[#allocation8_spill] sm:$0xff] %v6117_v60  ;;  %v862_v61 = vpop.f32.mrf.mxu2 }
 0x177   :  { %v6119_v24 = vpop.f32.mrf.mxu1  ;;  %v965_v45 = vpop.f32.mrf.mxu3 }
 0x178   :  { %7530 = vst [vmem:[#allocation9_spill] sm:$0xff] %v6119_v24  ;;  %1062 = vmatmul.f32.gmra.mxu0 %v7531_v3  ;;  %v6122_v12 = vadd.f32 %v965_v45, %v862_v61  ;;  %v7536_v61 = vld [vmem:[#allocation14_spill] sm:$0xff]  ;;  %v1367_v45 = vld [vmem:[#allocation4 + $0x8] sm:$0xff] }
 0x179   :  { %v7544_v24 = vld [vmem:[#allocation18_spill] sm:$0xff] }
 0x17b   :  { %1174 = vmatmul.f32.gmra.mxu1 %v7532_v46  ;;  %1271 = vmatmul.f32.gmra.mxu2 %v5831_v34 }
 0x17c   :  { %1354 = vmatmul.f32.gmra.mxu3 %v5831_v34  ;;  %v6138_v34 = vand.u32 4294901760, %v1371_v54 }
 0x17d   :  { %v6127_v30 = vpop.f32.mrf.mxu0 }
 0x17e   :  { %7533 = vst [vmem:[#allocation10_spill] sm:$0xff] %v6127_v30  ;;  %v870_v40 = vpop.f32.mrf.mxu2 }
 0x17f   :  { %v6129_v17 = vpop.f32.mrf.mxu1  ;;  %v969_v35 = vpop.f32.mrf.mxu3 }
 0x180   :  { %7534 = vst [vmem:[#allocation11_spill] sm:$0xff] %v6129_v17  ;;  %1067 = vmatmul.f32.gmra.mxu0 %v7535_v47  ;;  %v6132_v15 = vadd.f32 %v969_v35, %v870_v40  ;;  %v7539_v47 = vld [vmem:[#allocation15_spill] sm:$0xff]  ;;  %v6146_v35 = vsub.f32 %v1371_v54, %v6138_v34 }
 0x183   :  { %1180 = vmatmul.f32.gmra.mxu1 %v7536_v61  ;;  %1275 = vmatmul.f32.gmra.mxu2 %v5848_v62  ;;  %v1374_v61 = vsel %vm67_vm0, %v1367_v45, 0 }
 0x184   :  { %1358 = vmatmul.f32.gmra.mxu3 %v5848_v62  ;;  %v6155_v62 = vand.u32 4294901760, %v6146_v35 }
 0x185   :  { %v6140_v3 = vpop.f32.mrf.mxu0 }
 0x186   :  { %7537 = vst [vmem:[#allocation12_spill] sm:$0xff] %v6140_v3  ;;  %v878_v36 = vpop.f32.mrf.mxu2  ;;  %v1368_v3 = vld [vmem:[#allocation4 + $0x10] sm:$0xff] }
 0x187   :  { %v6142_v46 = vpop.f32.mrf.mxu1  ;;  %v973_v40 = vpop.f32.mrf.mxu3  ;;  %v1377_v25 = vsel %vm67_vm0, %v1368_v3, 0 }
 0x188   :  { %7538 = vst [vmem:[#allocation13_spill] sm:$0xff] %v6142_v46  ;;  %1072 = vmatmul.f32.gmra.mxu0 %v7539_v47  ;;  %v6148_v55 = vadd.f32 %v973_v40, %v878_v36  ;;  %v6157_v46 = vand.u32 4294901760, %v1374_v61  ;;  %v7543_v40 = vld [vmem:[#allocation17_spill] sm:$0xff] }
 0x18a   :  { %v6167_v50 = vsub.f32 %v1374_v61, %v6157_v46  ;;  %v7545_v61 = vand.u32 4294901760, %v6023_v37 }
 0x18b   :  { %1186 = vmatmul.f32.gmra.mxu1 %v7540_v19  ;;  %1279 = vmatmul.f32.gmra.mxu2 %v5865_v41  ;;  %v1403_v19 = vsub.f32 %v6146_v35, %v6155_v62 }
 0x18c   :  { %1362 = vmatmul.f32.gmra.mxu3 %v5865_v41 }
 0x18d   :  { %v6159_v47 = vpop.f32.mrf.mxu0 }
 0x18e   :  { %7541 = vst [vmem:[#allocation14_spill] sm:$0xff] %v6159_v47  ;;  %v886_v36 = vpop.f32.mrf.mxu2  ;;  %v6180_v47 = vand.u32 4294901760, %v1377_v25 }
 0x18f   :  { %v6161_v54 = vpop.f32.mrf.mxu1  ;;  %v977_v45 = vpop.f32.mrf.mxu3 }
 0x190   :  { %7542 = vst [vmem:[#allocation15_spill] sm:$0xff] %v6161_v54  ;;  %1077 = vmatmul.f32.gmra.mxu0 %v7543_v40  ;;  %v6169_v41 = vadd.f32 %v977_v45, %v886_v36  ;;  %v6175_v54 = vand.u32 4294901760, %v1403_v19  ;;  %v6178_v40 = vand.u32 4294901760, %v6167_v50  ;;  %v7546_v45 = vand.u32 4294901760, %v6015_v13 }
 0x191   :  { %v6193_v30 = vsub.f32 %v1377_v25, %v6180_v47 }
 0x193   :  { %1192 = vmatmul.f32.gmra.mxu1 %v7544_v24  ;;  %1498 = vmatmul.f32.vlgmr.msrb.gmra.mxu2 %v6146_v35  ;;  %v1369_v24 = vld [vmem:[#allocation4 + $0x18] sm:$0xff]  ;;  %v6206_v25 = vand.u32 4294901760, %v6193_v30 }
 0x194   :  { %1538 = vmatmul.f32.vlgmr.msrb.gmra.mxu3 %v6155_v62  ;;  %1829 = vmatpush.msrb.mxu2 %v7545_v61  ;;  %v1411_v61 = vsub.f32 %v6167_v50, %v6178_v40 }
 0x195   :  { %1866 = vmatpush.msrb.mxu3 %v6019_v39  ;;  %v1003_v36 = vpop.f32.mrf.mxu0 }
 0x196   :  { %v1004_v3 = vadd.f32 %v1003_v36, %v5991_v5  ;;  %1833 = vmatpush.msrb.mxu2 %v7546_v45  ;;  %v1220_v17 = vpop.f32.mrf.mxu2  ;;  %v1380_v5 = vsel %vm67_vm0, %v1369_v24, 0  ;;  %v6203_v45 = vand.u32 4294901760, %v1411_v61  ;;  %v1419_v24 = vsub.f32 %v6193_v30, %v6206_v25 }
 0x197   :  { %1868 = vmatpush.msrb.mxu3 %v6010_v31  ;;  %v1103_v19 = vpop.f32.mrf.mxu1  ;;  %v1303_v7 = vpop.f32.mrf.mxu3 }
 0x198   :  { %v1104_v60 = vadd.f32 %v1103_v19, %v1004_v3  ;;  %1405 = vmatmul.f32.vlgmr.msrb.gmra.mxu0 %v6175_v54  ;;  %v6208_v19 = vand.u32 4294901760, %v1380_v5 }
 0x199   :  { %1744 = vmatpush.msrb.mxu0 %v6023_v37 }
 0x19a   :  { %v1221_v36 = vadd.f32 %v1220_v17, %v1104_v60  ;;  %v6217_v61 = vsub.f32 %v1380_v5, %v6208_v19 }
 0x19b   :  { %1460 = vmatmul.f32.vlgmr.msrb.gmra.mxu1 %v6138_v34  ;;  %1747 = vmatpush.msrb.mxu0 %v6015_v13 }
 0x19c   :  { %1784 = vmatpush.msrb.mxu1 %v6019_v39  ;;  %v6200_v3 = vadd.f32 %v1303_v7, %v1221_v36  ;;  %1503 = vmatmul.f32.gmra.mxu2 %v6167_v50  ;;  %v615_v36 = vadd.f32 %v6047_v49, %v5925_v51 }
 0x19d   :  { %1544 = vmatmul.f32.gmra.mxu3 %v6178_v40  ;;  %v1008_v37 = vpop.f32.mrf.mxu0 }
 0x19e   :  { %7547 = vst [vmem:[#allocation16_spill] sm:$0xff] %v6200_v3  ;;  %1786 = vmatpush.msrb.mxu1 %v6010_v31  ;;  %v1009_v13 = vadd.f32 %v1008_v37, %v5998_v23  ;;  %v1224_v39 = vpop.f32.mrf.mxu2  ;;  %v611_v23 = vadd.f32 %v6028_v42, %v5919_v44  ;;  %v6227_v37 = vand.u32 4294901760, %v1419_v24  ;;  %v698_v51 = vadd.f32 %v6049_v11, %v615_v36 }
 0x19f   :  { %v1109_v60 = vpop.f32.mrf.mxu1  ;;  %v1307_v17 = vpop.f32.mrf.mxu3 }
 0x1a0   :  { %v1110_v7 = vadd.f32 %v1109_v60, %v1009_v13  ;;  %1413 = vmatmul.f32.gmra.mxu0 %v6203_v45  ;;  %v6230_v13 = vand.u32 4294901760, %v6217_v61  ;;  %v694_v44 = vadd.f32 %v6033_v0, %v611_v23 }
 0x1a2   :  { %v1225_v3 = vadd.f32 %v1224_v39, %v1110_v7  ;;  %v1427_v7 = vsub.f32 %v6217_v61, %v6230_v13 }
 0x1a3   :  { %1464 = vmatmul.f32.gmra.mxu1 %v6157_v46 }
 0x1a4   :  { %v6224_v31 = vadd.f32 %v1307_v17, %v1225_v3  ;;  %1508 = vmatmul.f32.gmra.mxu2 %v6193_v30  ;;  %v6239_v17 = vand.u32 4294901760, %v698_v51 }
 0x1a5   :  { %1550 = vmatmul.f32.gmra.mxu3 %v6206_v25  ;;  %v1013_v5 = vpop.f32.mrf.mxu0 }
 0x1a6   :  { %7548 = vst [vmem:[#allocation17_spill] sm:$0xff] %v6224_v31  ;;  %v1014_v49 = vadd.f32 %v1013_v5, %v6005_v27  ;;  %v1228_v39 = vpop.f32.mrf.mxu2  ;;  %v6242_v31 = vand.u32 4294901760, %v694_v44  ;;  %v6247_v27 = vand.u32 4294901760, %v1427_v7  ;;  %v6251_v36 = vsub.f32 %v698_v51, %v6239_v17 }
 0x1a7   :  { %v1115_v60 = vpop.f32.mrf.mxu1  ;;  %v1311_v3 = vpop.f32.mrf.mxu3 }
 0x1a8   :  { %v1116_v42 = vadd.f32 %v1115_v60, %v1014_v49  ;;  %1421 = vmatmul.f32.gmra.mxu0 %v6227_v37  ;;  %7550 = vst [vmem:[#allocation22_spill] sm:$0xff] %v6247_v27  ;;  %v6255_v49 = vsub.f32 %v694_v44, %v6242_v31 }
 0x1aa   :  { %v1229_v24 = vadd.f32 %v1228_v39, %v1116_v42  ;;  %v7491_v51 = vand.u32 4294901760, %v6255_v49 }
 0x1ab   :  { %1468 = vmatmul.f32.gmra.mxu1 %v6180_v47 }
 0x1ac   :  { %v6244_v11 = vadd.f32 %v1311_v3, %v1229_v24  ;;  %1513 = vmatmul.f32.gmra.mxu2 %v6217_v61  ;;  %v7489_v3 = vand.u32 4294901760, %v6251_v36 }
 0x1ad   :  { %1556 = vmatmul.f32.gmra.mxu3 %v6230_v13  ;;  %v1018_v0 = vpop.f32.mrf.mxu0 }
 0x1ae   :  { %7549 = vst [vmem:[#allocation18_spill] sm:$0xff] %v6244_v11  ;;  %v1019_v23 = vadd.f32 %v1018_v0, %v6017_v48  ;;  %v1232_v5 = vpop.f32.mrf.mxu2  ;;  %v1954_v0 = vsub.f32 %v6251_v36, %v7489_v3 }
 0x1af   :  { %v1315_v39 = vpop.f32.mrf.mxu3 }
 0x1b0   :  { %v1121_v60 = vpop.f32.mrf.mxu1  ;;  %1429 = vmatmul.f32.gmra.mxu0 %v6247_v27 }
 0x1b1   :  { %v1122_v42 = vadd.f32 %v1121_v60, %v1019_v23 }
 0x1b3   :  { %v1233_v7 = vadd.f32 %v1232_v5, %v1122_v42  ;;  %1472 = vmatmul.f32.gmra.mxu1 %v6208_v19 }
 0x1b4   :  { %1657 = vmatmul.f32.vlgmr.msra.gmra.mxu2 %v6175_v54 }
 0x1b5   :  { %v6262_v24 = vadd.f32 %v1315_v39, %v1233_v7  ;;  %1712 = vmatmul.f32.vlgmr.msra.gmra.mxu3 %v6138_v34  ;;  %1996 = vmatpush.msra.mxu2 %v6251_v36  ;;  %v1023_v48 = vpop.f32.mrf.mxu0  ;;  %v1960_v39 = vsub.f32 %v6255_v49, %v7491_v51 }
 0x1b6   :  { %2036 = vmatpush.msra.mxu3 %v6239_v17  ;;  %v1024_v44 = vadd.f32 %v1023_v48, %v6039_v20  ;;  %v1236_v23 = vpop.f32.mrf.mxu2  ;;  %v1955_v20 = vand.u32 4294901760, %v1954_v0  ;;  %v623_v48 = vadd.f32 %v6067_v56, %v5937_v1  ;;  %v619_v0 = vadd.f32 %v6057_v52, %v5931_v58 }
 0x1b7   :  { %1999 = vmatpush.msra.mxu2 %v6255_v49  ;;  %v1319_v60 = vpop.f32.mrf.mxu3  ;;  %v1961_v3 = vand.u32 4294901760, %v1960_v39 }
 0x1b8   :  { %2038 = vmatpush.msra.mxu3 %v6242_v31  ;;  %v1127_v5 = vpop.f32.mrf.mxu1  ;;  %1583 = vmatmul.f32.vlgmr.msra.gmra.mxu0 %v6138_v34 }
 0x1b9   :  { %v1128_v42 = vadd.f32 %v1127_v5, %v1024_v44  ;;  %1901 = vmatpush.msra.mxu0 %v6239_v17 }
 0x1bb   :  { %v1237_v7 = vadd.f32 %v1236_v23, %v1128_v42  ;;  %1618 = vmatmul.f32.vlgmr.msra.gmra.mxu1 %v6138_v34  ;;  %1903 = vmatpush.msra.mxu0 %v6242_v31  ;;  %v706_v42 = vadd.f32 %v6069_v59, %v623_v48 }
 0x1bc   :  { %1956 = vmatpush.msra.mxu1 %v1955_v20  ;;  %1665 = vmatmul.f32.gmra.mxu2 %v6203_v45 }
 0x1bd   :  { %v6283_v11 = vadd.f32 %v1319_v60, %v1237_v7  ;;  %1716 = vmatmul.f32.gmra.mxu3 %v6157_v46  ;;  %v1028_v44 = vpop.f32.mrf.mxu0  ;;  %v702_v60 = vadd.f32 %v6059_v53, %v619_v0  ;;  %v6293_v20 = vand.u32 4294901760, %v706_v42 }
 0x1be   :  { %1962 = vmatpush.msra.mxu1 %v1961_v3  ;;  %v1029_v23 = vadd.f32 %v1028_v44, %v6052_v4  ;;  %v1240_v5 = vpop.f32.mrf.mxu2 }
 0x1bf   :  { %v1323_v1 = vpop.f32.mrf.mxu3  ;;  %v6299_v52 = vand.u32 4294901760, %v702_v60 }
 0x1c0   :  { %v1133_v51 = vpop.f32.mrf.mxu1  ;;  %1587 = vmatmul.f32.gmra.mxu0 %v6157_v46 }
 0x1c1   :  { %v1134_v56 = vadd.f32 %v1133_v51, %v1029_v23  ;;  %v6303_v51 = vsub.f32 %v706_v42, %v6293_v20  ;;  %v6307_v44 = vsub.f32 %v702_v60, %v6299_v52 }
 0x1c3   :  { %v1241_v39 = vadd.f32 %v1240_v5, %v1134_v56  ;;  %1622 = vmatmul.f32.gmra.mxu1 %v6157_v46  ;;  %v2205_v23 = vand.u32 4294901760, %v6303_v51 }
 0x1c4   :  { %1673 = vmatmul.f32.gmra.mxu2 %v6227_v37 }
 0x1c5   :  { %v6296_v58 = vadd.f32 %v1323_v1, %v1241_v39  ;;  %1720 = vmatmul.f32.gmra.mxu3 %v6180_v47  ;;  %v1033_v4 = vpop.f32.mrf.mxu0  ;;  %v2211_v1 = vand.u32 4294901760, %v6307_v44 }
 0x1c6   :  { %v1034_v59 = vadd.f32 %v1033_v4, %v6062_v14  ;;  %v1244_v3 = vpop.f32.mrf.mxu2  ;;  %v2206_v4 = vsub.f32 %v6303_v51, %v2205_v23 }
 0x1c7   :  { %v1327_v7 = vpop.f32.mrf.mxu3 }
 0x1c8   :  { %v1139_v53 = vpop.f32.mrf.mxu1  ;;  %1591 = vmatmul.f32.gmra.mxu0 %v6180_v47 }
 0x1c9   :  { %v1140_v48 = vadd.f32 %v1139_v53, %v1034_v59 }
 0x1cb   :  { %v1245_v0 = vadd.f32 %v1244_v3, %v1140_v48  ;;  %1626 = vmatmul.f32.gmra.mxu1 %v6180_v47  ;;  %v2212_v3 = vsub.f32 %v6307_v44, %v2211_v1 }
 0x1cc   :  { %1681 = vmatmul.f32.gmra.mxu2 %v6247_v27 }
 0x1cd   :  { %v6312_v14 = vadd.f32 %v1327_v7, %v1245_v0  ;;  %1724 = vmatmul.f32.gmra.mxu3 %v6208_v19  ;;  %v1038_v5 = vpop.f32.mrf.mxu0 }
 0x1ce   :  { %v1039_v42 = vadd.f32 %v1038_v5, %v6072_v38  ;;  %v1248_v56 = vpop.f32.mrf.mxu2  ;;  %v2207_v38 = vand.u32 4294901760, %v2206_v4  ;;  %v2213_v5 = vand.u32 4294901760, %v2212_v3 }
 0x1cf   :  { %v1331_v60 = vpop.f32.mrf.mxu3 }
 0x1d0   :  { %v1145_v39 = vpop.f32.mrf.mxu1  ;;  %1595 = vmatmul.f32.gmra.mxu0 %v6208_v19 }
 0x1d1   :  { %v1146_v59 = vadd.f32 %v1145_v39, %v1039_v42 }
 0x1d3   :  { %v1249_v53 = vadd.f32 %v1248_v56, %v1146_v59  ;;  %1630 = vmatmul.f32.gmra.mxu1 %v6208_v19 }
 0x1d4   :  { %1835 = vmatmul.f32.vlgmr.msrb.gmra.mxu2 %v6138_v34 }
 0x1d5   :  { %v6326_v7 = vadd.f32 %v1331_v60, %v1249_v53  ;;  %1870 = vmatmul.f32.vlgmr.msrb.gmra.mxu3 %v6138_v34  ;;  %2153 = vmatpush.msrb.mxu2 %v6293_v20  ;;  %v1043_v48 = vpop.f32.mrf.mxu0  ;;  %v7551_v60 = vand.u32 4294901760, %v6251_v36  ;;  %v7552_v53 = vand.u32 4294901760, %v6255_v49 }
 0x1d6   :  { %2208 = vmatpush.msrb.mxu3 %v2207_v38  ;;  %v1044_v0 = vadd.f32 %v1043_v48, %v6082_v33  ;;  %v1252_v42 = vpop.f32.mrf.mxu2 }
 0x1d7   :  { %2155 = vmatpush.msrb.mxu2 %v6299_v52  ;;  %v1335_v39 = vpop.f32.mrf.mxu3 }
 0x1d8   :  { %2214 = vmatpush.msrb.mxu3 %v2213_v5  ;;  %v1151_v56 = vpop.f32.mrf.mxu1  ;;  %1750 = vmatmul.f32.vlgmr.msrb.gmra.mxu0 %v6146_v35 }
 0x1d9   :  { %v1152_v4 = vadd.f32 %v1151_v56, %v1044_v0  ;;  %2081 = vmatpush.msrb.mxu0 %v7551_v60 }
 0x1db   :  { %v1253_v59 = vadd.f32 %v1252_v42, %v1152_v4  ;;  %1790 = vmatmul.f32.vlgmr.msrb.gmra.mxu1 %v6155_v62  ;;  %2085 = vmatpush.msrb.mxu0 %v7552_v53 }
 0x1dc   :  { %2118 = vmatpush.msrb.mxu1 %v6239_v17  ;;  %1839 = vmatmul.f32.gmra.mxu2 %v6157_v46 }
 0x1dd   :  { %v6340_v33 = vadd.f32 %v1335_v39, %v1253_v59  ;;  %1874 = vmatmul.f32.gmra.mxu3 %v6157_v46  ;;  %v1048_v3 = vpop.f32.mrf.mxu0 }
 0x1de   :  { %2120 = vmatpush.msrb.mxu1 %v6242_v31  ;;  %v1049_v36 = vadd.f32 %v1048_v3, %v6092_v26  ;;  %v1256_v38 = vpop.f32.mrf.mxu2 }
 0x1df   :  { %v1339_v0 = vpop.f32.mrf.mxu3 }
 0x1e0   :  { %v1157_v48 = vpop.f32.mrf.mxu1  ;;  %1755 = vmatmul.f32.gmra.mxu0 %v6167_v50 }
 0x1e1   :  { %v1158_v49 = vadd.f32 %v1157_v48, %v1049_v36 }
 0x1e3   :  { %v1257_v5 = vadd.f32 %v1256_v38, %v1158_v49  ;;  %1796 = vmatmul.f32.gmra.mxu1 %v6178_v40 }
 0x1e4   :  { %1843 = vmatmul.f32.gmra.mxu2 %v6180_v47 }
 0x1e5   :  { %v6348_v17 = vadd.f32 %v1339_v0, %v1257_v5  ;;  %1878 = vmatmul.f32.gmra.mxu3 %v6180_v47  ;;  %v1053_v42 = vpop.f32.mrf.mxu0 }
 0x1e6   :  { %v1054_v31 = vadd.f32 %v1053_v42, %v6102_v8  ;;  %v1260_v56 = vpop.f32.mrf.mxu2 }
 0x1e7   :  { %v1343_v39 = vpop.f32.mrf.mxu3 }
 0x1e8   :  { %v1163_v26 = vpop.f32.mrf.mxu1  ;;  %1760 = vmatmul.f32.gmra.mxu0 %v6193_v30 }
 0x1e9   :  { %v1164_v4 = vadd.f32 %v1163_v26, %v1054_v31 }
 0x1eb   :  { %v1261_v60 = vadd.f32 %v1260_v56, %v1164_v4  ;;  %1802 = vmatmul.f32.gmra.mxu1 %v6206_v25 }
 0x1ec   :  { %1847 = vmatmul.f32.gmra.mxu2 %v6208_v19 }
 0x1ed   :  { %v6355_v59 = vadd.f32 %v1343_v39, %v1261_v60  ;;  %1882 = vmatmul.f32.gmra.mxu3 %v6208_v19  ;;  %v1058_v53 = vpop.f32.mrf.mxu0 }
 0x1ee   :  { %v1059_v3 = vadd.f32 %v1058_v53, %v6112_v21  ;;  %v1264_v36 = vpop.f32.mrf.mxu2 }
 0x1ef   :  { %v1347_v38 = vpop.f32.mrf.mxu3 }
 0x1f0   :  { %v1169_v8 = vpop.f32.mrf.mxu1  ;;  %1765 = vmatmul.f32.gmra.mxu0 %v6217_v61 }
 0x1f1   :  { %v1170_v48 = vadd.f32 %v1169_v8, %v1059_v3  ;;  %v627_v3 = vadd.f32 %v6077_v63, %v5943_v9 }
 0x1f3   :  { %v1265_v0 = vadd.f32 %v1264_v36, %v1170_v48  ;;  %1808 = vmatmul.f32.gmra.mxu1 %v6230_v13 }
 0x1f4   :  { %2002 = vmatmul.f32.vlgmr.msra.gmra.mxu2 %v6146_v35 }
 0x1f5   :  { %v6362_v49 = vadd.f32 %v1347_v38, %v1265_v0  ;;  %2042 = vmatmul.f32.vlgmr.msra.gmra.mxu3 %v6155_v62  ;;  %2333 = vmatpush.msra.mxu2 %v2205_v23  ;;  %v1063_v5 = vpop.f32.mrf.mxu0 }
 0x1f6   :  { %2370 = vmatpush.msra.mxu3 %v6293_v20  ;;  %v1064_v21 = vadd.f32 %v1063_v5, %v6122_v12  ;;  %v1268_v42 = vpop.f32.mrf.mxu2 }
 0x1f7   :  { %2337 = vmatpush.msra.mxu2 %v2211_v1  ;;  %v1351_v56 = vpop.f32.mrf.mxu3 }
 0x1f8   :  { %2372 = vmatpush.msra.mxu3 %v6299_v52  ;;  %v1175_v31 = vpop.f32.mrf.mxu1  ;;  %1909 = vmatmul.f32.vlgmr.msra.gmra.mxu0 %v6175_v54 }
 0x1f9   :  { %v1176_v26 = vadd.f32 %v1175_v31, %v1064_v21  ;;  %2248 = vmatpush.msra.mxu0 %v6303_v51 }
 0x1fb   :  { %v1269_v39 = vadd.f32 %v1268_v42, %v1176_v26  ;;  %1964 = vmatmul.f32.vlgmr.msra.gmra.mxu1 %v6138_v34  ;;  %2251 = vmatpush.msra.mxu0 %v6307_v44 }
 0x1fc   :  { %2288 = vmatpush.msra.mxu1 %v6293_v20  ;;  %2007 = vmatmul.f32.gmra.mxu2 %v6167_v50  ;;  %v631_v20 = vadd.f32 %v6087_v6, %v5949_v28  ;;  %v710_v28 = vadd.f32 %v6079_v2, %v627_v3 }
 0x1fd   :  { %v6378_v12 = vadd.f32 %v1351_v56, %v1269_v39  ;;  %2048 = vmatmul.f32.gmra.mxu3 %v6178_v40  ;;  %v1068_v23 = vpop.f32.mrf.mxu0 }
 0x1fe   :  { %2290 = vmatpush.msra.mxu1 %v6299_v52  ;;  %v1069_v1 = vadd.f32 %v1068_v23, %v6132_v15  ;;  %v1272_v4 = vpop.f32.mrf.mxu2  ;;  %v714_v36 = vadd.f32 %v6089_v10, %v631_v20  ;;  %v6400_v5 = vand.u32 4294901760, %v710_v28 }
 0x1ff   :  { %v1355_v60 = vpop.f32.mrf.mxu3 }
 0x200   :  { %v1181_v51 = vpop.f32.mrf.mxu1  ;;  %1917 = vmatmul.f32.gmra.mxu0 %v6203_v45  ;;  %v6397_v9 = vand.u32 4294901760, %v714_v36  ;;  %v6411_v31 = vsub.f32 %v710_v28, %v6400_v5 }
 0x201   :  { %v1182_v53 = vadd.f32 %v1181_v51, %v1069_v1 }
 0x202   :  { %v6407_v2 = vsub.f32 %v714_v36, %v6397_v9 }
 0x203   :  { %v1273_v44 = vadd.f32 %v1272_v4, %v1182_v53  ;;  %1968 = vmatmul.f32.gmra.mxu1 %v6157_v46  ;;  %v2463_v4 = vand.u32 4294901760, %v6411_v31 }
 0x204   :  { %2012 = vmatmul.f32.gmra.mxu2 %v6193_v30  ;;  %v2457_v23 = vand.u32 4294901760, %v6407_v2 }
 0x205   :  { %v6390_v52 = vadd.f32 %v1355_v60, %v1273_v44  ;;  %2054 = vmatmul.f32.gmra.mxu3 %v6206_v25  ;;  %v1073_v15 = vpop.f32.mrf.mxu0  ;;  %v2464_v3 = vsub.f32 %v6411_v31, %v2463_v4 }
 0x206   :  { %v1074_v8 = vadd.f32 %v1073_v15, %v6148_v55  ;;  %v1276_v38 = vpop.f32.mrf.mxu2  ;;  %v2458_v60 = vsub.f32 %v6407_v2, %v2457_v23 }
 0x207   :  { %v1359_v48 = vpop.f32.mrf.mxu3  ;;  %v2465_v28 = vand.u32 4294901760, %v2464_v3 }
 0x208   :  { %v1187_v6 = vpop.f32.mrf.mxu1  ;;  %1925 = vmatmul.f32.gmra.mxu0 %v6227_v37  ;;  %v2459_v36 = vand.u32 4294901760, %v2458_v60 }
 0x209   :  { %v1188_v0 = vadd.f32 %v1187_v6, %v1074_v8 }
 0x20b   :  { %v1277_v63 = vadd.f32 %v1276_v38, %v1188_v0  ;;  %1972 = vmatmul.f32.gmra.mxu1 %v6180_v47  ;;  %v639_v38 = vadd.f32 %v6107_v22, %v5961_v57  ;;  %v635_v0 = vadd.f32 %v6097_v18, %v5955_v16 }
 0x20c   :  { %2017 = vmatmul.f32.gmra.mxu2 %v6217_v61 }
 0x20d   :  { %v6403_v10 = vadd.f32 %v1359_v48, %v1277_v63  ;;  %2060 = vmatmul.f32.gmra.mxu3 %v6230_v13  ;;  %v1078_v55 = vpop.f32.mrf.mxu0 }
 0x20e   :  { %v1079_v21 = vadd.f32 %v1078_v55, %v6169_v41  ;;  %v1280_v42 = vpop.f32.mrf.mxu2  ;;  %v722_v55 = vadd.f32 %v6109_v43, %v639_v38 }
 0x20f   :  { %7553 = vst [vmem:[#allocation23_spill] sm:$0xff] %v6403_v10  ;;  %v1363_v26 = vpop.f32.mrf.mxu3 }
 0x210   :  { %v1193_v56 = vpop.f32.mrf.mxu1  ;;  %1933 = vmatmul.f32.gmra.mxu0 %v6247_v27 }
 0x211   :  { %v1194_v39 = vadd.f32 %v1193_v56, %v1079_v21 }
 0x213   :  { %v1281_v1 = vadd.f32 %v1280_v42, %v1194_v39  ;;  %1976 = vmatmul.f32.gmra.mxu1 %v6208_v19  ;;  %v718_v42 = vadd.f32 %v6099_v29, %v635_v0 }
 0x214   :  { %2161 = vmatmul.f32.vlgmr.msrb.gmra.mxu2 %v6175_v54 }
 0x215   :  { %v6418_v51 = vadd.f32 %v1363_v26, %v1281_v1  ;;  %2216 = vmatmul.f32.vlgmr.msrb.gmra.mxu3 %v6138_v34  ;;  %2500 = vmatpush.msrb.mxu2 %v6407_v2  ;;  %v1406_v41 = vpop.f32.mrf.mxu0  ;;  %v6447_v26 = vand.u32 4294901760, %v722_v55  ;;  %v6453_v18 = vand.u32 4294901760, %v718_v42 }
 0x216   :  { %2540 = vmatpush.msrb.mxu3 %v6397_v9  ;;  %v1499_v53 = vpop.f32.mrf.mxu2 }
 0x217   :  { %7554 = vst [vmem:[#allocation24_spill] sm:$0xff] %v6418_v51  ;;  %2503 = vmatpush.msrb.mxu2 %v6411_v31  ;;  %v1539_v44 = vpop.f32.mrf.mxu3  ;;  %v6456_v1 = vsub.f32 %v722_v55, %v6447_v26 }
 0x218   :  { %2542 = vmatpush.msrb.mxu3 %v6400_v5  ;;  %v1461_v20 = vpop.f32.mrf.mxu1  ;;  %2087 = vmatmul.f32.vlgmr.msrb.gmra.mxu0 %v6138_v34 }
 0x219   :  { %v1462_v15 = vadd.f32 %v1461_v20, %v1406_v41  ;;  %2405 = vmatpush.msrb.mxu0 %v6397_v9 }
 0x21b   :  { %v1500_v8 = vadd.f32 %v1499_v53, %v1462_v15  ;;  %2122 = vmatmul.f32.vlgmr.msrb.gmra.mxu1 %v6138_v34  ;;  %2407 = vmatpush.msrb.mxu0 %v6400_v5  ;;  %v6460_v53 = vsub.f32 %v718_v42, %v6453_v18 }
 0x21c   :  { %2460 = vmatpush.msrb.mxu1 %v2459_v36  ;;  %2169 = vmatmul.f32.gmra.mxu2 %v6203_v45 }
 0x21d   :  { %v6438_v6 = vadd.f32 %v1539_v44, %v1500_v8  ;;  %2220 = vmatmul.f32.gmra.mxu3 %v6157_v46  ;;  %v1414_v48 = vpop.f32.mrf.mxu0  ;;  %v2709_v44 = vand.u32 4294901760, %v6456_v1  ;;  %v2715_v36 = vand.u32 4294901760, %v6460_v53 }
 0x21e   :  { %2466 = vmatpush.msrb.mxu1 %v2465_v28 }
 0x21f   :  { %v1504_v63 = vpop.f32.mrf.mxu2 }
 0x220   :  { %v1465_v21 = vpop.f32.mrf.mxu1  ;;  %2091 = vmatmul.f32.gmra.mxu0 %v6157_v46  ;;  %v1545_v57 = vpop.f32.mrf.mxu3 }
 0x221   :  { %v1466_v22 = vadd.f32 %v1465_v21, %v1414_v48  ;;  %v2710_v48 = vsub.f32 %v6456_v1, %v2709_v44 }
 0x223   :  { %v1505_v56 = vadd.f32 %v1504_v63, %v1466_v22  ;;  %2126 = vmatmul.f32.gmra.mxu1 %v6157_v46  ;;  %v2716_v63 = vsub.f32 %v6460_v53, %v2715_v36  ;;  %v2711_v21 = vand.u32 4294901760, %v2710_v48 }
 0x224   :  { %2177 = vmatmul.f32.gmra.mxu2 %v6227_v37 }
 0x225   :  { %v6450_v39 = vadd.f32 %v1545_v57, %v1505_v56  ;;  %2224 = vmatmul.f32.gmra.mxu3 %v6180_v47  ;;  %v1422_v16 = vpop.f32.mrf.mxu0  ;;  %v2717_v42 = vand.u32 4294901760, %v2716_v63 }
 0x227   :  { %v1509_v43 = vpop.f32.mrf.mxu2 }
 0x228   :  { %v1469_v41 = vpop.f32.mrf.mxu1  ;;  %2095 = vmatmul.f32.gmra.mxu0 %v6180_v47  ;;  %v1551_v29 = vpop.f32.mrf.mxu3 }
 0x229   :  { %v1470_v60 = vadd.f32 %v1469_v41, %v1422_v16 }
 0x22b   :  { %v1510_v20 = vadd.f32 %v1509_v43, %v1470_v60  ;;  %2130 = vmatmul.f32.gmra.mxu1 %v6180_v47 }
 0x22c   :  { %2185 = vmatmul.f32.gmra.mxu2 %v6247_v27 }
 0x22d   :  { %v6465_v3 = vadd.f32 %v1551_v29, %v1510_v20  ;;  %2228 = vmatmul.f32.gmra.mxu3 %v6208_v19  ;;  %v1430_v15 = vpop.f32.mrf.mxu0 }
 0x22f   :  { %v1514_v8 = vpop.f32.mrf.mxu2 }
 0x230   :  { %v1473_v38 = vpop.f32.mrf.mxu1  ;;  %2099 = vmatmul.f32.gmra.mxu0 %v6208_v19  ;;  %v1557_v28 = vpop.f32.mrf.mxu3 }
 0x231   :  { %v1474_v0 = vadd.f32 %v1473_v38, %v1430_v15 }
 0x233   :  { %v1515_v55 = vadd.f32 %v1514_v8, %v1474_v0  ;;  %2134 = vmatmul.f32.gmra.mxu1 %v6208_v19 }
 0x234   :  { %2339 = vmatmul.f32.vlgmr.msra.gmra.mxu2 %v6138_v34 }
 0x235   :  { %v6478_v57 = vadd.f32 %v1557_v28, %v1515_v55  ;;  %2374 = vmatmul.f32.vlgmr.msra.gmra.mxu3 %v6138_v34  ;;  %2657 = vmatpush.msra.mxu2 %v6447_v26  ;;  %v6482_v22 = vpop.f32.mrf.mxu0 }
 0x236   :  { %2712 = vmatpush.msra.mxu3 %v2711_v21 }
 0x237   :  { %2659 = vmatpush.msra.mxu2 %v6453_v18  ;;  %v1658_v56 = vpop.f32.mrf.mxu2 }
 0x238   :  { %2718 = vmatpush.msra.mxu3 %v2717_v42  ;;  %v6485_v16 = vpop.f32.mrf.mxu1  ;;  %2254 = vmatmul.f32.vlgmr.msra.gmra.mxu0 %v6146_v35  ;;  %v1713_v43 = vpop.f32.mrf.mxu3 }
 0x239   :  { %2585 = vmatpush.msra.mxu0 %v2457_v23  ;;  %v1714_v41 = vadd.f32 %v1713_v43, %v1658_v56 }
 0x23b   :  { %2294 = vmatmul.f32.vlgmr.msra.gmra.mxu1 %v6155_v62  ;;  %2589 = vmatpush.msra.mxu0 %v2463_v4 }
 0x23c   :  { %2622 = vmatpush.msra.mxu1 %v6397_v9  ;;  %2343 = vmatmul.f32.gmra.mxu2 %v6157_v46 }
 0x23d   :  { %2378 = vmatmul.f32.gmra.mxu3 %v6157_v46  ;;  %v6496_v29 = vpop.f32.mrf.mxu0 }
 0x23e   :  { %2624 = vmatpush.msra.mxu1 %v6400_v5 }
 0x23f   :  { %v1666_v60 = vpop.f32.mrf.mxu2 }
 0x240   :  { %v6499_v20 = vpop.f32.mrf.mxu1  ;;  %2259 = vmatmul.f32.gmra.mxu0 %v6167_v50  ;;  %v1717_v2 = vpop.f32.mrf.mxu3 }
 0x241   :  { %v1718_v23 = vadd.f32 %v1717_v2, %v1666_v60 }
 0x243   :  { %2300 = vmatmul.f32.gmra.mxu1 %v6178_v40 }
 0x244   :  { %2347 = vmatmul.f32.gmra.mxu2 %v6180_v47 }
 0x245   :  { %2382 = vmatmul.f32.gmra.mxu3 %v6180_v47  ;;  %v6505_v9 = vpop.f32.mrf.mxu0 }
 0x247   :  { %v1674_v31 = vpop.f32.mrf.mxu2 }
 0x248   :  { %v6507_v4 = vpop.f32.mrf.mxu1  ;;  %2264 = vmatmul.f32.gmra.mxu0 %v6193_v30  ;;  %v1721_v5 = vpop.f32.mrf.mxu3 }
 0x249   :  { %v1722_v15 = vadd.f32 %v1721_v5, %v1674_v31 }
 0x24b   :  { %2306 = vmatmul.f32.gmra.mxu1 %v6206_v25 }
 0x24c   :  { %2351 = vmatmul.f32.gmra.mxu2 %v6208_v19 }
 0x24d   :  { %2386 = vmatmul.f32.gmra.mxu3 %v6208_v19  ;;  %v6513_v8 = vpop.f32.mrf.mxu0 }
 0x24f   :  { %v1682_v38 = vpop.f32.mrf.mxu2 }
 0x250   :  { %v6515_v28 = vpop.f32.mrf.mxu1  ;;  %2269 = vmatmul.f32.gmra.mxu0 %v6217_v61  ;;  %v1725_v48 = vpop.f32.mrf.mxu3 }
 0x251   :  { %v1726_v0 = vadd.f32 %v1725_v48, %v1682_v38  ;;  %v7556_v48 = vld [vmem:[#allocation19_spill] sm:$0xff] }
 0x253   :  { %2312 = vmatmul.f32.gmra.mxu1 %v6230_v13 }
 0x254   :  { %2506 = vmatmul.f32.vlgmr.msrb.gmra.mxu2 %v6146_v35 }
 0x255   :  { %2546 = vmatmul.f32.vlgmr.msrb.gmra.mxu3 %v6155_v62  ;;  %2837 = vmatpush.msrb.mxu2 %v2709_v44  ;;  %v1751_v63 = vpop.f32.mrf.mxu0 }
 0x256   :  { %2874 = vmatpush.msrb.mxu3 %v6447_v26  ;;  %v1752_v55 = vadd.f32 %v1751_v63, %v1714_v41  ;;  %v7557_v63 = vld [vmem:[#allocation8_spill] sm:$0xff] }
 0x257   :  { %2841 = vmatpush.msrb.mxu2 %v2715_v36  ;;  %v1836_v21 = vpop.f32.mrf.mxu2 }
 0x258   :  { %2876 = vmatpush.msrb.mxu3 %v6453_v18  ;;  %v1791_v42 = vpop.f32.mrf.mxu1  ;;  %2413 = vmatmul.f32.vlgmr.msrb.gmra.mxu0 %v6175_v54  ;;  %v1871_v56 = vpop.f32.mrf.mxu3 }
 0x259   :  { %v1792_v43 = vadd.f32 %v1791_v42, %v1752_v55  ;;  %2752 = vmatpush.msrb.mxu0 %v6456_v1  ;;  %v643_v55 = vadd.f32 %v7557_v63, %v7556_v48 }
 0x25b   :  { %v1837_v60 = vadd.f32 %v1836_v21, %v1792_v43  ;;  %2468 = vmatmul.f32.vlgmr.msrb.gmra.mxu1 %v6138_v34  ;;  %2755 = vmatpush.msrb.mxu0 %v6460_v53  ;;  %v7555_v53 = vld [vmem:[#allocation10_spill] sm:$0xff] }
 0x25c   :  { %2792 = vmatpush.msrb.mxu1 %v6447_v26  ;;  %2511 = vmatmul.f32.gmra.mxu2 %v6167_v50  ;;  %v647_v38 = vadd.f32 %v7555_v53, %v5973_v32 }
 0x25d   :  { %v6533_v44 = vadd.f32 %v1871_v56, %v1837_v60  ;;  %2552 = vmatmul.f32.gmra.mxu3 %v6178_v40  ;;  %v1756_v36 = vpop.f32.mrf.mxu0  ;;  %v7560_v60 = vld [vmem:[#allocation9_spill] sm:$0xff] }
 0x25e   :  { %2794 = vmatpush.msrb.mxu1 %v6453_v18  ;;  %v1757_v41 = vadd.f32 %v1756_v36, %v1718_v23  ;;  %v7559_v23 = vld [vmem:[#allocation11_spill] sm:$0xff]  ;;  %v726_v36 = vadd.f32 %v7560_v60, %v643_v55 }
 0x25f   :  { %v1840_v2 = vpop.f32.mrf.mxu2  ;;  %v730_v42 = vadd.f32 %v7559_v23, %v647_v38 }
 0x260   :  { %v1797_v31 = vpop.f32.mrf.mxu1  ;;  %2421 = vmatmul.f32.gmra.mxu0 %v6203_v45  ;;  %v1875_v1 = vpop.f32.mrf.mxu3 }
 0x261   :  { %v1798_v5 = vadd.f32 %v1797_v31, %v1757_v41  ;;  %v6550_v31 = vand.u32 4294901760, %v730_v42 }
 0x263   :  { %v1841_v26 = vadd.f32 %v1840_v2, %v1798_v5  ;;  %2472 = vmatmul.f32.gmra.mxu1 %v6157_v46  ;;  %v6560_v38 = vsub.f32 %v730_v42, %v6550_v31 }
 0x264   :  { %2516 = vmatmul.f32.gmra.mxu2 %v6193_v30 }
 0x265   :  { %v6544_v21 = vadd.f32 %v1875_v1, %v1841_v26  ;;  %2558 = vmatmul.f32.gmra.mxu3 %v6206_v25  ;;  %v1761_v18 = vpop.f32.mrf.mxu0  ;;  %v6553_v1 = vand.u32 4294901760, %v726_v36 }
 0x266   :  { %v1762_v56 = vadd.f32 %v1761_v18, %v1722_v15 }
 0x267   :  { %7558 = vst [vmem:[#allocation10_spill] sm:$0xff] %v6544_v21  ;;  %v1844_v43 = vpop.f32.mrf.mxu2  ;;  %v6563_v63 = vsub.f32 %v726_v36, %v6553_v1 }
 0x268   :  { %v1803_v32 = vpop.f32.mrf.mxu1  ;;  %2429 = vmatmul.f32.gmra.mxu0 %v6227_v37  ;;  %v1879_v41 = vpop.f32.mrf.mxu3 }
 0x269   :  { %v1804_v2 = vadd.f32 %v1803_v32, %v1762_v56  ;;  %v7492_v56 = vand.u32 4294901760, %v6560_v38  ;;  %v7493_v42 = vand.u32 4294901760, %v6563_v63 }
 0x26b   :  { %v1845_v5 = vadd.f32 %v1844_v43, %v1804_v2  ;;  %2476 = vmatmul.f32.gmra.mxu1 %v6180_v47  ;;  %v2962_v36 = vsub.f32 %v6560_v38, %v7492_v56 }
 0x26c   :  { %2521 = vmatmul.f32.gmra.mxu2 %v6217_v61 }
 0x26d   :  { %v6556_v53 = vadd.f32 %v1879_v41, %v1845_v5  ;;  %2564 = vmatmul.f32.gmra.mxu3 %v6230_v13  ;;  %v1766_v15 = vpop.f32.mrf.mxu0  ;;  %v2968_v5 = vsub.f32 %v6563_v63, %v7493_v42  ;;  %v7565_v42 = vld [vmem:[#allocation12_spill] sm:$0xff] }
 0x26e   :  { %v1767_v26 = vadd.f32 %v1766_v15, %v1726_v0 }
 0x26f   :  { %v1848_v48 = vpop.f32.mrf.mxu2 }
 0x270   :  { %v1809_v55 = vpop.f32.mrf.mxu1  ;;  %2437 = vmatmul.f32.gmra.mxu0 %v6247_v27  ;;  %v1883_v18 = vpop.f32.mrf.mxu3 }
 0x271   :  { %v1810_v23 = vadd.f32 %v1809_v55, %v1767_v26  ;;  %v2963_v26 = vand.u32 4294901760, %v2962_v36  ;;  %v7561_v55 = vld [vmem:[#allocation21_spill] sm:$0xff] }
 0x273   :  { %v1849_v43 = vadd.f32 %v1848_v48, %v1810_v23  ;;  %2480 = vmatmul.f32.gmra.mxu1 %v6208_v19 }
 0x274   :  { %2665 = vmatmul.f32.vlgmr.msra.gmra.mxu2 %v6175_v54 }
 0x275   :  { %v6570_v60 = vadd.f32 %v1883_v18, %v1849_v43  ;;  %2720 = vmatmul.f32.vlgmr.msra.gmra.mxu3 %v6138_v34  ;;  %3004 = vmatpush.msra.mxu2 %v6560_v38  ;;  %v1910_v0 = vpop.f32.mrf.mxu0  ;;  %v7562_v18 = vld [vmem:[#allocation14_spill] sm:$0xff]  ;;  %v2969_v43 = vand.u32 4294901760, %v2968_v5 }
 0x276   :  { %3044 = vmatpush.msra.mxu3 %v6550_v31  ;;  %v655_v23 = vadd.f32 %v7562_v18, %v7561_v55  ;;  %v7567_v18 = vld [vmem:[#allocation13_spill] sm:$0xff] }
 0x277   :  { %3007 = vmatpush.msra.mxu2 %v6563_v63  ;;  %v2003_v32 = vpop.f32.mrf.mxu2 }
 0x278   :  { %3046 = vmatpush.msra.mxu3 %v6553_v1  ;;  %v1965_v41 = vpop.f32.mrf.mxu1  ;;  %2591 = vmatmul.f32.vlgmr.msra.gmra.mxu0 %v6138_v34  ;;  %v2043_v2 = vpop.f32.mrf.mxu3 }
 0x279   :  { %v1966_v15 = vadd.f32 %v1965_v41, %v1910_v0  ;;  %2909 = vmatpush.msra.mxu0 %v6550_v31  ;;  %v7564_v41 = vld [vmem:[#allocation20_spill] sm:$0xff] }
 0x27a   :  { %v651_v36 = vadd.f32 %v7565_v42, %v7564_v41 }
 0x27b   :  { %v2004_v48 = vadd.f32 %v2003_v32, %v1966_v15  ;;  %2626 = vmatmul.f32.vlgmr.msra.gmra.mxu1 %v6138_v34  ;;  %2911 = vmatpush.msra.mxu0 %v6553_v1  ;;  %v7566_v15 = vld [vmem:[#allocation15_spill] sm:$0xff] }
 0x27c   :  { %2964 = vmatpush.msra.mxu1 %v2963_v26  ;;  %2673 = vmatmul.f32.gmra.mxu2 %v6203_v45  ;;  %v738_v10 = vadd.f32 %v7566_v15, %v655_v23  ;;  %v734_v21 = vadd.f32 %v7567_v18, %v651_v36 }
 0x27d   :  { %v6590_v56 = vadd.f32 %v2043_v2, %v2004_v48  ;;  %2724 = vmatmul.f32.gmra.mxu3 %v6157_v46  ;;  %v1918_v0 = vpop.f32.mrf.mxu0 }
 0x27e   :  { %2970 = vmatpush.msra.mxu1 %v2969_v43  ;;  %v6599_v2 = vand.u32 4294901760, %v738_v10  ;;  %v6605_v23 = vand.u32 4294901760, %v734_v21 }
 0x27f   :  { %7563 = vst [vmem:[#allocation19_spill] sm:$0xff] %v6590_v56  ;;  %v2008_v32 = vpop.f32.mrf.mxu2 }
 0x280   :  { %v1969_v51 = vpop.f32.mrf.mxu1  ;;  %2595 = vmatmul.f32.gmra.mxu0 %v6157_v46  ;;  %v2049_v55 = vpop.f32.mrf.mxu3  ;;  %v6608_v41 = vsub.f32 %v738_v10, %v6599_v2 }
 0x281   :  { %v1970_v26 = vadd.f32 %v1969_v51, %v1918_v0 }
 0x283   :  { %v2009_v5 = vadd.f32 %v2008_v32, %v1970_v26  ;;  %2630 = vmatmul.f32.gmra.mxu1 %v6157_v46  ;;  %v6612_v32 = vsub.f32 %v734_v21, %v6605_v23 }
 0x284   :  { %2681 = vmatmul.f32.gmra.mxu2 %v6227_v37 }
 0x285   :  { %v6602_v48 = vadd.f32 %v2049_v55, %v2009_v5  ;;  %2728 = vmatmul.f32.gmra.mxu3 %v6180_v47  ;;  %v1926_v42 = vpop.f32.mrf.mxu0  ;;  %v7497_v55 = vand.u32 4294901760, %v6608_v41  ;;  %v7496_v18 = vand.u32 4294901760, %v6612_v32 }
 0x287   :  { %7568 = vst [vmem:[#allocation8_spill] sm:$0xff] %v6602_v48  ;;  %v2013_v43 = vpop.f32.mrf.mxu2 }
 0x288   :  { %v1973_v51 = vpop.f32.mrf.mxu1  ;;  %2599 = vmatmul.f32.gmra.mxu0 %v6180_v47  ;;  %v2055_v0 = vpop.f32.mrf.mxu3 }
 0x289   :  { %v1974_v36 = vadd.f32 %v1973_v51, %v1926_v42  ;;  %v3214_v42 = vsub.f32 %v6608_v41, %v7497_v55  ;;  %v3220_v51 = vsub.f32 %v6612_v32, %v7496_v18 }
 0x28b   :  { %v2014_v15 = vadd.f32 %v2013_v43, %v1974_v36  ;;  %2634 = vmatmul.f32.gmra.mxu1 %v6180_v47  ;;  %v3215_v36 = vand.u32 4294901760, %v3214_v42 }
 0x28c   :  { %2689 = vmatmul.f32.gmra.mxu2 %v6247_v27 }
 0x28d   :  { %v6617_v26 = vadd.f32 %v2055_v0, %v2014_v15  ;;  %2732 = vmatmul.f32.gmra.mxu3 %v6208_v19  ;;  %v1934_v10 = vpop.f32.mrf.mxu0 }
 0x28f   :  { %7569 = vst [vmem:[#allocation11_spill] sm:$0xff] %v6617_v26  ;;  %v2018_v5 = vpop.f32.mrf.mxu2 }
 0x290   :  { %v1977_v48 = vpop.f32.mrf.mxu1  ;;  %2603 = vmatmul.f32.gmra.mxu0 %v6208_v19  ;;  %v2061_v21 = vpop.f32.mrf.mxu3 }
 0x291   :  { %v1978_v43 = vadd.f32 %v1977_v48, %v1934_v10  ;;  %v3221_v48 = vand.u32 4294901760, %v3220_v51 }
 0x293   :  { %v2019_v0 = vadd.f32 %v2018_v5, %v1978_v43  ;;  %2638 = vmatmul.f32.gmra.mxu1 %v6208_v19 }
 0x294   :  { %2843 = vmatmul.f32.vlgmr.msrb.gmra.mxu2 %v6138_v34 }
 0x295   :  { %v6630_v15 = vadd.f32 %v2061_v21, %v2019_v0  ;;  %2878 = vmatmul.f32.vlgmr.msrb.gmra.mxu3 %v6138_v34  ;;  %3161 = vmatpush.msrb.mxu2 %v6599_v2  ;;  %v6634_v56 = vpop.f32.mrf.mxu0  ;;  %v7573_v21 = vand.u32 4294901760, %v6560_v38  ;;  %v7574_v0 = vand.u32 4294901760, %v6563_v63 }
 0x296   :  { %7571 = vst [vmem:[#allocation21_spill] sm:$0xff] %v6634_v56  ;;  %3216 = vmatpush.msrb.mxu3 %v3215_v36 }
 0x297   :  { %7570 = vst [vmem:[#allocation9_spill] sm:$0xff] %v6630_v15  ;;  %3163 = vmatpush.msrb.mxu2 %v6605_v23  ;;  %v2162_v10 = vpop.f32.mrf.mxu2 }
 0x298   :  { %3222 = vmatpush.msrb.mxu3 %v3221_v48  ;;  %v6637_v5 = vpop.f32.mrf.mxu1  ;;  %2758 = vmatmul.f32.vlgmr.msrb.gmra.mxu0 %v6146_v35  ;;  %v2217_v43 = vpop.f32.mrf.mxu3 }
 0x299   :  { %7572 = vst [vmem:[#allocation14_spill] sm:$0xff] %v6637_v5  ;;  %3089 = vmatpush.msrb.mxu0 %v7573_v21  ;;  %v2218_v42 = vadd.f32 %v2217_v43, %v2162_v10 }
 0x29b   :  { %2798 = vmatmul.f32.vlgmr.msrb.gmra.mxu1 %v6155_v62  ;;  %3093 = vmatpush.msrb.mxu0 %v7574_v0 }
 0x29c   :  { %3126 = vmatpush.msrb.mxu1 %v6550_v31  ;;  %2847 = vmatmul.f32.gmra.mxu2 %v6157_v46 }
 0x29d   :  { %2882 = vmatmul.f32.gmra.mxu3 %v6157_v46  ;;  %v6648_v51 = vpop.f32.mrf.mxu0 }
 0x29e   :  { %7575 = vst [vmem:[#allocation20_spill] sm:$0xff] %v6648_v51  ;;  %3128 = vmatpush.msrb.mxu1 %v6553_v1  ;;  %v7582_v51 = vand.u32 4294901760, %v6612_v32 }
 0x29f   :  { %v2170_v36 = vpop.f32.mrf.mxu2 }
 0x2a0   :  { %v6651_v48 = vpop.f32.mrf.mxu1  ;;  %2763 = vmatmul.f32.gmra.mxu0 %v6167_v50  ;;  %v2221_v38 = vpop.f32.mrf.mxu3 }
 0x2a1   :  { %7576 = vst [vmem:[#allocation12_spill] sm:$0xff] %v6651_v48  ;;  %v2222_v10 = vadd.f32 %v2221_v38, %v2170_v36 }
 0x2a3   :  { %2804 = vmatmul.f32.gmra.mxu1 %v6178_v40 }
 0x2a4   :  { %2851 = vmatmul.f32.gmra.mxu2 %v6180_v47 }
 0x2a5   :  { %2886 = vmatmul.f32.gmra.mxu3 %v6180_v47  ;;  %v6657_v31 = vpop.f32.mrf.mxu0 }
 0x2a6   :  { %7577 = vst [vmem:[#allocation15_spill] sm:$0xff] %v6657_v31 }
 0x2a7   :  { %v2178_v63 = vpop.f32.mrf.mxu2 }
 0x2a8   :  { %v6659_v43 = vpop.f32.mrf.mxu1  ;;  %2768 = vmatmul.f32.gmra.mxu0 %v6193_v30  ;;  %v2225_v1 = vpop.f32.mrf.mxu3 }
 0x2a9   :  { %7578 = vst [vmem:[#allocation13_spill] sm:$0xff] %v6659_v43  ;;  %v2226_v21 = vadd.f32 %v2225_v1, %v2178_v63  ;;  %v7581_v63 = vand.u32 4294901760, %v6608_v41 }
 0x2ab   :  { %2810 = vmatmul.f32.gmra.mxu1 %v6206_v25 }
 0x2ac   :  { %2855 = vmatmul.f32.gmra.mxu2 %v6208_v19 }
 0x2ad   :  { %2890 = vmatmul.f32.gmra.mxu3 %v6208_v19  ;;  %v6665_v0 = vpop.f32.mrf.mxu0 }
 0x2ae   :  { %7579 = vst [vmem:[#allocation25_spill] sm:$0xff] %v6665_v0 }
 0x2af   :  { %v2186_v36 = vpop.f32.mrf.mxu2 }
 0x2b0   :  { %v6667_v38 = vpop.f32.mrf.mxu1  ;;  %2773 = vmatmul.f32.gmra.mxu0 %v6217_v61  ;;  %v2229_v18 = vpop.f32.mrf.mxu3 }
 0x2b1   :  { %7580 = vst [vmem:[#allocation26_spill] sm:$0xff] %v6667_v38  ;;  %v2230_v55 = vadd.f32 %v2229_v18, %v2186_v36 }
 0x2b3   :  { %2816 = vmatmul.f32.gmra.mxu1 %v6230_v13 }
 0x2b4   :  { %3010 = vmatmul.f32.vlgmr.msra.gmra.mxu2 %v6146_v35 }
 0x2b5   :  { %3050 = vmatmul.f32.vlgmr.msra.gmra.mxu3 %v6155_v62  ;;  %3341 = vmatpush.msra.mxu2 %v7581_v63  ;;  %v2255_v1 = vpop.f32.mrf.mxu0 }
 0x2b6   :  { %3378 = vmatpush.msra.mxu3 %v6599_v2  ;;  %v2256_v48 = vadd.f32 %v2255_v1, %v2218_v42 }
 0x2b7   :  { %3345 = vmatpush.msra.mxu2 %v7582_v51  ;;  %v2340_v5 = vpop.f32.mrf.mxu2 }
 0x2b8   :  { %3380 = vmatpush.msra.mxu3 %v6605_v23  ;;  %v2295_v18 = vpop.f32.mrf.mxu1  ;;  %2917 = vmatmul.f32.vlgmr.msra.gmra.mxu0 %v6175_v54  ;;  %v2375_v36 = vpop.f32.mrf.mxu3 }
 0x2b9   :  { %v2296_v56 = vadd.f32 %v2295_v18, %v2256_v48  ;;  %3256 = vmatpush.msra.mxu0 %v6608_v41 }
 0x2bb   :  { %v2341_v38 = vadd.f32 %v2340_v5, %v2296_v56  ;;  %2972 = vmatmul.f32.vlgmr.msra.gmra.mxu1 %v6138_v34  ;;  %3259 = vmatpush.msra.mxu0 %v6612_v32 }
 0x2bc   :  { %3296 = vmatpush.msra.mxu1 %v6599_v2  ;;  %3015 = vmatmul.f32.gmra.mxu2 %v6167_v50 }
 0x2bd   :  { %v6685_v42 = vadd.f32 %v2375_v36, %v2341_v38  ;;  %3056 = vmatmul.f32.gmra.mxu3 %v6178_v40  ;;  %v2260_v51 = vpop.f32.mrf.mxu0 }
 0x2be   :  { %3298 = vmatpush.msra.mxu1 %v6605_v23  ;;  %v2261_v63 = vadd.f32 %v2260_v51, %v2222_v10  ;;  %v7585_v51 = vld [vmem:[#allocation17_spill] sm:$0xff] }
 0x2bf   :  { %7583 = vst [vmem:[#allocation27_spill] sm:$0xff] %v6685_v42  ;;  %v2344_v48 = vpop.f32.mrf.mxu2  ;;  %v6697_v42 = vand.u32 4294901760, %v7585_v51 }
 0x2c0   :  { %v2301_v1 = vpop.f32.mrf.mxu1  ;;  %2925 = vmatmul.f32.gmra.mxu0 %v6203_v45  ;;  %v2379_v56 = vpop.f32.mrf.mxu3 }
 0x2c1   :  { %v2302_v41 = vadd.f32 %v2301_v1, %v2261_v63 }
 0x2c3   :  { %v2345_v5 = vadd.f32 %v2344_v48, %v2302_v41  ;;  %2976 = vmatmul.f32.gmra.mxu1 %v6157_v46  ;;  %v7586_v48 = vld [vmem:[#allocation16_spill] sm:$0xff]  ;;  %v6709_v41 = vsub.f32 %v7585_v51, %v6697_v42 }
 0x2c4   :  { %3020 = vmatmul.f32.gmra.mxu2 %v6193_v30  ;;  %v6701_v1 = vand.u32 4294901760, %v7586_v48 }
 0x2c5   :  { %v6692_v2 = vadd.f32 %v2379_v56, %v2345_v5  ;;  %3062 = vmatmul.f32.gmra.mxu3 %v6206_v25  ;;  %v2265_v32 = vpop.f32.mrf.mxu0 }
 0x2c6   :  { %v2266_v38 = vadd.f32 %v2265_v32, %v2226_v21 }
 0x2c7   :  { %7584 = vst [vmem:[#allocation28_spill] sm:$0xff] %v6692_v2  ;;  %v2348_v18 = vpop.f32.mrf.mxu2 }
 0x2c8   :  { %v2307_v23 = vpop.f32.mrf.mxu1  ;;  %2933 = vmatmul.f32.gmra.mxu0 %v6227_v37  ;;  %v2383_v10 = vpop.f32.mrf.mxu3 }
 0x2c9   :  { %v2308_v36 = vadd.f32 %v2307_v23, %v2266_v38  ;;  %v6713_v38 = vsub.f32 %v7586_v48, %v6701_v1 }
 0x2cb   :  { %v2349_v63 = vadd.f32 %v2348_v18, %v2308_v36  ;;  %2980 = vmatmul.f32.gmra.mxu1 %v6180_v47  ;;  %v7499_v51 = vand.u32 4294901760, %v6713_v38 }
 0x2cc   :  { %3025 = vmatmul.f32.gmra.mxu2 %v6217_v61 }
 0x2cd   :  { %v6704_v56 = vadd.f32 %v2383_v10, %v2349_v63  ;;  %3068 = vmatmul.f32.gmra.mxu3 %v6230_v13  ;;  %v2270_v21 = vpop.f32.mrf.mxu0  ;;  %v7498_v10 = vand.u32 4294901760, %v6709_v41 }
 0x2ce   :  { %v2271_v5 = vadd.f32 %v2270_v21, %v2230_v55 }
 0x2cf   :  { %7587 = vst [vmem:[#allocation17_spill] sm:$0xff] %v6704_v56  ;;  %v2352_v32 = vpop.f32.mrf.mxu2  ;;  %v3466_v21 = vsub.f32 %v6709_v41, %v7498_v10 }
 0x2d0   :  { %v2313_v18 = vpop.f32.mrf.mxu1  ;;  %2941 = vmatmul.f32.gmra.mxu0 %v6247_v27  ;;  %v2387_v23 = vpop.f32.mrf.mxu3 }
 0x2d1   :  { %v2314_v36 = vadd.f32 %v2313_v18, %v2271_v5 }
 0x2d3   :  { %v2353_v63 = vadd.f32 %v2352_v32, %v2314_v36  ;;  %2984 = vmatmul.f32.gmra.mxu1 %v6208_v19 }
 0x2d4   :  { %3169 = vmatmul.f32.vlgmr.msrb.gmra.mxu2 %v6175_v54 }
 0x2d5   :  { %v6720_v55 = vadd.f32 %v2387_v23, %v2353_v63  ;;  %3224 = vmatmul.f32.vlgmr.msrb.gmra.mxu3 %v6138_v34  ;;  %3508 = vmatpush.msrb.mxu2 %v6709_v41  ;;  %v2414_v48 = vpop.f32.mrf.mxu0  ;;  %v3472_v23 = vsub.f32 %v6713_v38, %v7499_v51  ;;  %v3467_v63 = vand.u32 4294901760, %v3466_v21 }
 0x2d6   :  { %3548 = vmatpush.msrb.mxu3 %v6697_v42 }
 0x2d7   :  { %7588 = vst [vmem:[#allocation16_spill] sm:$0xff] %v6720_v55  ;;  %3511 = vmatpush.msrb.mxu2 %v6713_v38  ;;  %v2507_v5 = vpop.f32.mrf.mxu2  ;;  %v3473_v10 = vand.u32 4294901760, %v3472_v23 }
 0x2d8   :  { %3550 = vmatpush.msrb.mxu3 %v6701_v1  ;;  %v2469_v32 = vpop.f32.mrf.mxu1  ;;  %3095 = vmatmul.f32.vlgmr.msrb.gmra.mxu0 %v6138_v34  ;;  %v2547_v18 = vpop.f32.mrf.mxu3 }
 0x2d9   :  { %v2470_v36 = vadd.f32 %v2469_v32, %v2414_v48  ;;  %3413 = vmatpush.msrb.mxu0 %v6697_v42 }
 0x2db   :  { %v2508_v2 = vadd.f32 %v2507_v5, %v2470_v36  ;;  %3130 = vmatmul.f32.vlgmr.msrb.gmra.mxu1 %v6138_v34  ;;  %3415 = vmatpush.msrb.mxu0 %v6701_v1  ;;  %v6744_v36 = vand.u32 4294901760, %v6262_v24 }
 0x2dc   :  { %3468 = vmatpush.msrb.mxu1 %v3467_v63  ;;  %3177 = vmatmul.f32.gmra.mxu2 %v6203_v45 }
 0x2dd   :  { %v6738_v55 = vadd.f32 %v2547_v18, %v2508_v2  ;;  %3228 = vmatmul.f32.gmra.mxu3 %v6157_v46  ;;  %v2422_v56 = vpop.f32.mrf.mxu0 }
 0x2de   :  { %3474 = vmatpush.msrb.mxu1 %v3473_v10  ;;  %v7591_v10 = vld [vmem:[#allocation18_spill] sm:$0xff] }
 0x2df   :  { %7589 = vst [vmem:[#allocation29_spill] sm:$0xff] %v6738_v55  ;;  %v2512_v51 = vpop.f32.mrf.mxu2  ;;  %v6751_v23 = vand.u32 4294901760, %v7591_v10 }
 0x2e0   :  { %v2473_v48 = vpop.f32.mrf.mxu1  ;;  %3099 = vmatmul.f32.gmra.mxu0 %v6157_v46  ;;  %v2553_v21 = vpop.f32.mrf.mxu3 }
 0x2e1   :  { %v2474_v5 = vadd.f32 %v2473_v48, %v2422_v56  ;;  %v6755_v56 = vsub.f32 %v6262_v24, %v6744_v36 }
 0x2e3   :  { %v2513_v32 = vadd.f32 %v2512_v51, %v2474_v5  ;;  %3134 = vmatmul.f32.gmra.mxu1 %v6157_v46 }
 0x2e4   :  { %3185 = vmatmul.f32.gmra.mxu2 %v6227_v37 }
 0x2e5   :  { %v6747_v2 = vadd.f32 %v2553_v21, %v2513_v32  ;;  %3232 = vmatmul.f32.gmra.mxu3 %v6180_v47  ;;  %v2430_v18 = vpop.f32.mrf.mxu0  ;;  %v6760_v21 = vsub.f32 %v7591_v10, %v6751_v23 }
 0x2e7   :  { %7590 = vst [vmem:[#allocation30_spill] sm:$0xff] %v6747_v2  ;;  %v2517_v63 = vpop.f32.mrf.mxu2  ;;  %v7501_v2 = vand.u32 4294901760, %v6755_v56  ;;  %v7500_v0 = vand.u32 4294901760, %v6760_v21 }
 0x2e8   :  { %v2477_v51 = vpop.f32.mrf.mxu1  ;;  %3103 = vmatmul.f32.gmra.mxu0 %v6180_v47  ;;  %v2559_v48 = vpop.f32.mrf.mxu3 }
 0x2e9   :  { %v2478_v5 = vadd.f32 %v2477_v51, %v2430_v18 }
 0x2eb   :  { %v2518_v32 = vadd.f32 %v2517_v63, %v2478_v5  ;;  %3138 = vmatmul.f32.gmra.mxu1 %v6180_v47  ;;  %v3718_v63 = vsub.f32 %v6755_v56, %v7501_v2 }
 0x2ec   :  { %3193 = vmatmul.f32.gmra.mxu2 %v6247_v27 }
 0x2ed   :  { %v6765_v55 = vadd.f32 %v2559_v48, %v2518_v32  ;;  %3236 = vmatmul.f32.gmra.mxu3 %v6208_v19  ;;  %v2438_v24 = vpop.f32.mrf.mxu0  ;;  %v3724_v48 = vsub.f32 %v6760_v21, %v7500_v0  ;;  %v3719_v32 = vand.u32 4294901760, %v3718_v63 }
 0x2ef   :  { %7592 = vst [vmem:[#allocation18_spill] sm:$0xff] %v6765_v55  ;;  %v2522_v15 = vpop.f32.mrf.mxu2 }
 0x2f0   :  { %v2481_v18 = vpop.f32.mrf.mxu1  ;;  %3107 = vmatmul.f32.gmra.mxu0 %v6208_v19  ;;  %v2565_v10 = vpop.f32.mrf.mxu3 }
 0x2f1   :  { %v2482_v51 = vadd.f32 %v2481_v18, %v2438_v24  ;;  %v3725_v24 = vand.u32 4294901760, %v3724_v48 }
 0x2f3   :  { %v2523_v5 = vadd.f32 %v2522_v15, %v2482_v51  ;;  %3142 = vmatmul.f32.gmra.mxu1 %v6208_v19 }
 0x2f4   :  { %3347 = vmatmul.f32.vlgmr.msra.gmra.mxu2 %v6138_v34 }
 0x2f5   :  { %v6778_v55 = vadd.f32 %v2565_v10, %v2523_v5  ;;  %3382 = vmatmul.f32.vlgmr.msra.gmra.mxu3 %v6138_v34  ;;  %3665 = vmatpush.msra.mxu2 %v6744_v36  ;;  %v6782_v43 = vpop.f32.mrf.mxu0  ;;  %v7596_v10 = vand.u32 4294901760, %v6709_v41  ;;  %v7597_v5 = vand.u32 4294901760, %v6713_v38 }
 0x2f6   :  { %7594 = vst [vmem:[#allocation32_spill] sm:$0xff] %v6782_v43  ;;  %3720 = vmatpush.msra.mxu3 %v3719_v32 }
 0x2f7   :  { %7593 = vst [vmem:[#allocation31_spill] sm:$0xff] %v6778_v55  ;;  %3667 = vmatpush.msra.mxu2 %v6751_v23  ;;  %v2666_v18 = vpop.f32.mrf.mxu2 }
 0x2f8   :  { %3726 = vmatpush.msra.mxu3 %v3725_v24  ;;  %v6785_v15 = vpop.f32.mrf.mxu1  ;;  %3262 = vmatmul.f32.vlgmr.msra.gmra.mxu0 %v6146_v35  ;;  %v2721_v51 = vpop.f32.mrf.mxu3 }
 0x2f9   :  { %7595 = vst [vmem:[#allocation33_spill] sm:$0xff] %v6785_v15  ;;  %3593 = vmatpush.msra.mxu0 %v7596_v10  ;;  %v2722_v63 = vadd.f32 %v2721_v51, %v2666_v18 }
 0x2fb   :  { %3302 = vmatmul.f32.vlgmr.msra.gmra.mxu1 %v6155_v62  ;;  %3597 = vmatpush.msra.mxu0 %v7597_v5 }
 0x2fc   :  { %3630 = vmatpush.msra.mxu1 %v6697_v42  ;;  %3351 = vmatmul.f32.gmra.mxu2 %v6157_v46 }
 0x2fd   :  { %3386 = vmatmul.f32.gmra.mxu3 %v6157_v46  ;;  %v6796_v48 = vpop.f32.mrf.mxu0 }
 0x2fe   :  { %7598 = vst [vmem:[#allocation34_spill] sm:$0xff] %v6796_v48  ;;  %3632 = vmatpush.msra.mxu1 %v6701_v1  ;;  %v7605_v48 = vand.u32 4294901760, %v6760_v21 }
 0x2ff   :  { %v2674_v32 = vpop.f32.mrf.mxu2 }
 0x300   :  { %v6799_v24 = vpop.f32.mrf.mxu1  ;;  %3267 = vmatmul.f32.gmra.mxu0 %v6167_v50  ;;  %v2725_v41 = vpop.f32.mrf.mxu3 }
 0x301   :  { %7599 = vst [vmem:[#allocation35_spill] sm:$0xff] %v6799_v24  ;;  %v2726_v18 = vadd.f32 %v2725_v41, %v2674_v32 }
 0x303   :  { %3308 = vmatmul.f32.gmra.mxu1 %v6178_v40 }
 0x304   :  { %3355 = vmatmul.f32.gmra.mxu2 %v6180_v47 }
 0x305   :  { %3390 = vmatmul.f32.gmra.mxu3 %v6180_v47  ;;  %v6805_v42 = vpop.f32.mrf.mxu0 }
 0x306   :  { %7600 = vst [vmem:[#allocation36_spill] sm:$0xff] %v6805_v42 }
 0x307   :  { %v2682_v38 = vpop.f32.mrf.mxu2 }
 0x308   :  { %v6807_v51 = vpop.f32.mrf.mxu1  ;;  %3272 = vmatmul.f32.gmra.mxu0 %v6193_v30  ;;  %v2729_v1 = vpop.f32.mrf.mxu3 }
 0x309   :  { %7601 = vst [vmem:[#allocation37_spill] sm:$0xff] %v6807_v51  ;;  %v2730_v10 = vadd.f32 %v2729_v1, %v2682_v38  ;;  %v7604_v38 = vand.u32 4294901760, %v6755_v56 }
 0x30b   :  { %3314 = vmatmul.f32.gmra.mxu1 %v6206_v25 }
 0x30c   :  { %3359 = vmatmul.f32.gmra.mxu2 %v6208_v19 }
 0x30d   :  { %3394 = vmatmul.f32.gmra.mxu3 %v6208_v19  ;;  %v6813_v5 = vpop.f32.mrf.mxu0 }
 0x30e   :  { %7602 = vst [vmem:[#allocation38_spill] sm:$0xff] %v6813_v5 }
 0x30f   :  { %v2690_v32 = vpop.f32.mrf.mxu2 }
 0x310   :  { %v6815_v41 = vpop.f32.mrf.mxu1  ;;  %3277 = vmatmul.f32.gmra.mxu0 %v6217_v61  ;;  %v2733_v0 = vpop.f32.mrf.mxu3 }
 0x311   :  { %7603 = vst [vmem:[#allocation39_spill] sm:$0xff] %v6815_v41  ;;  %v2734_v2 = vadd.f32 %v2733_v0, %v2690_v32 }
 0x313   :  { %3320 = vmatmul.f32.gmra.mxu1 %v6230_v13 }
 0x314   :  { %3514 = vmatmul.f32.vlgmr.msrb.gmra.mxu2 %v6146_v35 }
 0x315   :  { %3554 = vmatmul.f32.vlgmr.msrb.gmra.mxu3 %v6155_v62  ;;  %3845 = vmatpush.msrb.mxu2 %v7604_v38  ;;  %v2759_v1 = vpop.f32.mrf.mxu0 }
 0x316   :  { %3882 = vmatpush.msrb.mxu3 %v6744_v36  ;;  %v2760_v24 = vadd.f32 %v2759_v1, %v2722_v63 }
 0x317   :  { %3849 = vmatpush.msrb.mxu2 %v7605_v48  ;;  %v2844_v15 = vpop.f32.mrf.mxu2 }
 0x318   :  { %3884 = vmatpush.msrb.mxu3 %v6751_v23  ;;  %v2799_v0 = vpop.f32.mrf.mxu1  ;;  %3421 = vmatmul.f32.vlgmr.msrb.gmra.mxu0 %v6175_v54  ;;  %v2879_v32 = vpop.f32.mrf.mxu3 }
 0x319   :  { %v2800_v43 = vadd.f32 %v2799_v0, %v2760_v24  ;;  %3760 = vmatpush.msrb.mxu0 %v6755_v56 }
 0x31b   :  { %v2845_v41 = vadd.f32 %v2844_v15, %v2800_v43  ;;  %3476 = vmatmul.f32.vlgmr.msrb.gmra.mxu1 %v6138_v34  ;;  %3763 = vmatpush.msrb.mxu0 %v6760_v21 }
 0x31c   :  { %3800 = vmatpush.msrb.mxu1 %v6744_v36  ;;  %3519 = vmatmul.f32.gmra.mxu2 %v6167_v50 }
 0x31d   :  { %v6833_v63 = vadd.f32 %v2879_v32, %v2845_v41  ;;  %3560 = vmatmul.f32.gmra.mxu3 %v6178_v40  ;;  %v2764_v48 = vpop.f32.mrf.mxu0 }
 0x31e   :  { %3802 = vmatpush.msrb.mxu1 %v6751_v23  ;;  %v2765_v38 = vadd.f32 %v2764_v48, %v2726_v18  ;;  %v6845_v48 = vand.u32 4294901760, %v6296_v58 }
 0x31f   :  { %7606 = vst [vmem:[#allocation40_spill] sm:$0xff] %v6833_v63  ;;  %v2848_v24 = vpop.f32.mrf.mxu2 }
 0x320   :  { %v2805_v1 = vpop.f32.mrf.mxu1  ;;  %3429 = vmatmul.f32.gmra.mxu0 %v6203_v45  ;;  %v2883_v43 = vpop.f32.mrf.mxu3 }
 0x321   :  { %v2806_v56 = vadd.f32 %v2805_v1, %v2765_v38 }
 0x323   :  { %v2849_v15 = vadd.f32 %v2848_v24, %v2806_v56  ;;  %3480 = vmatmul.f32.gmra.mxu1 %v6157_v46  ;;  %v6849_v24 = vand.u32 4294901760, %v6283_v11 }
 0x324   :  { %3524 = vmatmul.f32.gmra.mxu2 %v6193_v30 }
 0x325   :  { %v6840_v36 = vadd.f32 %v2883_v43, %v2849_v15  ;;  %3566 = vmatmul.f32.gmra.mxu3 %v6206_v25  ;;  %v2769_v21 = vpop.f32.mrf.mxu0  ;;  %v6857_v43 = vsub.f32 %v6296_v58, %v6845_v48 }
 0x326   :  { %v2770_v41 = vadd.f32 %v2769_v21, %v2730_v10  ;;  %v6861_v21 = vsub.f32 %v6283_v11, %v6849_v24 }
 0x327   :  { %7607 = vst [vmem:[#allocation41_spill] sm:$0xff] %v6840_v36  ;;  %v2852_v0 = vpop.f32.mrf.mxu2 }
 0x328   :  { %v2811_v23 = vpop.f32.mrf.mxu1  ;;  %3437 = vmatmul.f32.gmra.mxu0 %v6227_v37  ;;  %v2887_v18 = vpop.f32.mrf.mxu3  ;;  %v7503_v58 = vand.u32 4294901760, %v6861_v21 }
 0x329   :  { %v2812_v32 = vadd.f32 %v2811_v23, %v2770_v41 }
 0x32b   :  { %v2853_v38 = vadd.f32 %v2852_v0, %v2812_v32  ;;  %3484 = vmatmul.f32.gmra.mxu1 %v6180_v47 }
 0x32c   :  { %3529 = vmatmul.f32.gmra.mxu2 %v6217_v61 }
 0x32d   :  { %v6852_v1 = vadd.f32 %v2887_v18, %v2853_v38  ;;  %3572 = vmatmul.f32.gmra.mxu3 %v6230_v13  ;;  %v2774_v10 = vpop.f32.mrf.mxu0  ;;  %v7502_v18 = vand.u32 4294901760, %v6857_v43 }
 0x32e   :  { %v2775_v56 = vadd.f32 %v2774_v10, %v2734_v2 }
 0x32f   :  { %7608 = vst [vmem:[#allocation42_spill] sm:$0xff] %v6852_v1  ;;  %v2856_v15 = vpop.f32.mrf.mxu2  ;;  %v3970_v38 = vsub.f32 %v6857_v43, %v7502_v18 }
 0x330   :  { %v2817_v41 = vpop.f32.mrf.mxu1  ;;  %3445 = vmatmul.f32.gmra.mxu0 %v6247_v27  ;;  %v2891_v0 = vpop.f32.mrf.mxu3 }
 0x331   :  { %v2818_v23 = vadd.f32 %v2817_v41, %v2775_v56  ;;  %v3976_v41 = vsub.f32 %v6861_v21, %v7503_v58 }
 0x333   :  { %v2857_v32 = vadd.f32 %v2856_v15, %v2818_v23  ;;  %3488 = vmatmul.f32.gmra.mxu1 %v6208_v19  ;;  %v3971_v23 = vand.u32 4294901760, %v3970_v38  ;;  %v3977_v18 = vand.u32 4294901760, %v3976_v41 }
 0x334   :  { %3673 = vmatmul.f32.vlgmr.msra.gmra.mxu2 %v6175_v54 }
 0x335   :  { %v6868_v2 = vadd.f32 %v2891_v0, %v2857_v32  ;;  %3728 = vmatmul.f32.vlgmr.msra.gmra.mxu3 %v6138_v34  ;;  %4012 = vmatpush.msra.mxu2 %v6857_v43  ;;  %v2918_v11 = vpop.f32.mrf.mxu0 }
 0x336   :  { %4052 = vmatpush.msra.mxu3 %v6845_v48 }
 0x337   :  { %7609 = vst [vmem:[#allocation43_spill] sm:$0xff] %v6868_v2  ;;  %4015 = vmatpush.msra.mxu2 %v6861_v21  ;;  %v3011_v10 = vpop.f32.mrf.mxu2 }
 0x338   :  { %4054 = vmatpush.msra.mxu3 %v6849_v24  ;;  %v2973_v56 = vpop.f32.mrf.mxu1  ;;  %3599 = vmatmul.f32.vlgmr.msra.gmra.mxu0 %v6138_v34  ;;  %v3051_v15 = vpop.f32.mrf.mxu3 }
 0x339   :  { %v2974_v0 = vadd.f32 %v2973_v56, %v2918_v11  ;;  %3917 = vmatpush.msra.mxu0 %v6845_v48 }
 0x33b   :  { %v3012_v32 = vadd.f32 %v3011_v10, %v2974_v0  ;;  %3634 = vmatmul.f32.vlgmr.msra.gmra.mxu1 %v6138_v34  ;;  %3919 = vmatpush.msra.mxu0 %v6849_v24  ;;  %v6892_v0 = vand.u32 4294901760, %v6326_v7 }
 0x33c   :  { %3972 = vmatpush.msra.mxu1 %v3971_v23  ;;  %3681 = vmatmul.f32.gmra.mxu2 %v6203_v45 }
 0x33d   :  { %v6886_v36 = vadd.f32 %v3051_v15, %v3012_v32  ;;  %3732 = vmatmul.f32.gmra.mxu3 %v6157_v46  ;;  %v2926_v63 = vpop.f32.mrf.mxu0 }
 0x33e   :  { %3978 = vmatpush.msra.mxu1 %v3977_v18  ;;  %v6899_v18 = vand.u32 4294901760, %v6312_v14 }
 0x33f   :  { %7610 = vst [vmem:[#allocation44_spill] sm:$0xff] %v6886_v36  ;;  %v3016_v58 = vpop.f32.mrf.mxu2 }
 0x340   :  { %v2977_v11 = vpop.f32.mrf.mxu1  ;;  %3603 = vmatmul.f32.gmra.mxu0 %v6157_v46  ;;  %v3057_v38 = vpop.f32.mrf.mxu3 }
 0x341   :  { %v2978_v10 = vadd.f32 %v2977_v11, %v2926_v63  ;;  %v6903_v63 = vsub.f32 %v6326_v7, %v6892_v0 }
 0x343   :  { %v3017_v56 = vadd.f32 %v3016_v58, %v2978_v10  ;;  %3638 = vmatmul.f32.gmra.mxu1 %v6157_v46 }
 0x344   :  { %3689 = vmatmul.f32.gmra.mxu2 %v6227_v37 }
 0x345   :  { %v6895_v15 = vadd.f32 %v3057_v38, %v3017_v56  ;;  %3736 = vmatmul.f32.gmra.mxu3 %v6180_v47  ;;  %v2934_v41 = vpop.f32.mrf.mxu0  ;;  %v6908_v38 = vsub.f32 %v6312_v14, %v6899_v18  ;;  %v7505_v56 = vand.u32 4294901760, %v6903_v63 }
 0x347   :  { %7611 = vst [vmem:[#allocation45_spill] sm:$0xff] %v6895_v15  ;;  %v3021_v23 = vpop.f32.mrf.mxu2  ;;  %v7504_v36 = vand.u32 4294901760, %v6908_v38 }
 0x348   :  { %v2981_v58 = vpop.f32.mrf.mxu1  ;;  %3607 = vmatmul.f32.gmra.mxu0 %v6180_v47  ;;  %v3063_v32 = vpop.f32.mrf.mxu3 }
 0x349   :  { %v2982_v11 = vadd.f32 %v2981_v58, %v2934_v41 }
 0x34b   :  { %v3022_v10 = vadd.f32 %v3021_v23, %v2982_v11  ;;  %3642 = vmatmul.f32.gmra.mxu1 %v6180_v47  ;;  %v4222_v23 = vsub.f32 %v6903_v63, %v7505_v56 }
 0x34c   :  { %3697 = vmatmul.f32.gmra.mxu2 %v6247_v27 }
 0x34d   :  { %v6913_v15 = vadd.f32 %v3063_v32, %v3022_v10  ;;  %3740 = vmatmul.f32.gmra.mxu3 %v6208_v19  ;;  %v2942_v7 = vpop.f32.mrf.mxu0  ;;  %v4228_v32 = vsub.f32 %v6908_v38, %v7504_v36  ;;  %v4223_v10 = vand.u32 4294901760, %v4222_v23 }
 0x34f   :  { %7612 = vst [vmem:[#allocation46_spill] sm:$0xff] %v6913_v15  ;;  %v3026_v2 = vpop.f32.mrf.mxu2 }
 0x350   :  { %v2985_v41 = vpop.f32.mrf.mxu1  ;;  %3611 = vmatmul.f32.gmra.mxu0 %v6208_v19  ;;  %v3069_v14 = vpop.f32.mrf.mxu3 }
 0x351   :  { %v2986_v58 = vadd.f32 %v2985_v41, %v2942_v7  ;;  %v4229_v7 = vand.u32 4294901760, %v4228_v32 }
 0x353   :  { %v3027_v11 = vadd.f32 %v3026_v2, %v2986_v58  ;;  %3646 = vmatmul.f32.gmra.mxu1 %v6208_v19 }
 0x354   :  { %3851 = vmatmul.f32.vlgmr.msrb.gmra.mxu2 %v6138_v34 }
 0x355   :  { %v6926_v15 = vadd.f32 %v3069_v14, %v3027_v11  ;;  %3886 = vmatmul.f32.vlgmr.msrb.gmra.mxu3 %v6138_v34  ;;  %4169 = vmatpush.msrb.mxu2 %v6892_v0  ;;  %v6930_v1 = vpop.f32.mrf.mxu0  ;;  %v7616_v14 = vand.u32 4294901760, %v6857_v43  ;;  %v7617_v11 = vand.u32 4294901760, %v6861_v21 }
 0x356   :  { %7614 = vst [vmem:[#allocation48_spill] sm:$0xff] %v6930_v1  ;;  %4224 = vmatpush.msrb.mxu3 %v4223_v10 }
 0x357   :  { %7613 = vst [vmem:[#allocation47_spill] sm:$0xff] %v6926_v15  ;;  %4171 = vmatpush.msrb.mxu2 %v6899_v18  ;;  %v3170_v41 = vpop.f32.mrf.mxu2 }
 0x358   :  { %4230 = vmatpush.msrb.mxu3 %v4229_v7  ;;  %v6933_v2 = vpop.f32.mrf.mxu1  ;;  %3766 = vmatmul.f32.vlgmr.msrb.gmra.mxu0 %v6146_v35  ;;  %v3225_v58 = vpop.f32.mrf.mxu3 }
 0x359   :  { %7615 = vst [vmem:[#allocation49_spill] sm:$0xff] %v6933_v2  ;;  %4097 = vmatpush.msrb.mxu0 %v7616_v14  ;;  %v3226_v23 = vadd.f32 %v3225_v58, %v3170_v41 }
 0x35b   :  { %3806 = vmatmul.f32.vlgmr.msrb.gmra.mxu1 %v6155_v62  ;;  %4101 = vmatpush.msrb.mxu0 %v7617_v11 }
 0x35c   :  { %4134 = vmatpush.msrb.mxu1 %v6845_v48  ;;  %3855 = vmatmul.f32.gmra.mxu2 %v6157_v46 }
 0x35d   :  { %3890 = vmatmul.f32.gmra.mxu3 %v6157_v46  ;;  %v6944_v32 = vpop.f32.mrf.mxu0 }
 0x35e   :  { %7618 = vst [vmem:[#allocation50_spill] sm:$0xff] %v6944_v32  ;;  %4136 = vmatpush.msrb.mxu1 %v6849_v24  ;;  %v7625_v32 = vand.u32 4294901760, %v6908_v38 }
 0x35f   :  { %v3178_v10 = vpop.f32.mrf.mxu2 }
 0x360   :  { %v6947_v7 = vpop.f32.mrf.mxu1  ;;  %3771 = vmatmul.f32.gmra.mxu0 %v6167_v50  ;;  %v3229_v43 = vpop.f32.mrf.mxu3 }
 0x361   :  { %7619 = vst [vmem:[#allocation51_spill] sm:$0xff] %v6947_v7  ;;  %v3230_v41 = vadd.f32 %v3229_v43, %v3178_v10 }
 0x363   :  { %3812 = vmatmul.f32.gmra.mxu1 %v6178_v40 }
 0x364   :  { %3859 = vmatmul.f32.gmra.mxu2 %v6180_v47 }
 0x365   :  { %3894 = vmatmul.f32.gmra.mxu3 %v6180_v47  ;;  %v6953_v48 = vpop.f32.mrf.mxu0 }
 0x366   :  { %7620 = vst [vmem:[#allocation52_spill] sm:$0xff] %v6953_v48 }
 0x367   :  { %v3186_v21 = vpop.f32.mrf.mxu2 }
 0x368   :  { %v6955_v58 = vpop.f32.mrf.mxu1  ;;  %3776 = vmatmul.f32.gmra.mxu0 %v6193_v30  ;;  %v3233_v24 = vpop.f32.mrf.mxu3 }
 0x369   :  { %7621 = vst [vmem:[#allocation53_spill] sm:$0xff] %v6955_v58  ;;  %v3234_v14 = vadd.f32 %v3233_v24, %v3186_v21  ;;  %v7624_v21 = vand.u32 4294901760, %v6903_v63 }
 0x36b   :  { %3818 = vmatmul.f32.gmra.mxu1 %v6206_v25 }
 0x36c   :  { %3863 = vmatmul.f32.gmra.mxu2 %v6208_v19 }
 0x36d   :  { %3898 = vmatmul.f32.gmra.mxu3 %v6208_v19  ;;  %v6961_v11 = vpop.f32.mrf.mxu0 }
 0x36e   :  { %7622 = vst [vmem:[#allocation54_spill] sm:$0xff] %v6961_v11 }
 0x36f   :  { %v3194_v10 = vpop.f32.mrf.mxu2 }
 0x370   :  { %v6963_v43 = vpop.f32.mrf.mxu1  ;;  %3781 = vmatmul.f32.gmra.mxu0 %v6217_v61  ;;  %v3237_v36 = vpop.f32.mrf.mxu3 }
 0x371   :  { %7623 = vst [vmem:[#allocation55_spill] sm:$0xff] %v6963_v43  ;;  %v3238_v56 = vadd.f32 %v3237_v36, %v3194_v10 }
 0x373   :  { %3824 = vmatmul.f32.gmra.mxu1 %v6230_v13 }
 0x374   :  { %4018 = vmatmul.f32.vlgmr.msra.gmra.mxu2 %v6146_v35 }
 0x375   :  { %4058 = vmatmul.f32.vlgmr.msra.gmra.mxu3 %v6155_v62  ;;  %4349 = vmatpush.msra.mxu2 %v7624_v21  ;;  %v3263_v24 = vpop.f32.mrf.mxu0 }
 0x376   :  { %4386 = vmatpush.msra.mxu3 %v6892_v0  ;;  %v3264_v7 = vadd.f32 %v3263_v24, %v3226_v23 }
 0x377   :  { %4353 = vmatpush.msra.mxu2 %v7625_v32  ;;  %v3348_v2 = vpop.f32.mrf.mxu2 }
 0x378   :  { %4388 = vmatpush.msra.mxu3 %v6899_v18  ;;  %v3303_v36 = vpop.f32.mrf.mxu1  ;;  %3925 = vmatmul.f32.vlgmr.msra.gmra.mxu0 %v6175_v54  ;;  %v3383_v10 = vpop.f32.mrf.mxu3 }
 0x379   :  { %v3304_v1 = vadd.f32 %v3303_v36, %v3264_v7  ;;  %4264 = vmatpush.msra.mxu0 %v6903_v63 }
 0x37b   :  { %v3349_v43 = vadd.f32 %v3348_v2, %v3304_v1  ;;  %3980 = vmatmul.f32.vlgmr.msra.gmra.mxu1 %v6138_v34  ;;  %4267 = vmatpush.msra.mxu0 %v6908_v38 }
 0x37c   :  { %4304 = vmatpush.msra.mxu1 %v6892_v0  ;;  %4023 = vmatmul.f32.gmra.mxu2 %v6167_v50 }
 0x37d   :  { %v6981_v23 = vadd.f32 %v3383_v10, %v3349_v43  ;;  %4064 = vmatmul.f32.gmra.mxu3 %v6178_v40  ;;  %v3268_v32 = vpop.f32.mrf.mxu0 }
 0x37e   :  { %4306 = vmatpush.msra.mxu1 %v6899_v18  ;;  %v3269_v21 = vadd.f32 %v3268_v32, %v3230_v41  ;;  %v6993_v32 = vand.u32 4294901760, %v6348_v17 }
 0x37f   :  { %7626 = vst [vmem:[#allocation56_spill] sm:$0xff] %v6981_v23  ;;  %v3352_v7 = vpop.f32.mrf.mxu2 }
 0x380   :  { %v3309_v24 = vpop.f32.mrf.mxu1  ;;  %3933 = vmatmul.f32.gmra.mxu0 %v6203_v45  ;;  %v3387_v1 = vpop.f32.mrf.mxu3 }
 0x381   :  { %v3310_v63 = vadd.f32 %v3309_v24, %v3269_v21 }
 0x383   :  { %v3353_v2 = vadd.f32 %v3352_v7, %v3310_v63  ;;  %3984 = vmatmul.f32.gmra.mxu1 %v6157_v46  ;;  %v6997_v7 = vand.u32 4294901760, %v6340_v33 }
 0x384   :  { %4028 = vmatmul.f32.gmra.mxu2 %v6193_v30 }
 0x385   :  { %v6988_v0 = vadd.f32 %v3387_v1, %v3353_v2  ;;  %4070 = vmatmul.f32.gmra.mxu3 %v6206_v25  ;;  %v3273_v38 = vpop.f32.mrf.mxu0  ;;  %v7005_v1 = vsub.f32 %v6348_v17, %v6993_v32 }
 0x386   :  { %v3274_v43 = vadd.f32 %v3273_v38, %v3234_v14  ;;  %v7009_v38 = vsub.f32 %v6340_v33, %v6997_v7 }
 0x387   :  { %7627 = vst [vmem:[#allocation57_spill] sm:$0xff] %v6988_v0  ;;  %v3356_v36 = vpop.f32.mrf.mxu2 }
 0x388   :  { %v3315_v18 = vpop.f32.mrf.mxu1  ;;  %3941 = vmatmul.f32.gmra.mxu0 %v6227_v37  ;;  %v3391_v41 = vpop.f32.mrf.mxu3  ;;  %v7507_v17 = vand.u32 4294901760, %v7009_v38 }
 0x389   :  { %v3316_v10 = vadd.f32 %v3315_v18, %v3274_v43 }
 0x38b   :  { %v3357_v21 = vadd.f32 %v3356_v36, %v3316_v10  ;;  %3988 = vmatmul.f32.gmra.mxu1 %v6180_v47 }
 0x38c   :  { %4033 = vmatmul.f32.gmra.mxu2 %v6217_v61 }
 0x38d   :  { %v7000_v24 = vadd.f32 %v3391_v41, %v3357_v21  ;;  %4076 = vmatmul.f32.gmra.mxu3 %v6230_v13  ;;  %v3278_v14 = vpop.f32.mrf.mxu0  ;;  %v7506_v41 = vand.u32 4294901760, %v7005_v1 }
 0x38e   :  { %v3279_v63 = vadd.f32 %v3278_v14, %v3238_v56 }
 0x38f   :  { %7628 = vst [vmem:[#allocation58_spill] sm:$0xff] %v7000_v24  ;;  %v3360_v2 = vpop.f32.mrf.mxu2  ;;  %v4474_v21 = vsub.f32 %v7005_v1, %v7506_v41 }
 0x390   :  { %v3321_v43 = vpop.f32.mrf.mxu1  ;;  %3949 = vmatmul.f32.gmra.mxu0 %v6247_v27  ;;  %v3395_v36 = vpop.f32.mrf.mxu3 }
 0x391   :  { %v3322_v18 = vadd.f32 %v3321_v43, %v3279_v63  ;;  %v4480_v43 = vsub.f32 %v7009_v38, %v7507_v17 }
 0x393   :  { %v3361_v10 = vadd.f32 %v3360_v2, %v3322_v18  ;;  %3992 = vmatmul.f32.gmra.mxu1 %v6208_v19  ;;  %v4481_v18 = vand.u32 4294901760, %v4480_v43  ;;  %v7043_v43 = vand.u32 4294901760, %v6355_v59 }
 0x394   :  { %4177 = vmatmul.f32.vlgmr.msrb.gmra.mxu2 %v6175_v54 }
 0x395   :  { %v7016_v56 = vadd.f32 %v3395_v36, %v3361_v10  ;;  %4232 = vmatmul.f32.vlgmr.msrb.gmra.mxu3 %v6138_v34  ;;  %4516 = vmatpush.msrb.mxu2 %v7005_v1  ;;  %v3422_v33 = vpop.f32.mrf.mxu0  ;;  %v4475_v36 = vand.u32 4294901760, %v4474_v21  ;;  %v7038_v21 = vand.u32 4294901760, %v6362_v49  ;;  %v7052_v11 = vsub.f32 %v6355_v59, %v7043_v43 }
 0x396   :  { %4556 = vmatpush.msrb.mxu3 %v6993_v32 }
 0x397   :  { %7629 = vst [vmem:[#allocation59_spill] sm:$0xff] %v7016_v56  ;;  %4519 = vmatpush.msrb.mxu2 %v7009_v38  ;;  %v3515_v14 = vpop.f32.mrf.mxu2 }
 0x398   :  { %4558 = vmatpush.msrb.mxu3 %v6997_v7  ;;  %v3477_v63 = vpop.f32.mrf.mxu1  ;;  %4103 = vmatmul.f32.vlgmr.msrb.gmra.mxu0 %v6138_v34  ;;  %v3555_v2 = vpop.f32.mrf.mxu3 }
 0x399   :  { %4421 = vmatpush.msrb.mxu0 %v6993_v32  ;;  %v3478_v58 = vadd.f32 %v3477_v63, %v3422_v33 }
 0x39b   :  { %4138 = vmatmul.f32.vlgmr.msrb.gmra.mxu1 %v6138_v34  ;;  %4423 = vmatpush.msrb.mxu0 %v6997_v7  ;;  %v3516_v55 = vadd.f32 %v3515_v14, %v3478_v58  ;;  %v1593_v14 = vadd.f32 %v6505_v9, %v6465_v3 }
 0x39c   :  { %4476 = vmatpush.msrb.mxu1 %v4475_v36  ;;  %4185 = vmatmul.f32.gmra.mxu2 %v6203_v45 }
 0x39d   :  { %4236 = vmatmul.f32.gmra.mxu3 %v6157_v46  ;;  %v3430_v10 = vpop.f32.mrf.mxu0  ;;  %v3556_v63 = vadd.f32 %v3555_v2, %v3516_v55  ;;  %v1628_v3 = vadd.f32 %v6507_v4, %v1593_v14 }
 0x39e   :  { %4482 = vmatpush.msrb.mxu1 %v4481_v18  ;;  %v7047_v18 = vsub.f32 %v6362_v49, %v7038_v21  ;;  %v7511_v49 = vand.u32 4294901760, %v7052_v11 }
 0x39f   :  { %v3520_v41 = vpop.f32.mrf.mxu2 }
 0x3a0   :  { %v3481_v0 = vpop.f32.mrf.mxu1  ;;  %4107 = vmatmul.f32.gmra.mxu0 %v6157_v46  ;;  %v3561_v17 = vpop.f32.mrf.mxu3  ;;  %v7508_v15 = vand.u32 4294901760, %v7047_v18  ;;  %v4732_v33 = vsub.f32 %v7052_v11, %v7511_v49 }
 0x3a1   :  { %v3482_v31 = vadd.f32 %v3481_v0, %v3430_v10  ;;  %v7630_v10 = vand.u32 4294901760, %v7005_v1 }
 0x3a2   :  { %v4726_v59 = vsub.f32 %v7047_v18, %v7508_v15 }
 0x3a3   :  { %4142 = vmatmul.f32.gmra.mxu1 %v6157_v46  ;;  %v3521_v55 = vadd.f32 %v3520_v41, %v3482_v31 }
 0x3a4   :  { %4193 = vmatmul.f32.gmra.mxu2 %v6227_v37  ;;  %v4727_v58 = vand.u32 4294901760, %v4726_v59 }
 0x3a5   :  { %4240 = vmatmul.f32.gmra.mxu3 %v6180_v47  ;;  %v3438_v36 = vpop.f32.mrf.mxu0 }
 0x3a7   :  { %v3525_v23 = vpop.f32.mrf.mxu2 }
 0x3a8   :  { %v3485_v56 = vpop.f32.mrf.mxu1  ;;  %4111 = vmatmul.f32.gmra.mxu0 %v6180_v47  ;;  %v3567_v24 = vpop.f32.mrf.mxu3 }
 0x3ab   :  { %4146 = vmatmul.f32.gmra.mxu1 %v6180_v47 }
 0x3ac   :  { %4201 = vmatmul.f32.gmra.mxu2 %v6247_v27  ;;  %v4733_v27 = vand.u32 4294901760, %v4732_v33  ;;  %v3562_v33 = vadd.f32 %v3561_v17, %v3521_v55 }
 0x3ad   :  { %4244 = vmatmul.f32.gmra.mxu3 %v6208_v19  ;;  %v3446_v48 = vpop.f32.mrf.mxu0 }
 0x3af   :  { %v3530_v5 = vpop.f32.mrf.mxu2 }
 0x3b0   :  { %v3489_v51 = vpop.f32.mrf.mxu1  ;;  %4115 = vmatmul.f32.gmra.mxu0 %v6208_v19  ;;  %v7060_v42 = vpop.f32.mrf.mxu3 }
 0x3b3   :  { %4150 = vmatmul.f32.gmra.mxu1 %v6208_v19 }
 0x3b4   :  { %4355 = vmatmul.f32.vlgmr.msra.gmra.mxu2 %v6138_v34 }
 0x3b5   :  { %4390 = vmatmul.f32.vlgmr.msra.gmra.mxu3 %v6138_v34  ;;  %4673 = vmatpush.msra.mxu2 %v7038_v21  ;;  %v3600_v26 = vpop.f32.mrf.mxu0 }
 0x3b6   :  { %4728 = vmatpush.msra.mxu3 %v4727_v58  ;;  %v3601_v15 = vadd.f32 %v3600_v26, %v3556_v63  ;;  %v7631_v26 = vand.u32 4294901760, %v7009_v38  ;;  %v3486_v63 = vadd.f32 %v3485_v56, %v3438_v36  ;;  %v3490_v56 = vadd.f32 %v3489_v51, %v3446_v48 }
 0x3b7   :  { %4675 = vmatpush.msra.mxu2 %v7043_v43  ;;  %v7075_v49 = vpop.f32.mrf.mxu2 }
 0x3b8   :  { %4734 = vmatpush.msra.mxu3 %v4733_v27  ;;  %v3635_v0 = vpop.f32.mrf.mxu1  ;;  %4270 = vmatmul.f32.vlgmr.msra.gmra.mxu0 %v6146_v35  ;;  %v3729_v2 = vpop.f32.mrf.mxu3  ;;  %v1597_v27 = vadd.f32 %v6513_v8, %v6478_v57  ;;  %v3526_v1 = vadd.f32 %v3525_v23, %v3486_v63  ;;  %v3531_v58 = vadd.f32 %v3530_v5, %v3490_v56 }
 0x3b9   :  { %v3636_v9 = vadd.f32 %v3635_v0, %v3601_v15  ;;  %4601 = vmatpush.msra.mxu0 %v7630_v10 }
 0x3ba   :  { %v1632_v41 = vadd.f32 %v6515_v28, %v1597_v27  ;;  %v3568_v17 = vadd.f32 %v3567_v24, %v3526_v1 }
 0x3bb   :  { %v5446_v59 = vadd.f32 %v3636_v9, %v1628_v3  ;;  %4310 = vmatmul.f32.vlgmr.msra.gmra.mxu1 %v6155_v62  ;;  %4605 = vmatpush.msra.mxu0 %v7631_v26 }
 0x3bc   :  { %4638 = vmatpush.msra.mxu1 %v6993_v32  ;;  %4359 = vmatmul.f32.gmra.mxu2 %v6157_v46 }
 0x3bd   :  { %5485 = vst.msk [vmem:[%s7473_s4 + $0x40] sm:$0xff] %vm67_vm0, %v5446_v59  ;;  %4394 = vmatmul.f32.gmra.mxu3 %v6157_v46  ;;  %v3604_v4 = vpop.f32.mrf.mxu0 }
 0x3be   :  { %4640 = vmatpush.msra.mxu1 %v6997_v7  ;;  %v3605_v31 = vadd.f32 %v3604_v4, %v3562_v33  ;;  %v1585_v7 = vadd.f32 %v6482_v22, %v6438_v6  ;;  %v3574_v6 = vadd.f32 %v7060_v42, %v3531_v58  ;;  %v1589_v22 = vadd.f32 %v6496_v29, %v6450_v39 }
 0x3bf   :  { %v3682_v15 = vpop.f32.mrf.mxu2  ;;  %v3730_v39 = vadd.f32 %v3729_v2, %v7075_v49  ;;  %v7632_v29 = vand.u32 4294901760, %v7047_v18  ;;  %v7633_v33 = vand.u32 4294901760, %v7052_v11  ;;  %v7157_v58 = vand.u32 4294901760, %v6390_v52 }
 0x3c0   :  { %v3639_v38 = vpop.f32.mrf.mxu1  ;;  %4275 = vmatmul.f32.gmra.mxu0 %v6167_v50  ;;  %v3733_v32 = vpop.f32.mrf.mxu3  ;;  %v1620_v48 = vadd.f32 %v6485_v16, %v1585_v7  ;;  %v1624_v42 = vadd.f32 %v6499_v20, %v1589_v22 }
 0x3c1   :  { %v3640_v57 = vadd.f32 %v3639_v38, %v3605_v31  ;;  %v3734_v31 = vadd.f32 %v3733_v32, %v3682_v15 }
 0x3c3   :  { %v5447_v8 = vadd.f32 %v3640_v57, %v1632_v41  ;;  %4316 = vmatmul.f32.gmra.mxu1 %v6178_v40 }
 0x3c4   :  { %4363 = vmatmul.f32.gmra.mxu2 %v6180_v47 }
 0x3c5   :  { %5486 = vst.msk [vmem:[%s7473_s4 + $0x48] sm:$0xff] %vm67_vm0, %v5447_v8  ;;  %4398 = vmatmul.f32.gmra.mxu3 %v6180_v47  ;;  %v3608_v23 = vpop.f32.mrf.mxu0 }
 0x3c6   :  { %v3609_v28 = vadd.f32 %v3608_v23, %v3568_v17 }
 0x3c7   :  { %v3690_v36 = vpop.f32.mrf.mxu2 }
 0x3c8   :  { %v3643_v14 = vpop.f32.mrf.mxu1  ;;  %4280 = vmatmul.f32.gmra.mxu0 %v6193_v30  ;;  %v3737_v51 = vpop.f32.mrf.mxu3 }
 0x3c9   :  { %v3644_v24 = vadd.f32 %v3643_v14, %v3609_v28  ;;  %v3738_v15 = vadd.f32 %v3737_v51, %v3690_v36  ;;  %v7161_v51 = vand.u32 4294901760, %v6378_v12 }
 0x3cb   :  { %v5414_v55 = vsub.f32 %v1620_v48, %v3644_v24  ;;  %4322 = vmatmul.f32.gmra.mxu1 %v6206_v25 }
 0x3cc   :  { %4367 = vmatmul.f32.gmra.mxu2 %v6208_v19 }
 0x3cd   :  { %5430 = vst.msk [vmem:[%s7473_s4] sm:$0xff] %vm67_vm0, %v5414_v55  ;;  %4402 = vmatmul.f32.gmra.mxu3 %v6208_v19  ;;  %v3612_v5 = vpop.f32.mrf.mxu0  ;;  %v7167_v55 = vsub.f32 %v6390_v52, %v7157_v58 }
 0x3ce   :  { %v3613_v16 = vadd.f32 %v3612_v5, %v3574_v6 }
 0x3cf   :  { %v3698_v0 = vpop.f32.mrf.mxu2  ;;  %v4977_v52 = vand.u32 4294901760, %v7167_v55 }
 0x3d0   :  { %v3647_v3 = vpop.f32.mrf.mxu1  ;;  %4285 = vmatmul.f32.gmra.mxu0 %v6217_v61  ;;  %v3741_v9 = vpop.f32.mrf.mxu3 }
 0x3d1   :  { %v3648_v10 = vadd.f32 %v3647_v3, %v3613_v16  ;;  %v7172_v16 = vsub.f32 %v6378_v12, %v7161_v51 }
 0x3d3   :  { %v5415_v59 = vsub.f32 %v1624_v42, %v3648_v10  ;;  %4328 = vmatmul.f32.gmra.mxu1 %v6230_v13  ;;  %v4983_v12 = vand.u32 4294901760, %v7172_v16 }
 0x3d4   :  { %4522 = vmatmul.f32.vlgmr.msrb.gmra.mxu2 %v6146_v35 }
 0x3d5   :  { %5431 = vst.msk [vmem:[%s7473_s4 + $0x8] sm:$0xff] %vm67_vm0, %v5415_v59  ;;  %4562 = vmatmul.f32.vlgmr.msrb.gmra.mxu3 %v6155_v62  ;;  %4853 = vmatpush.msrb.mxu2 %v7632_v29  ;;  %v3767_v26 = vpop.f32.mrf.mxu0  ;;  %v7635_v29 = vld [vmem:[#allocation10_spill] sm:$0xff] }
 0x3d6   :  { %4890 = vmatpush.msrb.mxu3 %v7038_v21  ;;  %v3768_v20 = vadd.f32 %v3767_v26, %v3730_v39  ;;  %v4978_v39 = vsub.f32 %v7167_v55, %v4977_v52 }
 0x3d7   :  { %4857 = vmatpush.msrb.mxu2 %v7633_v33  ;;  %v3852_v49 = vpop.f32.mrf.mxu2 }
 0x3d8   :  { %4892 = vmatpush.msrb.mxu3 %v7043_v43  ;;  %v3807_v2 = vpop.f32.mrf.mxu1  ;;  %4429 = vmatmul.f32.vlgmr.msrb.gmra.mxu0 %v6175_v54  ;;  %v3887_v63 = vpop.f32.mrf.mxu3 }
 0x3d9   :  { %v3808_v27 = vadd.f32 %v3807_v2, %v3768_v20  ;;  %4768 = vmatpush.msrb.mxu0 %v7047_v18  ;;  %v4984_v2 = vsub.f32 %v7172_v16, %v4983_v12 }
 0x3db   :  { %v3853_v4 = vadd.f32 %v3852_v49, %v3808_v27  ;;  %4484 = vmatmul.f32.vlgmr.msrb.gmra.mxu1 %v6138_v34  ;;  %4771 = vmatpush.msrb.mxu0 %v7052_v11  ;;  %v4985_v27 = vand.u32 4294901760, %v4984_v2 }
 0x3dc   :  { %4808 = vmatpush.msrb.mxu1 %v7038_v21  ;;  %4527 = vmatmul.f32.gmra.mxu2 %v6167_v50 }
 0x3dd   :  { %v3888_v1 = vadd.f32 %v3887_v63, %v3853_v4  ;;  %4568 = vmatmul.f32.gmra.mxu3 %v6178_v40  ;;  %v3772_v38 = vpop.f32.mrf.mxu0  ;;  %v4979_v63 = vand.u32 4294901760, %v4978_v39 }
 0x3de   :  { %4810 = vmatpush.msrb.mxu1 %v7043_v43  ;;  %v3773_v41 = vadd.f32 %v3772_v38, %v3734_v31 }
 0x3df   :  { %v5448_v57 = vadd.f32 %v3888_v1, %v6556_v53  ;;  %v3856_v18 = vpop.f32.mrf.mxu2 }
 0x3e0   :  { %v3813_v8 = vpop.f32.mrf.mxu1  ;;  %4437 = vmatmul.f32.gmra.mxu0 %v6203_v45  ;;  %v3891_v17 = vpop.f32.mrf.mxu3 }
 0x3e1   :  { %5487 = vst.msk [vmem:[%s7473_s4 + $0x50] sm:$0xff] %vm67_vm0, %v5448_v57  ;;  %v3814_v11 = vadd.f32 %v3813_v8, %v3773_v41  ;;  %v7636_v41 = vld [vmem:[#allocation24_spill] sm:$0xff]  ;;  %v7637_v8 = vld [vmem:[#allocation23_spill] sm:$0xff] }
 0x3e2   :  { %v7208_v57 = vand.u32 4294901760, %v7636_v41 }
 0x3e3   :  { %v3857_v21 = vadd.f32 %v3856_v18, %v3814_v11  ;;  %4488 = vmatmul.f32.gmra.mxu1 %v6157_v46 }
 0x3e4   :  { %4532 = vmatmul.f32.gmra.mxu2 %v6193_v30 }
 0x3e5   :  { %v3892_v43 = vadd.f32 %v3891_v17, %v3857_v21  ;;  %4574 = vmatmul.f32.gmra.mxu3 %v6206_v25  ;;  %v3777_v53 = vpop.f32.mrf.mxu0  ;;  %v7213_v17 = vand.u32 4294901760, %v7637_v8  ;;  %v7217_v21 = vsub.f32 %v7636_v41, %v7208_v57 }
 0x3e6   :  { %v3778_v32 = vadd.f32 %v3777_v53, %v3738_v15 }
 0x3e7   :  { %v5449_v56 = vadd.f32 %v3892_v43, %v6570_v60  ;;  %v3860_v7 = vpop.f32.mrf.mxu2  ;;  %v3742_v60 = vadd.f32 %v3741_v9, %v3698_v0  ;;  %v7634_v0 = vld [vmem:[#allocation22_spill] sm:$0xff]  ;;  %v7222_v53 = vsub.f32 %v7637_v8, %v7213_v17 }
 0x3e8   :  { %v3819_v23 = vpop.f32.mrf.mxu1  ;;  %4445 = vmatmul.f32.gmra.mxu0 %v6227_v37  ;;  %v3895_v28 = vpop.f32.mrf.mxu3 }
 0x3e9   :  { %5488 = vst.msk [vmem:[%s7473_s4 + $0x58] sm:$0xff] %vm67_vm0, %v5449_v56  ;;  %v3820_v36 = vadd.f32 %v3819_v23, %v3778_v32  ;;  %v5229_v32 = vand.u32 4294901760, %v7217_v21  ;;  %v5235_v23 = vand.u32 4294901760, %v7222_v53 }
 0x3eb   :  { %v3861_v14 = vadd.f32 %v3860_v7, %v3820_v36  ;;  %4492 = vmatmul.f32.gmra.mxu1 %v6180_v47 }
 0x3ec   :  { %4537 = vmatmul.f32.gmra.mxu2 %v6217_v61 }
 0x3ed   :  { %v3896_v48 = vadd.f32 %v3895_v28, %v3861_v14  ;;  %4580 = vmatmul.f32.gmra.mxu3 %v6230_v13  ;;  %v3782_v24 = vpop.f32.mrf.mxu0 }
 0x3ee   :  { %v3783_v6 = vadd.f32 %v3782_v24, %v3742_v60  ;;  %v5236_v24 = vsub.f32 %v7222_v53, %v5235_v23 }
 0x3ef   :  { %v5416_v22 = vsub.f32 %v6533_v44, %v3896_v48  ;;  %v3864_v5 = vpop.f32.mrf.mxu2  ;;  %v5230_v48 = vsub.f32 %v7217_v21, %v5229_v32 }
 0x3f0   :  { %v3825_v3 = vpop.f32.mrf.mxu1  ;;  %4453 = vmatmul.f32.gmra.mxu0 %v7634_v0  ;;  %v3899_v9 = vpop.f32.mrf.mxu3 }
 0x3f1   :  { %5432 = vst.msk [vmem:[%s7473_s4 + $0x10] sm:$0xff] %vm67_vm0, %v5416_v22  ;;  %v3826_v42 = vadd.f32 %v3825_v3, %v3783_v6  ;;  %v7638_v3 = vld [vmem:[#allocation11_spill] sm:$0xff] }
 0x3f3   :  { %v3865_v10 = vadd.f32 %v3864_v5, %v3826_v42  ;;  %4496 = vmatmul.f32.gmra.mxu1 %v6208_v19  ;;  %v5231_v5 = vand.u32 4294901760, %v5230_v48 }
 0x3f4   :  { %4681 = vmatmul.f32.vlgmr.msra.gmra.mxu2 %v6175_v54 }
 0x3f5   :  { %v3900_v44 = vadd.f32 %v3899_v9, %v3865_v10  ;;  %4736 = vmatmul.f32.vlgmr.msra.gmra.mxu3 %v6138_v34  ;;  %5020 = vmatpush.msra.mxu2 %v7167_v55  ;;  %v3926_v59 = vpop.f32.mrf.mxu0  ;;  %v7639_v9 = vld [vmem:[#allocation15_spill] sm:$0xff] }
 0x3f6   :  { %5060 = vmatpush.msra.mxu3 %v7157_v58  ;;  %v2097_v42 = vadd.f32 %v7639_v9, %v7638_v3 }
 0x3f7   :  { %v5417_v26 = vsub.f32 %v7635_v29, %v3900_v44  ;;  %5023 = vmatpush.msra.mxu2 %v7172_v16  ;;  %v4019_v20 = vpop.f32.mrf.mxu2 }
 0x3f8   :  { %5062 = vmatpush.msra.mxu3 %v7161_v51  ;;  %v3981_v33 = vpop.f32.mrf.mxu1  ;;  %4607 = vmatmul.f32.vlgmr.msra.gmra.mxu0 %v6138_v34  ;;  %v4059_v49 = vpop.f32.mrf.mxu3 }
 0x3f9   :  { %5433 = vst.msk [vmem:[%s7473_s4 + $0x18] sm:$0xff] %vm67_vm0, %v5417_v26  ;;  %4925 = vmatpush.msra.mxu0 %v7157_v58  ;;  %v3982_v56 = vadd.f32 %v3981_v33, %v3926_v59  ;;  %v5237_v59 = vand.u32 4294901760, %v5236_v24  ;;  %v7640_v33 = vld [vmem:[#allocation13_spill] sm:$0xff]  ;;  %v7644_v24 = vld [vmem:[#allocation19_spill] sm:$0xff] }
 0x3fb   :  { %4642 = vmatmul.f32.vlgmr.msra.gmra.mxu1 %v6138_v34  ;;  %4927 = vmatpush.msra.mxu0 %v7161_v51  ;;  %v4020_v36 = vadd.f32 %v4019_v20, %v3982_v56 }
 0x3fc   :  { %4980 = vmatpush.msra.mxu1 %v4979_v63  ;;  %4689 = vmatmul.f32.gmra.mxu2 %v6203_v45 }
 0x3fd   :  { %4740 = vmatmul.f32.gmra.mxu3 %v6157_v46  ;;  %v3934_v4 = vpop.f32.mrf.mxu0  ;;  %v4060_v6 = vadd.f32 %v4059_v49, %v4020_v36  ;;  %v2132_v49 = vadd.f32 %v7640_v33, %v2097_v42 }
 0x3fe   :  { %4986 = vmatpush.msra.mxu1 %v4985_v27 }
 0x3ff   :  { %v4024_v31 = vpop.f32.mrf.mxu2 }
 0x400   :  { %v3985_v1 = vpop.f32.mrf.mxu1  ;;  %4611 = vmatmul.f32.gmra.mxu0 %v6157_v46  ;;  %v4065_v38 = vpop.f32.mrf.mxu3 }
 0x401   :  { %v3986_v22 = vadd.f32 %v3985_v1, %v3934_v4  ;;  %v7642_v1 = vld [vmem:[#allocation25_spill] sm:$0xff] }
 0x403   :  { %4646 = vmatmul.f32.gmra.mxu1 %v6157_v46  ;;  %v4025_v29 = vadd.f32 %v4024_v31, %v3986_v22  ;;  %v7641_v31 = vld [vmem:[#allocation9_spill] sm:$0xff] }
 0x404   :  { %4697 = vmatmul.f32.gmra.mxu2 %v6227_v37  ;;  %v2101_v41 = vadd.f32 %v7642_v1, %v7641_v31 }
 0x405   :  { %4744 = vmatmul.f32.gmra.mxu3 %v6180_v47  ;;  %v3942_v18 = vpop.f32.mrf.mxu0  ;;  %v4066_v27 = vadd.f32 %v4065_v38, %v4025_v29  ;;  %v7648_v29 = vld [vmem:[#allocation20_spill] sm:$0xff] }
 0x407   :  { %v4029_v11 = vpop.f32.mrf.mxu2 }
 0x408   :  { %v3989_v15 = vpop.f32.mrf.mxu1  ;;  %4615 = vmatmul.f32.gmra.mxu0 %v6180_v47  ;;  %v4071_v43 = vpop.f32.mrf.mxu3 }
 0x409   :  { %v3990_v4 = vadd.f32 %v3989_v15, %v3942_v18  ;;  %v7643_v18 = vld [vmem:[#allocation26_spill] sm:$0xff] }
 0x40a   :  { %v2136_v8 = vadd.f32 %v7643_v18, %v2101_v41 }
 0x40b   :  { %4650 = vmatmul.f32.gmra.mxu1 %v6180_v47 }
 0x40c   :  { %4705 = vmatmul.f32.gmra.mxu2 %v7634_v0 }
 0x40d   :  { %4748 = vmatmul.f32.gmra.mxu3 %v6208_v19  ;;  %v3950_v7 = vpop.f32.mrf.mxu0 }
 0x40f   :  { %v4034_v28 = vpop.f32.mrf.mxu2 }
 0x410   :  { %v3993_v14 = vpop.f32.mrf.mxu1  ;;  %4619 = vmatmul.f32.gmra.mxu0 %v6208_v19  ;;  %v7230_v60 = vpop.f32.mrf.mxu3 }
 0x411   :  { %v3994_v48 = vadd.f32 %v3993_v14, %v3950_v7  ;;  %v7646_v7 = vld [vmem:[#allocation14_spill] sm:$0xff] }
 0x413   :  { %4654 = vmatmul.f32.gmra.mxu1 %v6208_v19  ;;  %v4035_v3 = vadd.f32 %v4034_v28, %v3994_v48 }
 0x414   :  { %4859 = vmatmul.f32.vlgmr.msrb.gmra.mxu2 %v6138_v34 }
 0x415   :  { %4894 = vmatmul.f32.vlgmr.msrb.gmra.mxu3 %v6138_v34  ;;  %5177 = vmatpush.msrb.mxu2 %v7208_v57  ;;  %v4104_v10 = vpop.f32.mrf.mxu0 }
 0x416   :  { %5232 = vmatpush.msrb.mxu3 %v5231_v5  ;;  %v4105_v44 = vadd.f32 %v4104_v10, %v4060_v6  ;;  %v7645_v6 = vld [vmem:[#allocation21_spill] sm:$0xff] }
 0x417   :  { %5179 = vmatpush.msrb.mxu2 %v7213_v17  ;;  %v7245_v39 = vpop.f32.mrf.mxu2 }
 0x418   :  { %5238 = vmatpush.msrb.mxu3 %v5237_v59  ;;  %v4139_v26 = vpop.f32.mrf.mxu1  ;;  %4774 = vmatmul.f32.vlgmr.msrb.gmra.mxu0 %v6146_v35  ;;  %v4233_v20 = vpop.f32.mrf.mxu3  ;;  %v7647_v59 = vld [vmem:[#allocation8_spill] sm:$0xff] }
 0x419   :  { %v4140_v2 = vadd.f32 %v4139_v26, %v4105_v44  ;;  %5105 = vmatpush.msrb.mxu0 %v4977_v52  ;;  %v4078_v44 = vadd.f32 %v7230_v60, %v4035_v3  ;;  %v2093_v26 = vadd.f32 %v7648_v29, %v7647_v59  ;;  %v7649_v60 = vld [vmem:[#allocation12_spill] sm:$0xff]  ;;  %v4234_v1 = vadd.f32 %v4233_v20, %v7245_v39 }
 0x41b   :  { %v5450_v63 = vadd.f32 %v4140_v2, %v2132_v49  ;;  %4814 = vmatmul.f32.vlgmr.msrb.gmra.mxu1 %v6155_v62  ;;  %5109 = vmatpush.msrb.mxu0 %v4983_v12  ;;  %v4030_v12 = vadd.f32 %v4029_v11, %v3990_v4 }
 0x41c   :  { %5142 = vmatpush.msrb.mxu1 %v7157_v58  ;;  %4863 = vmatmul.f32.gmra.mxu2 %v6157_v46 }
 0x41d   :  { %5489 = vst.msk [vmem:[%s7473_s4 + $0x60] sm:$0xff] %vm67_vm0, %v5450_v63  ;;  %4898 = vmatmul.f32.gmra.mxu3 %v6157_v46  ;;  %v4108_v55 = vpop.f32.mrf.mxu0  ;;  %v4072_v36 = vadd.f32 %v4071_v43, %v4030_v12 }
 0x41e   :  { %5144 = vmatpush.msrb.mxu1 %v7161_v51  ;;  %v4109_v16 = vadd.f32 %v4108_v55, %v4066_v27  ;;  %v2089_v51 = vadd.f32 %v7645_v6, %v7644_v24  ;;  %v2128_v27 = vadd.f32 %v7649_v60, %v2093_v26  ;;  %v7651_v6 = vld [vmem:[#allocation16_spill] sm:$0xff] }
 0x41f   :  { %v4186_v52 = vpop.f32.mrf.mxu2 }
 0x420   :  { %v4143_v38 = vpop.f32.mrf.mxu1  ;;  %4779 = vmatmul.f32.gmra.mxu0 %v6167_v50  ;;  %v4237_v58 = vpop.f32.mrf.mxu3  ;;  %v2124_v14 = vadd.f32 %v7646_v7, %v2089_v51 }
 0x421   :  { %v4144_v15 = vadd.f32 %v4143_v38, %v4109_v16 }
 0x423   :  { %v5451_v56 = vadd.f32 %v4144_v15, %v2136_v8  ;;  %4820 = vmatmul.f32.gmra.mxu1 %v6178_v40  ;;  %v7650_v15 = vld [vmem:[#allocation17_spill] sm:$0xff] }
 0x424   :  { %4867 = vmatmul.f32.gmra.mxu2 %v6180_v47 }
 0x425   :  { %5490 = vst.msk [vmem:[%s7473_s4 + $0x68] sm:$0xff] %vm67_vm0, %v5451_v56  ;;  %4902 = vmatmul.f32.gmra.mxu3 %v6180_v47  ;;  %v4112_v11 = vpop.f32.mrf.mxu0 }
 0x426   :  { %v4113_v22 = vadd.f32 %v4112_v11, %v4072_v36 }
 0x427   :  { %v4194_v5 = vpop.f32.mrf.mxu2 }
 0x428   :  { %v4147_v9 = vpop.f32.mrf.mxu1  ;;  %4784 = vmatmul.f32.gmra.mxu0 %v6193_v30  ;;  %v4241_v43 = vpop.f32.mrf.mxu3 }
 0x429   :  { %v4148_v42 = vadd.f32 %v4147_v9, %v4113_v22 }
 0x42b   :  { %v5418_v10 = vsub.f32 %v2124_v14, %v4148_v42  ;;  %4826 = vmatmul.f32.gmra.mxu1 %v6206_v25 }
 0x42c   :  { %4871 = vmatmul.f32.gmra.mxu2 %v6208_v19 }
 0x42d   :  { %5434 = vst.msk [vmem:[%s7473_s4 + $0x20] sm:$0xff] %vm67_vm0, %v5418_v10  ;;  %4906 = vmatmul.f32.gmra.mxu3 %v6208_v19  ;;  %v4116_v28 = vpop.f32.mrf.mxu0  ;;  %v7652_v10 = vld [vmem:[#allocation27_spill] sm:$0xff] }
 0x42e   :  { %v4117_v33 = vadd.f32 %v4116_v28, %v4078_v44 }
 0x42f   :  { %v4202_v49 = vpop.f32.mrf.mxu2 }
 0x430   :  { %v4151_v2 = vpop.f32.mrf.mxu1  ;;  %4789 = vmatmul.f32.gmra.mxu0 %v6217_v61  ;;  %v4245_v63 = vpop.f32.mrf.mxu3 }
 0x431   :  { %v4152_v4 = vadd.f32 %v4151_v2, %v4117_v33 }
 0x433   :  { %v5419_v31 = vsub.f32 %v2128_v27, %v4152_v4  ;;  %4832 = vmatmul.f32.gmra.mxu1 %v6230_v13 }
 0x434   :  { %5026 = vmatmul.f32.vlgmr.msra.gmra.mxu2 %v6146_v35 }
 0x435   :  { %5435 = vst.msk [vmem:[%s7473_s4 + $0x28] sm:$0xff] %vm67_vm0, %v5419_v31  ;;  %5066 = vmatmul.f32.vlgmr.msra.gmra.mxu3 %v6155_v62  ;;  %5357 = vmatpush.msra.mxu2 %v5229_v32  ;;  %v4271_v41 = vpop.f32.mrf.mxu0  ;;  %v4238_v32 = vadd.f32 %v4237_v58, %v4186_v52  ;;  %v4242_v52 = vadd.f32 %v4241_v43, %v4194_v5 }
 0x436   :  { %5394 = vmatpush.msra.mxu3 %v7208_v57  ;;  %v4272_v55 = vadd.f32 %v4271_v41, %v4234_v1  ;;  %v4246_v43 = vadd.f32 %v4245_v63, %v4202_v49  ;;  %v7653_v63 = vld [vmem:[#allocation28_spill] sm:$0xff] }
 0x437   :  { %5361 = vmatpush.msra.mxu2 %v5235_v23  ;;  %v4356_v39 = vpop.f32.mrf.mxu2 }
 0x438   :  { %5396 = vmatpush.msra.mxu3 %v7213_v17  ;;  %v4311_v20 = vpop.f32.mrf.mxu1  ;;  %4933 = vmatmul.f32.vlgmr.msra.gmra.mxu0 %v6175_v54  ;;  %v4391_v16 = vpop.f32.mrf.mxu3 }
 0x439   :  { %v4312_v12 = vadd.f32 %v4311_v20, %v4272_v55  ;;  %5272 = vmatpush.msra.mxu0 %v7217_v21 }
 0x43b   :  { %v4357_v38 = vadd.f32 %v4356_v39, %v4312_v12  ;;  %4988 = vmatmul.f32.vlgmr.msra.gmra.mxu1 %v6138_v34  ;;  %5275 = vmatpush.msra.mxu0 %v7222_v53 }
 0x43c   :  { %5312 = vmatpush.msra.mxu1 %v7208_v57  ;;  %5031 = vmatmul.f32.gmra.mxu2 %v6167_v50 }
 0x43d   :  { %v4392_v23 = vadd.f32 %v4391_v16, %v4357_v38  ;;  %v4276_v18 = vpop.f32.mrf.mxu0  ;;  %5072 = vmatmul.f32.gmra.mxu3 %v6178_v40 }
 0x43e   :  { %5314 = vmatpush.msra.mxu1 %v7213_v17  ;;  %v4277_v8 = vadd.f32 %v4276_v18, %v4238_v32 }
 0x43f   :  { %v5452_v56 = vadd.f32 %v4392_v23, %v7650_v15  ;;  %v4360_v21 = vpop.f32.mrf.mxu2 }
 0x440   :  { %v4317_v36 = vpop.f32.mrf.mxu1  ;;  %4941 = vmatmul.f32.gmra.mxu0 %v6203_v45  ;;  %v4395_v48 = vpop.f32.mrf.mxu3 }
 0x441   :  { %5491 = vst.msk [vmem:[%s7473_s4 + $0x70] sm:$0xff] %vm67_vm0, %v5452_v56  ;;  %v4318_v57 = vadd.f32 %v4317_v36, %v4277_v8  ;;  %v7654_v56 = vld [vmem:[#allocation18_spill] sm:$0xff] }
 0x443   :  { %v4361_v53 = vadd.f32 %v4360_v21, %v4318_v57  ;;  %4992 = vmatmul.f32.gmra.mxu1 %v6157_v46  ;;  %v7655_v21 = vld [vmem:[#allocation36_spill] sm:$0xff] }
 0x444   :  { %5036 = vmatmul.f32.gmra.mxu2 %v6193_v30  ;;  %v2601_v36 = vadd.f32 %v7655_v21, %v7654_v56 }
 0x445   :  { %v4396_v17 = vadd.f32 %v4395_v48, %v4361_v53  ;;  %v4281_v58 = vpop.f32.mrf.mxu0  ;;  %5078 = vmatmul.f32.gmra.mxu3 %v6206_v25 }
 0x446   :  { %v4282_v24 = vadd.f32 %v4281_v58, %v4242_v52  ;;  %v7656_v58 = vld [vmem:[#allocation37_spill] sm:$0xff] }
 0x447   :  { %v5453_v51 = vadd.f32 %v4396_v17, %v7651_v6  ;;  %v4364_v11 = vpop.f32.mrf.mxu2 }
 0x448   :  { %v4323_v22 = vpop.f32.mrf.mxu1  ;;  %4949 = vmatmul.f32.gmra.mxu0 %v6227_v37  ;;  %v4399_v3 = vpop.f32.mrf.mxu3 }
 0x449   :  { %5492 = vst.msk [vmem:[%s7473_s4 + $0x78] sm:$0xff] %vm67_vm0, %v5453_v51  ;;  %v4324_v5 = vadd.f32 %v4323_v22, %v4282_v24  ;;  %v2636_v24 = vadd.f32 %v7656_v58, %v2601_v36 }
 0x44b   :  { %v4365_v9 = vadd.f32 %v4364_v11, %v4324_v5  ;;  %4996 = vmatmul.f32.gmra.mxu1 %v6180_v47  ;;  %v7658_v5 = vld [vmem:[#allocation38_spill] sm:$0xff] }
 0x44c   :  { %5041 = vmatmul.f32.gmra.mxu2 %v6217_v61 }
 0x44d   :  { %v4400_v7 = vadd.f32 %v4399_v3, %v4365_v9  ;;  %v4286_v14 = vpop.f32.mrf.mxu0  ;;  %5084 = vmatmul.f32.gmra.mxu3 %v6230_v13  ;;  %v7657_v3 = vld [vmem:[#allocation31_spill] sm:$0xff] }
 0x44e   :  { %v4287_v42 = vadd.f32 %v4286_v14, %v4246_v43 }
 0x44f   :  { %v5420_v44 = vsub.f32 %v7652_v10, %v4400_v7  ;;  %v4368_v59 = vpop.f32.mrf.mxu2 }
 0x450   :  { %v4329_v29 = vpop.f32.mrf.mxu1  ;;  %4957 = vmatmul.f32.gmra.mxu0 %v7634_v0  ;;  %v4403_v26 = vpop.f32.mrf.mxu3 }
 0x451   :  { %5436 = vst.msk [vmem:[%s7473_s4 + $0x30] sm:$0xff] %vm67_vm0, %v5420_v44  ;;  %v4330_v28 = vadd.f32 %v4329_v29, %v4287_v42  ;;  %v7659_v42 = vld [vmem:[#allocation39_spill] sm:$0xff] }
 0x453   :  { %v4369_v33 = vadd.f32 %v4368_v59, %v4330_v28  ;;  %5000 = vmatmul.f32.gmra.mxu1 %v6208_v19  ;;  %v7660_v28 = vld [vmem:[#allocation29_spill] sm:$0xff] }
 0x454   :  { %5185 = vmatmul.f32.vlgmr.msrb.gmra.mxu2 %v6175_v54 }
 0x455   :  { %v4404_v49 = vadd.f32 %v4403_v26, %v4369_v33  ;;  %v4430_v2 = vpop.f32.mrf.mxu0  ;;  %5240 = vmatmul.f32.vlgmr.msrb.gmra.mxu3 %v6138_v34  ;;  %v7661_v33 = vld [vmem:[#allocation32_spill] sm:$0xff] }
 0x457   :  { %v5421_v60 = vsub.f32 %v7653_v63, %v4404_v49  ;;  %v4523_v27 = vpop.f32.mrf.mxu2 }
 0x458   :  { %v4485_v4 = vpop.f32.mrf.mxu1  ;;  %5111 = vmatmul.f32.vlgmr.msrb.gmra.mxu0 %v6138_v34  ;;  %v4563_v31 = vpop.f32.mrf.mxu3 }
 0x459   :  { %5437 = vst.msk [vmem:[%s7473_s4 + $0x38] sm:$0xff] %vm67_vm0, %v5421_v60  ;;  %v4486_v12 = vadd.f32 %v4485_v4, %v4430_v2 }
 0x45b   :  { %5146 = vmatmul.f32.vlgmr.msrb.gmra.mxu1 %v6138_v34  ;;  %v4524_v23 = vadd.f32 %v4523_v27, %v4486_v12  ;;  %v7662_v27 = vld [vmem:[#allocation33_spill] sm:$0xff] }
 0x45c   :  { %5193 = vmatmul.f32.gmra.mxu2 %v6203_v45 }
 0x45d   :  { %v4438_v54 = vpop.f32.mrf.mxu0  ;;  %5244 = vmatmul.f32.gmra.mxu3 %v6157_v46  ;;  %v4564_v8 = vadd.f32 %v4563_v31, %v4524_v23 }
 0x45f   :  { %v4528_v1 = vpop.f32.mrf.mxu2 }
 0x460   :  { %v4489_v41 = vpop.f32.mrf.mxu1  ;;  %5115 = vmatmul.f32.gmra.mxu0 %v6157_v46  ;;  %v4569_v55 = vpop.f32.mrf.mxu3 }
 0x461   :  { %v4490_v15 = vadd.f32 %v4489_v41, %v4438_v54  ;;  %v7663_v41 = vld [vmem:[#allocation30_spill] sm:$0xff] }
 0x463   :  { %5150 = vmatmul.f32.gmra.mxu1 %v6157_v46  ;;  %v4529_v53 = vadd.f32 %v4528_v1, %v4490_v15 }
 0x464   :  { %5201 = vmatmul.f32.gmra.mxu2 %v6227_v37 }
 0x465   :  { %v4446_v39 = vpop.f32.mrf.mxu0  ;;  %5248 = vmatmul.f32.gmra.mxu3 %v6180_v47  ;;  %v4570_v11 = vadd.f32 %v4569_v55, %v4529_v53  ;;  %v7664_v55 = vld [vmem:[#allocation34_spill] sm:$0xff] }
 0x466   :  { %v7666_v53 = vld [vmem:[#allocation42_spill] sm:$0xff] }
 0x467   :  { %v4533_v20 = vpop.f32.mrf.mxu2 }
 0x468   :  { %v4493_v16 = vpop.f32.mrf.mxu1  ;;  %5119 = vmatmul.f32.gmra.mxu0 %v6180_v47  ;;  %v4575_v45 = vpop.f32.mrf.mxu3 }
 0x469   :  { %v4494_v22 = vadd.f32 %v4493_v16, %v4446_v39  ;;  %v2597_v39 = vadd.f32 %v7664_v55, %v7663_v41 }
 0x46b   :  { %5154 = vmatmul.f32.gmra.mxu1 %v6180_v47  ;;  %v4534_v7 = vadd.f32 %v4533_v20, %v4494_v22 }
 0x46c   :  { %5209 = vmatmul.f32.gmra.mxu2 %v7634_v0 }
 0x46d   :  { %v4454_v38 = vpop.f32.mrf.mxu0  ;;  %5252 = vmatmul.f32.gmra.mxu3 %v6208_v19  ;;  %v4576_v29 = vadd.f32 %v4575_v45, %v4534_v7  ;;  %v7665_v45 = vld [vmem:[#allocation35_spill] sm:$0xff] }
 0x46e   :  { %v2632_v12 = vadd.f32 %v7665_v45, %v2597_v39 }
 0x46f   :  { %v4538_v32 = vpop.f32.mrf.mxu2 }
 0x470   :  { %v4497_v18 = vpop.f32.mrf.mxu1  ;;  %5123 = vmatmul.f32.gmra.mxu0 %v6208_v19  ;;  %v4581_v37 = vpop.f32.mrf.mxu3 }
 0x471   :  { %v4498_v26 = vadd.f32 %v4497_v18, %v4454_v38 }
 0x473   :  { %5158 = vmatmul.f32.gmra.mxu1 %v6208_v19  ;;  %v4539_v63 = vadd.f32 %v4538_v32, %v4498_v26 }
 0x474   :  { %5363 = vmatmul.f32.vlgmr.msra.gmra.mxu2 %v6138_v34 }
 0x475   :  { %v4608_v48 = vpop.f32.mrf.mxu0  ;;  %5398 = vmatmul.f32.vlgmr.msra.gmra.mxu3 %v6138_v34  ;;  %v2605_v34 = vadd.f32 %v7658_v5, %v7657_v3  ;;  %v4582_v1 = vadd.f32 %v4581_v37, %v4539_v63  ;;  %v7667_v3 = vld [vmem:[#allocation43_spill] sm:$0xff] }
 0x476   :  { %v4609_v0 = vadd.f32 %v4608_v48, %v4564_v8 }
 0x477   :  { %v4682_v57 = vpop.f32.mrf.mxu2  ;;  %v2640_v10 = vadd.f32 %v7659_v42, %v2605_v34 }
 0x478   :  { %v4643_v52 = vpop.f32.mrf.mxu1  ;;  %5278 = vmatmul.f32.vlgmr.msra.gmra.mxu0 %v6146_v35  ;;  %v4737_v17 = vpop.f32.mrf.mxu3 }
 0x479   :  { %v4644_v6 = vadd.f32 %v4643_v52, %v4609_v0  ;;  %v4738_v23 = vadd.f32 %v4737_v17, %v4682_v57 }
 0x47b   :  { %v5454_v51 = vadd.f32 %v4644_v6, %v2636_v24  ;;  %5318 = vmatmul.f32.vlgmr.msra.gmra.mxu1 %v6155_v62 }
 0x47c   :  { %5367 = vmatmul.f32.gmra.mxu2 %v6157_v46 }
 0x47d   :  { %5493 = vst.msk [vmem:[%s7473_s4 + $0xc0] sm:$0xff] %vm67_vm0, %v5454_v51  ;;  %v4612_v35 = vpop.f32.mrf.mxu0  ;;  %5402 = vmatmul.f32.gmra.mxu3 %v6157_v46  ;;  %v2593_v46 = vadd.f32 %v7661_v33, %v7660_v28 }
 0x47e   :  { %v4613_v9 = vadd.f32 %v4612_v35, %v4570_v11 }
 0x47f   :  { %v4690_v43 = vpop.f32.mrf.mxu2  ;;  %v2628_v4 = vadd.f32 %v7662_v27, %v2593_v46 }
 0x480   :  { %v4647_v14 = vpop.f32.mrf.mxu1  ;;  %5283 = vmatmul.f32.gmra.mxu0 %v6167_v50  ;;  %v4741_v62 = vpop.f32.mrf.mxu3 }
 0x481   :  { %v4648_v44 = vadd.f32 %v4647_v14, %v4613_v9  ;;  %v4742_v21 = vadd.f32 %v4741_v62, %v4690_v43 }
 0x483   :  { %v5455_v59 = vadd.f32 %v4648_v44, %v2640_v10  ;;  %5324 = vmatmul.f32.gmra.mxu1 %v6178_v40  ;;  %v7668_v44 = vld [vmem:[#allocation40_spill] sm:$0xff] }
 0x484   :  { %5371 = vmatmul.f32.gmra.mxu2 %v6180_v47 }
 0x485   :  { %5494 = vst.msk [vmem:[%s7473_s4 + $0xc8] sm:$0xff] %vm67_vm0, %v5455_v59  ;;  %v4616_v50 = vpop.f32.mrf.mxu0  ;;  %5406 = vmatmul.f32.gmra.mxu3 %v6180_v47 }
 0x486   :  { %v4617_v49 = vadd.f32 %v4616_v50, %v4576_v29 }
 0x487   :  { %v4698_v2 = vpop.f32.mrf.mxu2 }
 0x488   :  { %v4651_v60 = vpop.f32.mrf.mxu1  ;;  %5288 = vmatmul.f32.gmra.mxu0 %v6193_v30  ;;  %v4745_v40 = vpop.f32.mrf.mxu3 }
 0x489   :  { %v4652_v31 = vadd.f32 %v4651_v60, %v4617_v49  ;;  %v4746_v6 = vadd.f32 %v4745_v40, %v4698_v2  ;;  %v7669_v2 = vld [vmem:[#allocation41_spill] sm:$0xff] }
 0x48b   :  { %v5422_v54 = vsub.f32 %v2628_v4, %v4652_v31  ;;  %5330 = vmatmul.f32.gmra.mxu1 %v6206_v25 }
 0x48c   :  { %5375 = vmatmul.f32.gmra.mxu2 %v6208_v19 }
 0x48d   :  { %5438 = vst.msk [vmem:[%s7473_s4 + $0x80] sm:$0xff] %vm67_vm0, %v5422_v54  ;;  %v4620_v47 = vpop.f32.mrf.mxu0  ;;  %5410 = vmatmul.f32.gmra.mxu3 %v6208_v19 }
 0x48e   :  { %v4621_v30 = vadd.f32 %v4620_v47, %v4582_v1 }
 0x48f   :  { %v4706_v20 = vpop.f32.mrf.mxu2 }
 0x490   :  { %v4655_v16 = vpop.f32.mrf.mxu1  ;;  %5293 = vmatmul.f32.gmra.mxu0 %v6217_v61  ;;  %v4749_v25 = vpop.f32.mrf.mxu3 }
 0x491   :  { %v4656_v38 = vadd.f32 %v4655_v16, %v4621_v30  ;;  %v4750_v14 = vadd.f32 %v4749_v25, %v4706_v20 }
 0x493   :  { %v5423_v32 = vsub.f32 %v2632_v12, %v4656_v38  ;;  %5336 = vmatmul.f32.gmra.mxu1 %v6230_v13 }
 0x495   :  { %5439 = vst.msk [vmem:[%s7473_s4 + $0x88] sm:$0xff] %vm67_vm0, %v5423_v32  ;;  %v4775_v18 = vpop.f32.mrf.mxu0 }
 0x496   :  { %v4776_v19 = vadd.f32 %v4775_v18, %v4738_v23  ;;  %v7670_v23 = vld [vmem:[#allocation46_spill] sm:$0xff]  ;;  %v7671_v18 = vld [vmem:[#allocation52_spill] sm:$0xff] }
 0x497   :  { %v4860_v37 = vpop.f32.mrf.mxu2 }
 0x498   :  { %v4815_v8 = vpop.f32.mrf.mxu1  ;;  %v4895_v15 = vpop.f32.mrf.mxu3 }
 0x499   :  { %v4816_v56 = vadd.f32 %v4815_v8, %v4776_v19  ;;  %v3105_v19 = vadd.f32 %v7671_v18, %v7670_v23 }
 0x49b   :  { %v4861_v61 = vadd.f32 %v4860_v37, %v4816_v56 }
 0x49d   :  { %v4896_v36 = vadd.f32 %v4895_v15, %v4861_v61  ;;  %v4780_v48 = vpop.f32.mrf.mxu0 }
 0x49e   :  { %v4781_v0 = vadd.f32 %v4780_v48, %v4742_v21 }
 0x49f   :  { %v5456_v52 = vadd.f32 %v4896_v36, %v7666_v53  ;;  %v4864_v13 = vpop.f32.mrf.mxu2  ;;  %v7672_v36 = vld [vmem:[#allocation53_spill] sm:$0xff] }
 0x4a0   :  { %v4821_v57 = vpop.f32.mrf.mxu1  ;;  %v4899_v17 = vpop.f32.mrf.mxu3  ;;  %v3140_v48 = vadd.f32 %v7672_v36, %v3105_v19 }
 0x4a1   :  { %5495 = vst.msk [vmem:[%s7473_s4 + $0xd0] sm:$0xff] %vm67_vm0, %v5456_v52  ;;  %v4822_v58 = vadd.f32 %v4821_v57, %v4781_v0  ;;  %v7673_v57 = vld [vmem:[#allocation47_spill] sm:$0xff] }
 0x4a3   :  { %v4865_v24 = vadd.f32 %v4864_v13, %v4822_v58 }
 0x4a5   :  { %v4900_v51 = vadd.f32 %v4899_v17, %v4865_v24  ;;  %v4785_v11 = vpop.f32.mrf.mxu0  ;;  %v7674_v17 = vld [vmem:[#allocation54_spill] sm:$0xff] }
 0x4a6   :  { %v4786_v22 = vadd.f32 %v4785_v11, %v4746_v6  ;;  %v3109_v58 = vadd.f32 %v7674_v17, %v7673_v57  ;;  %v7683_v57 = vld [vmem:[#allocation59_spill] sm:$0xff] }
 0x4a7   :  { %v5457_v5 = vadd.f32 %v4900_v51, %v7667_v3  ;;  %v4868_v34 = vpop.f32.mrf.mxu2 }
 0x4a8   :  { %v4827_v35 = vpop.f32.mrf.mxu1  ;;  %v4903_v9 = vpop.f32.mrf.mxu3 }
 0x4a9   :  { %5496 = vst.msk [vmem:[%s7473_s4 + $0xd8] sm:$0xff] %vm67_vm0, %v5457_v5  ;;  %v4828_v43 = vadd.f32 %v4827_v35, %v4786_v22  ;;  %v7675_v5 = vld [vmem:[#allocation55_spill] sm:$0xff] }
 0x4ab   :  { %v4869_v7 = vadd.f32 %v4868_v34, %v4828_v43  ;;  %v3144_v34 = vadd.f32 %v7675_v5, %v3109_v58 }
 0x4ad   :  { %v4904_v62 = vadd.f32 %v4903_v9, %v4869_v7  ;;  %v4790_v42 = vpop.f32.mrf.mxu0 }
 0x4ae   :  { %v4791_v10 = vadd.f32 %v4790_v42, %v4750_v14  ;;  %v7676_v14 = vld [vmem:[#allocation44_spill] sm:$0xff] }
 0x4af   :  { %v5424_v59 = vsub.f32 %v7668_v44, %v4904_v62  ;;  %v4872_v29 = vpop.f32.mrf.mxu2  ;;  %v7677_v62 = vld [vmem:[#allocation48_spill] sm:$0xff] }
 0x4b0   :  { %v4833_v26 = vpop.f32.mrf.mxu1  ;;  %v4907_v28 = vpop.f32.mrf.mxu3  ;;  %v3097_v42 = vadd.f32 %v7677_v62, %v7676_v14 }
 0x4b1   :  { %5440 = vst.msk [vmem:[%s7473_s4 + $0x90] sm:$0xff] %vm67_vm0, %v5424_v59  ;;  %v4834_v33 = vadd.f32 %v4833_v26, %v4791_v10 }
 0x4b3   :  { %v4873_v46 = vadd.f32 %v4872_v29, %v4834_v33  ;;  %v7678_v33 = vld [vmem:[#allocation49_spill] sm:$0xff] }
 0x4b5   :  { %v4908_v50 = vadd.f32 %v4907_v28, %v4873_v46  ;;  %v4934_v49 = vpop.f32.mrf.mxu0  ;;  %v3132_v46 = vadd.f32 %v7678_v33, %v3097_v42 }
 0x4b7   :  { %v5425_v63 = vsub.f32 %v7669_v2, %v4908_v50  ;;  %v5027_v60 = vpop.f32.mrf.mxu2 }
 0x4b8   :  { %v4989_v40 = vpop.f32.mrf.mxu1  ;;  %v5067_v27 = vpop.f32.mrf.mxu3 }
 0x4b9   :  { %5441 = vst.msk [vmem:[%s7473_s4 + $0x98] sm:$0xff] %vm67_vm0, %v5425_v63  ;;  %v4990_v30 = vadd.f32 %v4989_v40, %v4934_v49  ;;  %v7679_v63 = vld [vmem:[#allocation45_spill] sm:$0xff] }
 0x4bb   :  { %v5028_v25 = vadd.f32 %v5027_v60, %v4990_v30  ;;  %v7680_v60 = vld [vmem:[#allocation50_spill] sm:$0xff] }
 0x4bc   :  { %v3101_v40 = vadd.f32 %v7680_v60, %v7679_v63 }
 0x4bd   :  { %v4942_v4 = vpop.f32.mrf.mxu0  ;;  %v5068_v38 = vadd.f32 %v5067_v27, %v5028_v25 }
 0x4bf   :  { %v5032_v31 = vpop.f32.mrf.mxu2 }
 0x4c0   :  { %v4993_v54 = vpop.f32.mrf.mxu1  ;;  %v5073_v1 = vpop.f32.mrf.mxu3 }
 0x4c1   :  { %v4994_v32 = vadd.f32 %v4993_v54, %v4942_v4 }
 0x4c3   :  { %v5033_v56 = vadd.f32 %v5032_v31, %v4994_v32 }
 0x4c5   :  { %v4950_v41 = vpop.f32.mrf.mxu0  ;;  %v5074_v52 = vadd.f32 %v5073_v1, %v5033_v56 }
 0x4c7   :  { %v5037_v55 = vpop.f32.mrf.mxu2 }
 0x4c8   :  { %v4997_v39 = vpop.f32.mrf.mxu1  ;;  %v5079_v47 = vpop.f32.mrf.mxu3 }
 0x4c9   :  { %v4998_v13 = vadd.f32 %v4997_v39, %v4950_v41  ;;  %v7681_v41 = vld [vmem:[#allocation51_spill] sm:$0xff] }
 0x4cb   :  { %v5038_v11 = vadd.f32 %v5037_v55, %v4998_v13  ;;  %v3136_v55 = vadd.f32 %v7681_v41, %v3101_v40 }
 0x4cd   :  { %v4958_v20 = vpop.f32.mrf.mxu0  ;;  %v5080_v43 = vadd.f32 %v5079_v47, %v5038_v11 }
 0x4cf   :  { %v5042_v16 = vpop.f32.mrf.mxu2 }
 0x4d0   :  { %v5001_v45 = vpop.f32.mrf.mxu1  ;;  %v5085_v12 = vpop.f32.mrf.mxu3 }
 0x4d1   :  { %v5002_v7 = vadd.f32 %v5001_v45, %v4958_v20 }
 0x4d3   :  { %v5043_v29 = vadd.f32 %v5042_v16, %v5002_v7 }
 0x4d5   :  { %v5112_v37 = vpop.f32.mrf.mxu0  ;;  %v5086_v2 = vadd.f32 %v5085_v12, %v5043_v29 }
 0x4d6   :  { %v5113_v8 = vadd.f32 %v5112_v37, %v5068_v38 }
 0x4d7   :  { %v5186_v15 = vpop.f32.mrf.mxu2 }
 0x4d8   :  { %v5147_v61 = vpop.f32.mrf.mxu1  ;;  %v5241_v21 = vpop.f32.mrf.mxu3 }
 0x4d9   :  { %v5148_v0 = vadd.f32 %v5147_v61, %v5113_v8  ;;  %v5242_v30 = vadd.f32 %v5241_v21, %v5186_v15  ;;  %v7682_v8 = vld [vmem:[#allocation58_spill] sm:$0xff] }
 0x4db   :  { %v5458_v53 = vadd.f32 %v5148_v0, %v3140_v48 }
 0x4dd   :  { %5497 = vst.msk [vmem:[%s7473_s4 + $0xe0] sm:$0xff] %vm67_vm0, %v5458_v53  ;;  %v5116_v24 = vpop.f32.mrf.mxu0 }
 0x4de   :  { %v5117_v6 = vadd.f32 %v5116_v24, %v5074_v52 }
 0x4df   :  { %v5194_v51 = vpop.f32.mrf.mxu2 }
 0x4e0   :  { %v5151_v22 = vpop.f32.mrf.mxu1  ;;  %v5245_v3 = vpop.f32.mrf.mxu3 }
 0x4e1   :  { %v5152_v35 = vadd.f32 %v5151_v22, %v5117_v6  ;;  %v5246_v23 = vadd.f32 %v5245_v3, %v5194_v51 }
 0x4e3   :  { %v5459_v9 = vadd.f32 %v5152_v35, %v3144_v34  ;;  %v7684_v35 = vld [vmem:[#allocation56_spill] sm:$0xff] }
 0x4e5   :  { %5498 = vst.msk [vmem:[%s7473_s4 + $0xe8] sm:$0xff] %vm67_vm0, %v5459_v9  ;;  %v5120_v10 = vpop.f32.mrf.mxu0 }
 0x4e6   :  { %v5121_v44 = vadd.f32 %v5120_v10, %v5080_v43 }
 0x4e7   :  { %v5202_v59 = vpop.f32.mrf.mxu2 }
 0x4e8   :  { %v5155_v26 = vpop.f32.mrf.mxu1  ;;  %v5249_v28 = vpop.f32.mrf.mxu3 }
 0x4e9   :  { %v5156_v50 = vadd.f32 %v5155_v26, %v5121_v44  ;;  %v5250_v0 = vadd.f32 %v5249_v28, %v5202_v59  ;;  %v7685_v44 = vld [vmem:[#allocation57_spill] sm:$0xff] }
 0x4eb   :  { %v5426_v49 = vsub.f32 %v3132_v46, %v5156_v50 }
 0x4ed   :  { %5442 = vst.msk [vmem:[%s7473_s4 + $0xa0] sm:$0xff] %vm67_vm0, %v5426_v49  ;;  %v5124_v27 = vpop.f32.mrf.mxu0 }
 0x4ee   :  { %v5125_v4 = vadd.f32 %v5124_v27, %v5086_v2 }
 0x4ef   :  { %v5210_v31 = vpop.f32.mrf.mxu2 }
 0x4f0   :  { %v5159_v54 = vpop.f32.mrf.mxu1  ;;  %v5253_v1 = vpop.f32.mrf.mxu3 }
 0x4f1   :  { %v5160_v39 = vadd.f32 %v5159_v54, %v5125_v4  ;;  %v5254_v22 = vadd.f32 %v5253_v1, %v5210_v31 }
 0x4f3   :  { %v5427_v47 = vsub.f32 %v3136_v55, %v5160_v39 }
 0x4f5   :  { %5443 = vst.msk [vmem:[%s7473_s4 + $0xa8] sm:$0xff] %vm67_vm0, %v5427_v47  ;;  %v5279_v20 = vpop.f32.mrf.mxu0 }
 0x4f6   :  { %v5280_v16 = vadd.f32 %v5279_v20, %v5242_v30 }
 0x4f7   :  { %v5364_v25 = vpop.f32.mrf.mxu2 }
 0x4f8   :  { %v5319_v45 = vpop.f32.mrf.mxu1  ;;  %v5399_v12 = vpop.f32.mrf.mxu3 }
 0x4f9   :  { %v5320_v38 = vadd.f32 %v5319_v45, %v5280_v16 }
 0x4fb   :  { %v5365_v32 = vadd.f32 %v5364_v25, %v5320_v38 }
 0x4fd   :  { %v5400_v18 = vadd.f32 %v5399_v12, %v5365_v32  ;;  %v5284_v19 = vpop.f32.mrf.mxu0 }
 0x4fe   :  { %v5285_v37 = vadd.f32 %v5284_v19, %v5246_v23 }
 0x4ff   :  { %v5460_v56 = vadd.f32 %v5400_v18, %v7682_v8  ;;  %v5368_v61 = vpop.f32.mrf.mxu2 }
 0x500   :  { %v5325_v15 = vpop.f32.mrf.mxu1  ;;  %v5403_v21 = vpop.f32.mrf.mxu3 }
 0x501   :  { %5499 = vst.msk [vmem:[%s7473_s4 + $0xf0] sm:$0xff] %vm67_vm0, %v5460_v56  ;;  %v5326_v36 = vadd.f32 %v5325_v15, %v5285_v37 }
 0x503   :  { %v5369_v48 = vadd.f32 %v5368_v61, %v5326_v36 }
 0x505   :  { %v5404_v53 = vadd.f32 %v5403_v21, %v5369_v48  ;;  %v5289_v52 = vpop.f32.mrf.mxu0 }
 0x506   :  { %v5290_v13 = vadd.f32 %v5289_v52, %v5250_v0 }
 0x507   :  { %v5461_v17 = vadd.f32 %v5404_v53, %v7683_v57  ;;  %v5372_v58 = vpop.f32.mrf.mxu2 }
 0x508   :  { %v5331_v24 = vpop.f32.mrf.mxu1  ;;  %v5407_v6 = vpop.f32.mrf.mxu3 }
 0x509   :  { %5500 = vst.msk [vmem:[%s7473_s4 + $0xf8] sm:$0xff] %vm67_vm0, %v5461_v17  ;;  %v5332_v51 = vadd.f32 %v5331_v24, %v5290_v13 }
 0x50b   :  { %v5373_v11 = vadd.f32 %v5372_v58, %v5332_v51 }
 0x50d   :  { %v5408_v3 = vadd.f32 %v5407_v6, %v5373_v11  ;;  %v5294_v5 = vpop.f32.mrf.mxu0 }
 0x50e   :  { %v5295_v34 = vadd.f32 %v5294_v5, %v5254_v22 }
 0x50f   :  { %v5428_v9 = vsub.f32 %v7684_v35, %v5408_v3  ;;  %v5376_v7 = vpop.f32.mrf.mxu2 }
 0x510   :  { %v5337_v43 = vpop.f32.mrf.mxu1  ;;  %v5411_v62 = vpop.f32.mrf.mxu3 }
 0x511   :  { %5444 = vst.msk [vmem:[%s7473_s4 + $0xb0] sm:$0xff] %vm67_vm0, %v5428_v9  ;;  %v5338_v14 = vadd.f32 %v5337_v43, %v5295_v34 }
 0x513   :  { %v5377_v42 = vadd.f32 %v5376_v7, %v5338_v14 }
 0x515   :  { %v5412_v10 = vadd.f32 %v5411_v62, %v5377_v42 }
 0x517   :  { %v5429_v59 = vsub.f32 %v7685_v44, %v5412_v10 }
 0x519   :  { %5445 = vst.msk [vmem:[%s7473_s4 + $0xb8] sm:$0xff] %vm67_vm0, %v5429_v59 }
 0x51a   :  { %5483 = vsyncpa [#allocation3], 1 }
 0x51b   :  { %5484 = vsyncpa [#allocation5], 1 }

</bundles_post_ra>
